<compile_context>
chip_gen: v5e
topology: v5e:2x2
jax: 0.10.0
libtpu: 0.0.40
codegen_flags: <defaults>
</compile_context>

<pallas_src>
import jax
import jax.numpy as jnp
from jax.experimental import pallas as pl
from jax.experimental.pallas import tpu as pltpu


_VMEM = pl.BlockSpec(memory_space=pltpu.MemorySpace.VMEM)


# ----------------------------------------------------------------------------
# One bidirectional LSTM layer on pre-projected gate inputs (values only).
# ----------------------------------------------------------------------------
def _bilstm_layer(xp, whh, fwd_mask, H, T, Bp):
    """xp      : (T*Bp, 8H) f32, x @ Wih + bias; row t*Bp+b is timestep t.
                 Columns gate-major/dir-minor: [i_f|i_b | f_f|f_b | o_f|o_b | g_f|g_b].
       whh     : (2H, 8H) bf16; rows [:H] (fwd h) feed fwd columns only,
                 rows [H:] (bwd h) feed bwd columns only.
       fwd_mask: (Bp, 8H) bool, True on forward-direction columns (hoisted).
       Returns (out_fwd, out_bwd): each (T*Bp, H) f32 in time-major row order.
    """
    H2, H4, H6 = 2 * H, 4 * H, 6 * H
    h = jnp.zeros((Bp, H2), jnp.float32)        # [h_fwd | h_bwd] as vreg values
    c = jnp.zeros((Bp, H2), jnp.float32)        # [c_fwd | c_bwd] as vreg values
    fwd_steps, bwd_steps = [], []

    # Fully unrolled: T is small & static, so the LLO scheduler sees everything.
    for t in range(T):
        tb = T - 1 - t                          # backward-direction time index
        # fwd columns take xp[time t], bwd columns take xp[time T-1-t]:
        # a single VPU select on (Bp, 8H), no data movement.
        x_t = jnp.where(fwd_mask,
                        xp[t * Bp:(t + 1) * Bp, :],
                        xp[tb * Bp:(tb + 1) * Bp, :])
        gates = x_t + jnp.dot(h.astype(whh.dtype), whh,
                              preferred_element_type=jnp.float32)   # (Bp, 8H)
        sig = jax.nn.sigmoid(gates[:, :H6])     # i|f|o, both directions at once
        g = jnp.tanh(gates[:, H6:])             # g,     both directions at once
        c = sig[:, H2:H4] * c + sig[:, :H2] * g
        h = sig[:, H4:H6] * jnp.tanh(c)
        fwd_steps.append(h[:, :H])              # fwd output for time t
        bwd_steps.append(h[:, H:])              # bwd output for time T-1-t
    out_fwd = jnp.concatenate(fwd_steps, axis=0)         # (T*Bp, H), time order
    out_bwd = jnp.concatenate(bwd_steps[::-1], axis=0)   # (T*Bp, H), time order
    return out_fwd, out_bwd


# ----------------------------------------------------------------------------
# Fully fused forward kernel
# ----------------------------------------------------------------------------
def rnn_kernel(x_ref,
               wih0_ref, whh0_ref, bl0_ref,
               wih1_ref, whh1_ref, bl1_ref,
               w1_ref, bf1_ref, w2_ref, bf2_ref,
               out_ref):
    Bp = out_ref.shape[0]
    T = x_ref.shape[0] // Bp
    H = whh0_ref.shape[0] // 2

    # Hoisted lane mask: True on forward-direction gate columns.
    col = jax.lax.broadcasted_iota(jnp.int32, (Bp, 8 * H), 1)
    fwd_mask = (col % (2 * H)) < H

    # ---- Layer 0: hoisted input projection (all T, both dirs, bias folded).
    xp0 = jnp.dot(x_ref[...], wih0_ref[...],
                  preferred_element_type=jnp.float32) + bl0_ref[...]
    f0, b0 = _bilstm_layer(xp0, whh0_ref[...], fwd_mask, H, T, Bp)

    # ---- Layer 1: split-row projection (fwd rows / bwd rows of Wih) avoids a
    #      lane concat of the layer-0 fwd/bwd halves.
    wih1 = wih1_ref[...]
    xp1 = (jnp.dot(f0.astype(wih1.dtype), wih1[:H, :],
                   preferred_element_type=jnp.float32)
           + jnp.dot(b0.astype(wih1.dtype), wih1[H:, :],
                     preferred_element_type=jnp.float32)
           + bl1_ref[...])
    f1, b1 = _bilstm_layer(xp1, whh1_ref[...], fwd_mask, H, T, Bp)

    # ---- Head: relu -> fc1 -> relu -> reshape(Bp, T*F) -> fc2  (dropout = id).
    w1 = w1_ref[...]
    h1 = (jnp.dot(jnp.maximum(f1, 0.0).astype(w1.dtype), w1[:H, :],
                  preferred_element_type=jnp.float32)
          + jnp.dot(jnp.maximum(b1, 0.0).astype(w1.dtype), w1[H:, :],
                    preferred_element_type=jnp.float32)
          + bf1_ref[...])
    h1 = jnp.maximum(h1, 0.0)                                # (T*Bp, F)

    # Assemble the batch-major (Bp, T*F) operand once (lane concat), then a
    # single fc2 matmul instead of T serialized (Bp, F) @ (F, 3) MXU pushes.
    h1_bm = jnp.concatenate([h1[t * Bp:(t + 1) * Bp, :] for t in range(T)],
                            axis=1)                          # (Bp, T*F)
    out_ref[...] = jnp.dot(h1_bm, w2_ref[...],
                           preferred_element_type=jnp.float32) + bf2_ref[...]


# ----------------------------------------------------------------------------
# Parameter construction (deterministic, synthetic)
# ----------------------------------------------------------------------------
def init_params(key, vocab_size, d_model, max_words):
    H = d_model
    F = d_model >> 2
    T = max_words
    cnt = [0]

    def w(shape):
        cnt[0] += 1
        return 0.1 * jax.random.normal(jax.random.fold_in(key, cnt[0]), shape,
                                       dtype=jnp.float32)

    def fused_bilstm(din):
        # Per-direction gate order [i, f, o, g], packed gate-major/dir-minor:
        # columns [i_f|i_b | f_f|f_b | o_f|o_b | g_f|g_b].
        # NOTE: loading a real nn.LSTM checkpoint requires permuting PyTorch's
        # [i, f, g, o] gate blocks and summing b_ih + b_hh before this packing.
        wih_cols, b_cols = [], []
        whh = jnp.zeros((2 * H, 8 * H), jnp.float32)
        for gi in range(4):
            wih_cols += [w((din, H)), w((din, H))]          # fwd, bwd
            b_cols += [w((1, H)), w((1, H))]
            whh = whh.at[:H, gi * 2 * H:gi * 2 * H + H].set(w((H, H)))        # fwd
            whh = whh.at[H:, gi * 2 * H + H:(gi + 1) * 2 * H].set(w((H, H)))  # bwd
        wih = jnp.concatenate(wih_cols, axis=1).astype(jnp.bfloat16)  # (din, 8H)
        bias = jnp.concatenate(b_cols, axis=1)                        # (1, 8H) f32
        return wih, whh.astype(jnp.bfloat16), bias

    return {
        "emb": w((vocab_size, d_model)),
        "l0": fused_bilstm(d_model),            # layer 0 input = d_model
        "l1": fused_bilstm(2 * d_model),        # layer 1 input = 2*d_model
        "fc1_w": w((2 * d_model, F)).astype(jnp.bfloat16),
        "fc1_b": jnp.zeros((1, F), jnp.float32),
        # fc2 weight (T*F, 3): row t*F + f matches the batch_first (B, T, F)
        # flatten order of the PyTorch reshape.
        "fc2_w": w((T * F, 3)),
        "fc2_b": jnp.zeros((1, 3), jnp.float32),
    }


# ----------------------------------------------------------------------------
# Forward pass (eval mode: dropout is identity)
# ----------------------------------------------------------------------------
def rnn_forward(tokens, params):
    B, T = tokens.shape
    D = params["emb"].shape[1]
    Bp = ((B + 7) // 8) * 8          # pad batch to 8 sublanes for aligned slices
    if Bp != B:
        tokens = jnp.pad(tokens, ((0, Bp - B), (0, 0)))
    # Embedding gather directly in time-major row order (row = t*Bp + b), cast
    # to bf16 so the only activation DMA into the kernel is half-size.
    # TODO(synk): could move the gather in-kernel via scalar-prefetched ids.
    x = params["emb"][tokens.T].reshape(T * Bp, D).astype(jnp.bfloat16)

    out = pl.pallas_call(
        rnn_kernel,
        out_shape=jax.ShapeDtypeStruct((Bp, 3), jnp.float32),
        in_specs=[_VMEM] * 11,
        out_specs=_VMEM,
    )(x, *params["l0"], *params["l1"],
      params["fc1_w"], params["fc1_b"], params["fc2_w"], params["fc2_b"])
    return out[:B]


# ----------------------------------------------------------------------------
if __name__ == "__main__":
    vocab_size = 50
    d_model = 32
    max_words = 8    # sequence length
    batch = 2

    key = jax.random.PRNGKey(0)
    k_tok, k_par = jax.random.split(key)

    tokens = jax.random.randint(k_tok, (batch, max_words), 0, vocab_size,
                                dtype=jnp.int32)
    params = init_params(k_par, vocab_size, d_model, max_words)

    fwd = jax.jit(rnn_forward)
    out = jax.block_until_ready(fwd(tokens, params))

    assert out.shape == (batch, 3), out.shape
    assert bool(jnp.all(jnp.isfinite(out)))
    print("KERNEL_OK")
</pallas_src>

<mosaic_0001>
module attributes {stable_mosaic.version = 11 : i64} {
  func.func @rnn_kernel(%arg0: memref<64x32xbf16, #tpu.memory_space<vmem>>, %arg1: memref<32x256xbf16, #tpu.memory_space<vmem>>, %arg2: memref<64x256xbf16, #tpu.memory_space<vmem>>, %arg3: memref<1x256xf32, #tpu.memory_space<vmem>>, %arg4: memref<64x256xbf16, #tpu.memory_space<vmem>>, %arg5: memref<64x256xbf16, #tpu.memory_space<vmem>>, %arg6: memref<1x256xf32, #tpu.memory_space<vmem>>, %arg7: memref<64x8xbf16, #tpu.memory_space<vmem>>, %arg8: memref<1x8xf32, #tpu.memory_space<vmem>>, %arg9: memref<64x3xf32, #tpu.memory_space<vmem>>, %arg10: memref<1x3xf32, #tpu.memory_space<vmem>>, %arg11: memref<8x3xf32, #tpu.memory_space<vmem>>) attributes {dimension_semantics = [], scalar_prefetch = 0 : i64, scratch_operands = 0 : i64, tpu.core_type = #tpu.core_type<tc>} {
    %0 = tpu.iota {dimensions = array<i32: 1>} : vector<8x256xi32>
    %c64_i32 = arith.constant 64 : i32
    %c0_i32 = arith.constant 0 : i32
    %1 = arith.cmpi eq, %c64_i32, %c0_i32 : i32
    %c1_i32 = arith.constant 1 : i32
    %2 = arith.select %1, %c1_i32, %c64_i32 : i32
    %3 = vector.broadcast %2 : i32 to vector<8x256xi32>
    %4 = arith.remsi %0, %3 : vector<8x256xi32>
    %c0_i32_0 = arith.constant 0 : i32
    %5 = vector.broadcast %c0_i32_0 : i32 to vector<8x256xi32>
    %6 = arith.cmpi ne, %4, %5 : vector<8x256xi32>
    %c0_i32_1 = arith.constant 0 : i32
    %7 = vector.broadcast %c0_i32_1 : i32 to vector<8x256xi32>
    %8 = arith.cmpi slt, %4, %7 : vector<8x256xi32>
    %c0_i32_2 = arith.constant 0 : i32
    %9 = arith.cmpi slt, %2, %c0_i32_2 : i32
    %10 = vector.broadcast %9 : i1 to vector<8x256xi1>
    %11 = vector.broadcast %10 : vector<8x256xi1> to vector<8x256xi1>
    %12 = arith.xori %8, %11 : vector<8x256xi1>
    %13 = arith.andi %12, %6 : vector<8x256xi1>
    %14 = vector.broadcast %2 : i32 to vector<8x256xi32>
    %15 = arith.addi %4, %14 : vector<8x256xi32>
    %16 = arith.select %13, %15, %4 : vector<8x256xi1>, vector<8x256xi32>
    %c32_i32 = arith.constant 32 : i32
    %17 = vector.broadcast %c32_i32 : i32 to vector<8x256xi32>
    %18 = arith.cmpi slt, %16, %17 : vector<8x256xi32>
    %c0 = arith.constant 0 : index
    %c0_3 = arith.constant 0 : index
    %19 = vector.load %arg0[%c0, %c0_3] : memref<64x32xbf16, #tpu.memory_space<vmem>>, vector<64x32xbf16>
    %c0_4 = arith.constant 0 : index
    %c0_5 = arith.constant 0 : index
    %20 = vector.load %arg1[%c0_4, %c0_5] : memref<32x256xbf16, #tpu.memory_space<vmem>>, vector<32x256xbf16>
    %cst = arith.constant dense<0.000000e+00> : vector<64x256xf32>
    %21 = tpu.matmul %19, %20, %cst {dimension_numbers = #tpu.dot_dimension_numbers<[1], [0], [0], [1], [0, 0, 1, 1], [], []>} : vector<64x32xbf16>, vector<32x256xbf16>, vector<64x256xf32> -> vector<64x256xf32>
    %c0_6 = arith.constant 0 : index
    %c0_7 = arith.constant 0 : index
    %22 = vector.load %arg3[%c0_6, %c0_7] : memref<1x256xf32, #tpu.memory_space<vmem>>, vector<1x256xf32>
    %23 = vector.broadcast %22 : vector<1x256xf32> to vector<64x256xf32>
    %24 = arith.addf %21, %23 : vector<64x256xf32>
    %c0_8 = arith.constant 0 : index
    %c0_9 = arith.constant 0 : index
    %25 = vector.load %arg2[%c0_8, %c0_9] : memref<64x256xbf16, #tpu.memory_space<vmem>>, vector<64x256xbf16>
    %cst_10 = arith.constant 0.000000e+00 : f32
    %26 = vector.broadcast %cst_10 : f32 to vector<8x64xf32>
    %cst_11 = arith.constant 0.000000e+00 : f32
    %27 = vector.broadcast %cst_11 : f32 to vector<8x64xf32>
    %28 = vector.extract_strided_slice %24 {offsets = [0, 0], sizes = [8, 256], strides = [1, 1]} : vector<64x256xf32> to vector<8x256xf32>
    %29 = vector.extract_strided_slice %24 {offsets = [56, 0], sizes = [8, 256], strides = [1, 1]} : vector<64x256xf32> to vector<8x256xf32>
    %30 = arith.select %18, %28, %29 : vector<8x256xi1>, vector<8x256xf32>
    %31 = arith.truncf %26 : vector<8x64xf32> to vector<8x64xbf16>
    %cst_12 = arith.constant dense<0.000000e+00> : vector<8x256xf32>
    %32 = tpu.matmul %31, %25, %cst_12 {dimension_numbers = #tpu.dot_dimension_numbers<[1], [0], [0], [1], [0, 0, 1, 1], [], []>} : vector<8x64xbf16>, vector<64x256xbf16>, vector<8x256xf32> -> vector<8x256xf32>
    %33 = arith.addf %30, %32 : vector<8x256xf32>
    %34 = vector.extract_strided_slice %33 {offsets = [0, 0], sizes = [8, 192], strides = [1, 1]} : vector<8x256xf32> to vector<8x192xf32>
    %35 = arith.negf %34 : vector<8x192xf32>
    %36 = math.exp %35 : vector<8x192xf32>
    %cst_13 = arith.constant 1.000000e+00 : f32
    %37 = vector.broadcast %cst_13 : f32 to vector<8x192xf32>
    %38 = arith.addf %37, %36 : vector<8x192xf32>
    %39 = arith.divf %37, %38 : vector<8x192xf32>
    %40 = vector.extract_strided_slice %33 {offsets = [0, 192], sizes = [8, 64], strides = [1, 1]} : vector<8x256xf32> to vector<8x64xf32>
    %41 = math.tanh %40 : vector<8x64xf32>
    %42 = vector.extract_strided_slice %39 {offsets = [0, 64], sizes = [8, 64], strides = [1, 1]} : vector<8x192xf32> to vector<8x64xf32>
    %43 = arith.mulf %42, %27 : vector<8x64xf32>
    %44 = vector.extract_strided_slice %39 {offsets = [0, 0], sizes = [8, 64], strides = [1, 1]} : vector<8x192xf32> to vector<8x64xf32>
    %45 = arith.mulf %44, %41 : vector<8x64xf32>
    %46 = arith.addf %43, %45 : vector<8x64xf32>
    %47 = vector.extract_strided_slice %39 {offsets = [0, 128], sizes = [8, 64], strides = [1, 1]} : vector<8x192xf32> to vector<8x64xf32>
    %48 = math.tanh %46 : vector<8x64xf32>
    %49 = arith.mulf %47, %48 : vector<8x64xf32>
    %50 = vector.extract_strided_slice %49 {offsets = [0, 0], sizes = [8, 32], strides = [1, 1]} : vector<8x64xf32> to vector<8x32xf32>
    %51 = vector.extract_strided_slice %49 {offsets = [0, 32], sizes = [8, 32], strides = [1, 1]} : vector<8x64xf32> to vector<8x32xf32>
    %52 = vector.extract_strided_slice %24 {offsets = [8, 0], sizes = [8, 256], strides = [1, 1]} : vector<64x256xf32> to vector<8x256xf32>
    %53 = vector.extract_strided_slice %24 {offsets = [48, 0], sizes = [8, 256], strides = [1, 1]} : vector<64x256xf32> to vector<8x256xf32>
    %54 = arith.select %18, %52, %53 : vector<8x256xi1>, vector<8x256xf32>
    %55 = arith.truncf %49 : vector<8x64xf32> to vector<8x64xbf16>
    %cst_14 = arith.constant dense<0.000000e+00> : vector<8x256xf32>
    %56 = tpu.matmul %55, %25, %cst_14 {dimension_numbers = #tpu.dot_dimension_numbers<[1], [0], [0], [1], [0, 0, 1, 1], [], []>} : vector<8x64xbf16>, vector<64x256xbf16>, vector<8x256xf32> -> vector<8x256xf32>
    %57 = arith.addf %54, %56 : vector<8x256xf32>
    %58 = vector.extract_strided_slice %57 {offsets = [0, 0], sizes = [8, 192], strides = [1, 1]} : vector<8x256xf32> to vector<8x192xf32>
    %59 = arith.negf %58 : vector<8x192xf32>
    %60 = math.exp %59 : vector<8x192xf32>
    %cst_15 = arith.constant 1.000000e+00 : f32
    %61 = vector.broadcast %cst_15 : f32 to vector<8x192xf32>
    %62 = arith.addf %61, %60 : vector<8x192xf32>
    %63 = arith.divf %61, %62 : vector<8x192xf32>
    %64 = vector.extract_strided_slice %57 {offsets = [0, 192], sizes = [8, 64], strides = [1, 1]} : vector<8x256xf32> to vector<8x64xf32>
    %65 = math.tanh %64 : vector<8x64xf32>
    %66 = vector.extract_strided_slice %63 {offsets = [0, 64], sizes = [8, 64], strides = [1, 1]} : vector<8x192xf32> to vector<8x64xf32>
    %67 = arith.mulf %66, %46 : vector<8x64xf32>
    %68 = vector.extract_strided_slice %63 {offsets = [0, 0], sizes = [8, 64], strides = [1, 1]} : vector<8x192xf32> to vector<8x64xf32>
    %69 = arith.mulf %68, %65 : vector<8x64xf32>
    %70 = arith.addf %67, %69 : vector<8x64xf32>
    %71 = vector.extract_strided_slice %63 {offsets = [0, 128], sizes = [8, 64], strides = [1, 1]} : vector<8x192xf32> to vector<8x64xf32>
    %72 = math.tanh %70 : vector<8x64xf32>
    %73 = arith.mulf %71, %72 : vector<8x64xf32>
    %74 = vector.extract_strided_slice %73 {offsets = [0, 0], sizes = [8, 32], strides = [1, 1]} : vector<8x64xf32> to vector<8x32xf32>
    %75 = vector.extract_strided_slice %73 {offsets = [0, 32], sizes = [8, 32], strides = [1, 1]} : vector<8x64xf32> to vector<8x32xf32>
    %76 = vector.extract_strided_slice %24 {offsets = [16, 0], sizes = [8, 256], strides = [1, 1]} : vector<64x256xf32> to vector<8x256xf32>
    %77 = vector.extract_strided_slice %24 {offsets = [40, 0], sizes = [8, 256], strides = [1, 1]} : vector<64x256xf32> to vector<8x256xf32>
    %78 = arith.select %18, %76, %77 : vector<8x256xi1>, vector<8x256xf32>
    %79 = arith.truncf %73 : vector<8x64xf32> to vector<8x64xbf16>
    %cst_16 = arith.constant dense<0.000000e+00> : vector<8x256xf32>
    %80 = tpu.matmul %79, %25, %cst_16 {dimension_numbers = #tpu.dot_dimension_numbers<[1], [0], [0], [1], [0, 0, 1, 1], [], []>} : vector<8x64xbf16>, vector<64x256xbf16>, vector<8x256xf32> -> vector<8x256xf32>
    %81 = arith.addf %78, %80 : vector<8x256xf32>
    %82 = vector.extract_strided_slice %81 {offsets = [0, 0], sizes = [8, 192], strides = [1, 1]} : vector<8x256xf32> to vector<8x192xf32>
    %83 = arith.negf %82 : vector<8x192xf32>
    %84 = math.exp %83 : vector<8x192xf32>
    %cst_17 = arith.constant 1.000000e+00 : f32
    %85 = vector.broadcast %cst_17 : f32 to vector<8x192xf32>
    %86 = arith.addf %85, %84 : vector<8x192xf32>
    %87 = arith.divf %85, %86 : vector<8x192xf32>
    %88 = vector.extract_strided_slice %81 {offsets = [0, 192], sizes = [8, 64], strides = [1, 1]} : vector<8x256xf32> to vector<8x64xf32>
    %89 = math.tanh %88 : vector<8x64xf32>
    %90 = vector.extract_strided_slice %87 {offsets = [0, 64], sizes = [8, 64], strides = [1, 1]} : vector<8x192xf32> to vector<8x64xf32>
    %91 = arith.mulf %90, %70 : vector<8x64xf32>
    %92 = vector.extract_strided_slice %87 {offsets = [0, 0], sizes = [8, 64], strides = [1, 1]} : vector<8x192xf32> to vector<8x64xf32>
    %93 = arith.mulf %92, %89 : vector<8x64xf32>
    %94 = arith.addf %91, %93 : vector<8x64xf32>
    %95 = vector.extract_strided_slice %87 {offsets = [0, 128], sizes = [8, 64], strides = [1, 1]} : vector<8x192xf32> to vector<8x64xf32>
    %96 = math.tanh %94 : vector<8x64xf32>
    %97 = arith.mulf %95, %96 : vector<8x64xf32>
    %98 = vector.extract_strided_slice %97 {offsets = [0, 0], sizes = [8, 32], strides = [1, 1]} : vector<8x64xf32> to vector<8x32xf32>
    %99 = vector.extract_strided_slice %97 {offsets = [0, 32], sizes = [8, 32], strides = [1, 1]} : vector<8x64xf32> to vector<8x32xf32>
    %100 = vector.extract_strided_slice %24 {offsets = [24, 0], sizes = [8, 256], strides = [1, 1]} : vector<64x256xf32> to vector<8x256xf32>
    %101 = vector.extract_strided_slice %24 {offsets = [32, 0], sizes = [8, 256], strides = [1, 1]} : vector<64x256xf32> to vector<8x256xf32>
    %102 = arith.select %18, %100, %101 : vector<8x256xi1>, vector<8x256xf32>
    %103 = arith.truncf %97 : vector<8x64xf32> to vector<8x64xbf16>
    %cst_18 = arith.constant dense<0.000000e+00> : vector<8x256xf32>
    %104 = tpu.matmul %103, %25, %cst_18 {dimension_numbers = #tpu.dot_dimension_numbers<[1], [0], [0], [1], [0, 0, 1, 1], [], []>} : vector<8x64xbf16>, vector<64x256xbf16>, vector<8x256xf32> -> vector<8x256xf32>
    %105 = arith.addf %102, %104 : vector<8x256xf32>
    %106 = vector.extract_strided_slice %105 {offsets = [0, 0], sizes = [8, 192], strides = [1, 1]} : vector<8x256xf32> to vector<8x192xf32>
    %107 = arith.negf %106 : vector<8x192xf32>
    %108 = math.exp %107 : vector<8x192xf32>
    %cst_19 = arith.constant 1.000000e+00 : f32
    %109 = vector.broadcast %cst_19 : f32 to vector<8x192xf32>
    %110 = arith.addf %109, %108 : vector<8x192xf32>
    %111 = arith.divf %109, %110 : vector<8x192xf32>
    %112 = vector.extract_strided_slice %105 {offsets = [0, 192], sizes = [8, 64], strides = [1, 1]} : vector<8x256xf32> to vector<8x64xf32>
    %113 = math.tanh %112 : vector<8x64xf32>
    %114 = vector.extract_strided_slice %111 {offsets = [0, 64], sizes = [8, 64], strides = [1, 1]} : vector<8x192xf32> to vector<8x64xf32>
    %115 = arith.mulf %114, %94 : vector<8x64xf32>
    %116 = vector.extract_strided_slice %111 {offsets = [0, 0], sizes = [8, 64], strides = [1, 1]} : vector<8x192xf32> to vector<8x64xf32>
    %117 = arith.mulf %116, %113 : vector<8x64xf32>
    %118 = arith.addf %115, %117 : vector<8x64xf32>
    %119 = vector.extract_strided_slice %111 {offsets = [0, 128], sizes = [8, 64], strides = [1, 1]} : vector<8x192xf32> to vector<8x64xf32>
    %120 = math.tanh %118 : vector<8x64xf32>
    %121 = arith.mulf %119, %120 : vector<8x64xf32>
    %122 = vector.extract_strided_slice %121 {offsets = [0, 0], sizes = [8, 32], strides = [1, 1]} : vector<8x64xf32> to vector<8x32xf32>
    %123 = vector.extract_strided_slice %121 {offsets = [0, 32], sizes = [8, 32], strides = [1, 1]} : vector<8x64xf32> to vector<8x32xf32>
    %124 = vector.extract_strided_slice %24 {offsets = [32, 0], sizes = [8, 256], strides = [1, 1]} : vector<64x256xf32> to vector<8x256xf32>
    %125 = vector.extract_strided_slice %24 {offsets = [24, 0], sizes = [8, 256], strides = [1, 1]} : vector<64x256xf32> to vector<8x256xf32>
    %126 = arith.select %18, %124, %125 : vector<8x256xi1>, vector<8x256xf32>
    %127 = arith.truncf %121 : vector<8x64xf32> to vector<8x64xbf16>
    %cst_20 = arith.constant dense<0.000000e+00> : vector<8x256xf32>
    %128 = tpu.matmul %127, %25, %cst_20 {dimension_numbers = #tpu.dot_dimension_numbers<[1], [0], [0], [1], [0, 0, 1, 1], [], []>} : vector<8x64xbf16>, vector<64x256xbf16>, vector<8x256xf32> -> vector<8x256xf32>
    %129 = arith.addf %126, %128 : vector<8x256xf32>
    %130 = vector.extract_strided_slice %129 {offsets = [0, 0], sizes = [8, 192], strides = [1, 1]} : vector<8x256xf32> to vector<8x192xf32>
    %131 = arith.negf %130 : vector<8x192xf32>
    %132 = math.exp %131 : vector<8x192xf32>
    %cst_21 = arith.constant 1.000000e+00 : f32
    %133 = vector.broadcast %cst_21 : f32 to vector<8x192xf32>
    %134 = arith.addf %133, %132 : vector<8x192xf32>
    %135 = arith.divf %133, %134 : vector<8x192xf32>
    %136 = vector.extract_strided_slice %129 {offsets = [0, 192], sizes = [8, 64], strides = [1, 1]} : vector<8x256xf32> to vector<8x64xf32>
    %137 = math.tanh %136 : vector<8x64xf32>
    %138 = vector.extract_strided_slice %135 {offsets = [0, 64], sizes = [8, 64], strides = [1, 1]} : vector<8x192xf32> to vector<8x64xf32>
    %139 = arith.mulf %138, %118 : vector<8x64xf32>
    %140 = vector.extract_strided_slice %135 {offsets = [0, 0], sizes = [8, 64], strides = [1, 1]} : vector<8x192xf32> to vector<8x64xf32>
    %141 = arith.mulf %140, %137 : vector<8x64xf32>
    %142 = arith.addf %139, %141 : vector<8x64xf32>
    %143 = vector.extract_strided_slice %135 {offsets = [0, 128], sizes = [8, 64], strides = [1, 1]} : vector<8x192xf32> to vector<8x64xf32>
    %144 = math.tanh %142 : vector<8x64xf32>
    %145 = arith.mulf %143, %144 : vector<8x64xf32>
    %146 = vector.extract_strided_slice %145 {offsets = [0, 0], sizes = [8, 32], strides = [1, 1]} : vector<8x64xf32> to vector<8x32xf32>
    %147 = vector.extract_strided_slice %145 {offsets = [0, 32], sizes = [8, 32], strides = [1, 1]} : vector<8x64xf32> to vector<8x32xf32>
    %148 = vector.extract_strided_slice %24 {offsets = [40, 0], sizes = [8, 256], strides = [1, 1]} : vector<64x256xf32> to vector<8x256xf32>
    %149 = vector.extract_strided_slice %24 {offsets = [16, 0], sizes = [8, 256], strides = [1, 1]} : vector<64x256xf32> to vector<8x256xf32>
    %150 = arith.select %18, %148, %149 : vector<8x256xi1>, vector<8x256xf32>
    %151 = arith.truncf %145 : vector<8x64xf32> to vector<8x64xbf16>
    %cst_22 = arith.constant dense<0.000000e+00> : vector<8x256xf32>
    %152 = tpu.matmul %151, %25, %cst_22 {dimension_numbers = #tpu.dot_dimension_numbers<[1], [0], [0], [1], [0, 0, 1, 1], [], []>} : vector<8x64xbf16>, vector<64x256xbf16>, vector<8x256xf32> -> vector<8x256xf32>
    %153 = arith.addf %150, %152 : vector<8x256xf32>
    %154 = vector.extract_strided_slice %153 {offsets = [0, 0], sizes = [8, 192], strides = [1, 1]} : vector<8x256xf32> to vector<8x192xf32>
    %155 = arith.negf %154 : vector<8x192xf32>
    %156 = math.exp %155 : vector<8x192xf32>
    %cst_23 = arith.constant 1.000000e+00 : f32
    %157 = vector.broadcast %cst_23 : f32 to vector<8x192xf32>
    %158 = arith.addf %157, %156 : vector<8x192xf32>
    %159 = arith.divf %157, %158 : vector<8x192xf32>
    %160 = vector.extract_strided_slice %153 {offsets = [0, 192], sizes = [8, 64], strides = [1, 1]} : vector<8x256xf32> to vector<8x64xf32>
    %161 = math.tanh %160 : vector<8x64xf32>
    %162 = vector.extract_strided_slice %159 {offsets = [0, 64], sizes = [8, 64], strides = [1, 1]} : vector<8x192xf32> to vector<8x64xf32>
    %163 = arith.mulf %162, %142 : vector<8x64xf32>
    %164 = vector.extract_strided_slice %159 {offsets = [0, 0], sizes = [8, 64], strides = [1, 1]} : vector<8x192xf32> to vector<8x64xf32>
    %165 = arith.mulf %164, %161 : vector<8x64xf32>
    %166 = arith.addf %163, %165 : vector<8x64xf32>
    %167 = vector.extract_strided_slice %159 {offsets = [0, 128], sizes = [8, 64], strides = [1, 1]} : vector<8x192xf32> to vector<8x64xf32>
    %168 = math.tanh %166 : vector<8x64xf32>
    %169 = arith.mulf %167, %168 : vector<8x64xf32>
    %170 = vector.extract_strided_slice %169 {offsets = [0, 0], sizes = [8, 32], strides = [1, 1]} : vector<8x64xf32> to vector<8x32xf32>
    %171 = vector.extract_strided_slice %169 {offsets = [0, 32], sizes = [8, 32], strides = [1, 1]} : vector<8x64xf32> to vector<8x32xf32>
    %172 = vector.extract_strided_slice %24 {offsets = [48, 0], sizes = [8, 256], strides = [1, 1]} : vector<64x256xf32> to vector<8x256xf32>
    %173 = vector.extract_strided_slice %24 {offsets = [8, 0], sizes = [8, 256], strides = [1, 1]} : vector<64x256xf32> to vector<8x256xf32>
    %174 = arith.select %18, %172, %173 : vector<8x256xi1>, vector<8x256xf32>
    %175 = arith.truncf %169 : vector<8x64xf32> to vector<8x64xbf16>
    %cst_24 = arith.constant dense<0.000000e+00> : vector<8x256xf32>
    %176 = tpu.matmul %175, %25, %cst_24 {dimension_numbers = #tpu.dot_dimension_numbers<[1], [0], [0], [1], [0, 0, 1, 1], [], []>} : vector<8x64xbf16>, vector<64x256xbf16>, vector<8x256xf32> -> vector<8x256xf32>
    %177 = arith.addf %174, %176 : vector<8x256xf32>
    %178 = vector.extract_strided_slice %177 {offsets = [0, 0], sizes = [8, 192], strides = [1, 1]} : vector<8x256xf32> to vector<8x192xf32>
    %179 = arith.negf %178 : vector<8x192xf32>
    %180 = math.exp %179 : vector<8x192xf32>
    %cst_25 = arith.constant 1.000000e+00 : f32
    %181 = vector.broadcast %cst_25 : f32 to vector<8x192xf32>
    %182 = arith.addf %181, %180 : vector<8x192xf32>
    %183 = arith.divf %181, %182 : vector<8x192xf32>
    %184 = vector.extract_strided_slice %177 {offsets = [0, 192], sizes = [8, 64], strides = [1, 1]} : vector<8x256xf32> to vector<8x64xf32>
    %185 = math.tanh %184 : vector<8x64xf32>
    %186 = vector.extract_strided_slice %183 {offsets = [0, 64], sizes = [8, 64], strides = [1, 1]} : vector<8x192xf32> to vector<8x64xf32>
    %187 = arith.mulf %186, %166 : vector<8x64xf32>
    %188 = vector.extract_strided_slice %183 {offsets = [0, 0], sizes = [8, 64], strides = [1, 1]} : vector<8x192xf32> to vector<8x64xf32>
    %189 = arith.mulf %188, %185 : vector<8x64xf32>
    %190 = arith.addf %187, %189 : vector<8x64xf32>
    %191 = vector.extract_strided_slice %183 {offsets = [0, 128], sizes = [8, 64], strides = [1, 1]} : vector<8x192xf32> to vector<8x64xf32>
    %192 = math.tanh %190 : vector<8x64xf32>
    %193 = arith.mulf %191, %192 : vector<8x64xf32>
    %194 = vector.extract_strided_slice %193 {offsets = [0, 0], sizes = [8, 32], strides = [1, 1]} : vector<8x64xf32> to vector<8x32xf32>
    %195 = vector.extract_strided_slice %193 {offsets = [0, 32], sizes = [8, 32], strides = [1, 1]} : vector<8x64xf32> to vector<8x32xf32>
    %196 = vector.extract_strided_slice %24 {offsets = [56, 0], sizes = [8, 256], strides = [1, 1]} : vector<64x256xf32> to vector<8x256xf32>
    %197 = vector.extract_strided_slice %24 {offsets = [0, 0], sizes = [8, 256], strides = [1, 1]} : vector<64x256xf32> to vector<8x256xf32>
    %198 = arith.select %18, %196, %197 : vector<8x256xi1>, vector<8x256xf32>
    %199 = arith.truncf %193 : vector<8x64xf32> to vector<8x64xbf16>
    %cst_26 = arith.constant dense<0.000000e+00> : vector<8x256xf32>
    %200 = tpu.matmul %199, %25, %cst_26 {dimension_numbers = #tpu.dot_dimension_numbers<[1], [0], [0], [1], [0, 0, 1, 1], [], []>} : vector<8x64xbf16>, vector<64x256xbf16>, vector<8x256xf32> -> vector<8x256xf32>
    %201 = arith.addf %198, %200 : vector<8x256xf32>
    %202 = vector.extract_strided_slice %201 {offsets = [0, 0], sizes = [8, 192], strides = [1, 1]} : vector<8x256xf32> to vector<8x192xf32>
    %203 = arith.negf %202 : vector<8x192xf32>
    %204 = math.exp %203 : vector<8x192xf32>
    %cst_27 = arith.constant 1.000000e+00 : f32
    %205 = vector.broadcast %cst_27 : f32 to vector<8x192xf32>
    %206 = arith.addf %205, %204 : vector<8x192xf32>
    %207 = arith.divf %205, %206 : vector<8x192xf32>
    %208 = vector.extract_strided_slice %201 {offsets = [0, 192], sizes = [8, 64], strides = [1, 1]} : vector<8x256xf32> to vector<8x64xf32>
    %209 = math.tanh %208 : vector<8x64xf32>
    %210 = vector.extract_strided_slice %207 {offsets = [0, 64], sizes = [8, 64], strides = [1, 1]} : vector<8x192xf32> to vector<8x64xf32>
    %211 = arith.mulf %210, %190 : vector<8x64xf32>
    %212 = vector.extract_strided_slice %207 {offsets = [0, 0], sizes = [8, 64], strides = [1, 1]} : vector<8x192xf32> to vector<8x64xf32>
    %213 = arith.mulf %212, %209 : vector<8x64xf32>
    %214 = arith.addf %211, %213 : vector<8x64xf32>
    %215 = vector.extract_strided_slice %207 {offsets = [0, 128], sizes = [8, 64], strides = [1, 1]} : vector<8x192xf32> to vector<8x64xf32>
    %216 = math.tanh %214 : vector<8x64xf32>
    %217 = arith.mulf %215, %216 : vector<8x64xf32>
    %218 = vector.extract_strided_slice %217 {offsets = [0, 0], sizes = [8, 32], strides = [1, 1]} : vector<8x64xf32> to vector<8x32xf32>
    %219 = vector.extract_strided_slice %217 {offsets = [0, 32], sizes = [8, 32], strides = [1, 1]} : vector<8x64xf32> to vector<8x32xf32>
    %220 = tpu.concatenate %50, %74, %98, %122, %146, %170, %194, %218 in 0 : vector<8x32xf32>, vector<8x32xf32>, vector<8x32xf32>, vector<8x32xf32>, vector<8x32xf32>, vector<8x32xf32>, vector<8x32xf32>, vector<8x32xf32> -> vector<64x32xf32>
    %221 = tpu.concatenate %219, %195, %171, %147, %123, %99, %75, %51 in 0 : vector<8x32xf32>, vector<8x32xf32>, vector<8x32xf32>, vector<8x32xf32>, vector<8x32xf32>, vector<8x32xf32>, vector<8x32xf32>, vector<8x32xf32> -> vector<64x32xf32>
    %c0_28 = arith.constant 0 : index
    %c0_29 = arith.constant 0 : index
    %222 = vector.load %arg4[%c0_28, %c0_29] : memref<64x256xbf16, #tpu.memory_space<vmem>>, vector<64x256xbf16>
    %223 = arith.truncf %220 : vector<64x32xf32> to vector<64x32xbf16>
    %224 = vector.extract_strided_slice %222 {offsets = [0, 0], sizes = [32, 256], strides = [1, 1]} : vector<64x256xbf16> to vector<32x256xbf16>
    %cst_30 = arith.constant dense<0.000000e+00> : vector<64x256xf32>
    %225 = tpu.matmul %223, %224, %cst_30 {dimension_numbers = #tpu.dot_dimension_numbers<[1], [0], [0], [1], [0, 0, 1, 1], [], []>} : vector<64x32xbf16>, vector<32x256xbf16>, vector<64x256xf32> -> vector<64x256xf32>
    %226 = arith.truncf %221 : vector<64x32xf32> to vector<64x32xbf16>
    %227 = vector.extract_strided_slice %222 {offsets = [32, 0], sizes = [32, 256], strides = [1, 1]} : vector<64x256xbf16> to vector<32x256xbf16>
    %cst_31 = arith.constant dense<0.000000e+00> : vector<64x256xf32>
    %228 = tpu.matmul %226, %227, %cst_31 {dimension_numbers = #tpu.dot_dimension_numbers<[1], [0], [0], [1], [0, 0, 1, 1], [], []>} : vector<64x32xbf16>, vector<32x256xbf16>, vector<64x256xf32> -> vector<64x256xf32>
    %229 = arith.addf %225, %228 : vector<64x256xf32>
    %c0_32 = arith.constant 0 : index
    %c0_33 = arith.constant 0 : index
    %230 = vector.load %arg6[%c0_32, %c0_33] : memref<1x256xf32, #tpu.memory_space<vmem>>, vector<1x256xf32>
    %231 = vector.broadcast %230 : vector<1x256xf32> to vector<64x256xf32>
    %232 = arith.addf %229, %231 : vector<64x256xf32>
    %c0_34 = arith.constant 0 : index
    %c0_35 = arith.constant 0 : index
    %233 = vector.load %arg5[%c0_34, %c0_35] : memref<64x256xbf16, #tpu.memory_space<vmem>>, vector<64x256xbf16>
    %cst_36 = arith.constant 0.000000e+00 : f32
    %234 = vector.broadcast %cst_36 : f32 to vector<8x64xf32>
    %cst_37 = arith.constant 0.000000e+00 : f32
    %235 = vector.broadcast %cst_37 : f32 to vector<8x64xf32>
    %236 = vector.extract_strided_slice %232 {offsets = [0, 0], sizes = [8, 256], strides = [1, 1]} : vector<64x256xf32> to vector<8x256xf32>
    %237 = vector.extract_strided_slice %232 {offsets = [56, 0], sizes = [8, 256], strides = [1, 1]} : vector<64x256xf32> to vector<8x256xf32>
    %238 = arith.select %18, %236, %237 : vector<8x256xi1>, vector<8x256xf32>
    %239 = arith.truncf %234 : vector<8x64xf32> to vector<8x64xbf16>
    %cst_38 = arith.constant dense<0.000000e+00> : vector<8x256xf32>
    %240 = tpu.matmul %239, %233, %cst_38 {dimension_numbers = #tpu.dot_dimension_numbers<[1], [0], [0], [1], [0, 0, 1, 1], [], []>} : vector<8x64xbf16>, vector<64x256xbf16>, vector<8x256xf32> -> vector<8x256xf32>
    %241 = arith.addf %238, %240 : vector<8x256xf32>
    %242 = vector.extract_strided_slice %241 {offsets = [0, 0], sizes = [8, 192], strides = [1, 1]} : vector<8x256xf32> to vector<8x192xf32>
    %243 = arith.negf %242 : vector<8x192xf32>
    %244 = math.exp %243 : vector<8x192xf32>
    %cst_39 = arith.constant 1.000000e+00 : f32
    %245 = vector.broadcast %cst_39 : f32 to vector<8x192xf32>
    %246 = arith.addf %245, %244 : vector<8x192xf32>
    %247 = arith.divf %245, %246 : vector<8x192xf32>
    %248 = vector.extract_strided_slice %241 {offsets = [0, 192], sizes = [8, 64], strides = [1, 1]} : vector<8x256xf32> to vector<8x64xf32>
    %249 = math.tanh %248 : vector<8x64xf32>
    %250 = vector.extract_strided_slice %247 {offsets = [0, 64], sizes = [8, 64], strides = [1, 1]} : vector<8x192xf32> to vector<8x64xf32>
    %251 = arith.mulf %250, %235 : vector<8x64xf32>
    %252 = vector.extract_strided_slice %247 {offsets = [0, 0], sizes = [8, 64], strides = [1, 1]} : vector<8x192xf32> to vector<8x64xf32>
    %253 = arith.mulf %252, %249 : vector<8x64xf32>
    %254 = arith.addf %251, %253 : vector<8x64xf32>
    %255 = vector.extract_strided_slice %247 {offsets = [0, 128], sizes = [8, 64], strides = [1, 1]} : vector<8x192xf32> to vector<8x64xf32>
    %256 = math.tanh %254 : vector<8x64xf32>
    %257 = arith.mulf %255, %256 : vector<8x64xf32>
    %258 = vector.extract_strided_slice %257 {offsets = [0, 0], sizes = [8, 32], strides = [1, 1]} : vector<8x64xf32> to vector<8x32xf32>
    %259 = vector.extract_strided_slice %257 {offsets = [0, 32], sizes = [8, 32], strides = [1, 1]} : vector<8x64xf32> to vector<8x32xf32>
    %260 = vector.extract_strided_slice %232 {offsets = [8, 0], sizes = [8, 256], strides = [1, 1]} : vector<64x256xf32> to vector<8x256xf32>
    %261 = vector.extract_strided_slice %232 {offsets = [48, 0], sizes = [8, 256], strides = [1, 1]} : vector<64x256xf32> to vector<8x256xf32>
    %262 = arith.select %18, %260, %261 : vector<8x256xi1>, vector<8x256xf32>
    %263 = arith.truncf %257 : vector<8x64xf32> to vector<8x64xbf16>
    %cst_40 = arith.constant dense<0.000000e+00> : vector<8x256xf32>
    %264 = tpu.matmul %263, %233, %cst_40 {dimension_numbers = #tpu.dot_dimension_numbers<[1], [0], [0], [1], [0, 0, 1, 1], [], []>} : vector<8x64xbf16>, vector<64x256xbf16>, vector<8x256xf32> -> vector<8x256xf32>
    %265 = arith.addf %262, %264 : vector<8x256xf32>
    %266 = vector.extract_strided_slice %265 {offsets = [0, 0], sizes = [8, 192], strides = [1, 1]} : vector<8x256xf32> to vector<8x192xf32>
    %267 = arith.negf %266 : vector<8x192xf32>
    %268 = math.exp %267 : vector<8x192xf32>
    %cst_41 = arith.constant 1.000000e+00 : f32
    %269 = vector.broadcast %cst_41 : f32 to vector<8x192xf32>
    %270 = arith.addf %269, %268 : vector<8x192xf32>
    %271 = arith.divf %269, %270 : vector<8x192xf32>
    %272 = vector.extract_strided_slice %265 {offsets = [0, 192], sizes = [8, 64], strides = [1, 1]} : vector<8x256xf32> to vector<8x64xf32>
    %273 = math.tanh %272 : vector<8x64xf32>
    %274 = vector.extract_strided_slice %271 {offsets = [0, 64], sizes = [8, 64], strides = [1, 1]} : vector<8x192xf32> to vector<8x64xf32>
    %275 = arith.mulf %274, %254 : vector<8x64xf32>
    %276 = vector.extract_strided_slice %271 {offsets = [0, 0], sizes = [8, 64], strides = [1, 1]} : vector<8x192xf32> to vector<8x64xf32>
    %277 = arith.mulf %276, %273 : vector<8x64xf32>
    %278 = arith.addf %275, %277 : vector<8x64xf32>
    %279 = vector.extract_strided_slice %271 {offsets = [0, 128], sizes = [8, 64], strides = [1, 1]} : vector<8x192xf32> to vector<8x64xf32>
    %280 = math.tanh %278 : vector<8x64xf32>
    %281 = arith.mulf %279, %280 : vector<8x64xf32>
    %282 = vector.extract_strided_slice %281 {offsets = [0, 0], sizes = [8, 32], strides = [1, 1]} : vector<8x64xf32> to vector<8x32xf32>
    %283 = vector.extract_strided_slice %281 {offsets = [0, 32], sizes = [8, 32], strides = [1, 1]} : vector<8x64xf32> to vector<8x32xf32>
    %284 = vector.extract_strided_slice %232 {offsets = [16, 0], sizes = [8, 256], strides = [1, 1]} : vector<64x256xf32> to vector<8x256xf32>
    %285 = vector.extract_strided_slice %232 {offsets = [40, 0], sizes = [8, 256], strides = [1, 1]} : vector<64x256xf32> to vector<8x256xf32>
    %286 = arith.select %18, %284, %285 : vector<8x256xi1>, vector<8x256xf32>
    %287 = arith.truncf %281 : vector<8x64xf32> to vector<8x64xbf16>
    %cst_42 = arith.constant dense<0.000000e+00> : vector<8x256xf32>
    %288 = tpu.matmul %287, %233, %cst_42 {dimension_numbers = #tpu.dot_dimension_numbers<[1], [0], [0], [1], [0, 0, 1, 1], [], []>} : vector<8x64xbf16>, vector<64x256xbf16>, vector<8x256xf32> -> vector<8x256xf32>
    %289 = arith.addf %286, %288 : vector<8x256xf32>
    %290 = vector.extract_strided_slice %289 {offsets = [0, 0], sizes = [8, 192], strides = [1, 1]} : vector<8x256xf32> to vector<8x192xf32>
    %291 = arith.negf %290 : vector<8x192xf32>
    %292 = math.exp %291 : vector<8x192xf32>
    %cst_43 = arith.constant 1.000000e+00 : f32
    %293 = vector.broadcast %cst_43 : f32 to vector<8x192xf32>
    %294 = arith.addf %293, %292 : vector<8x192xf32>
    %295 = arith.divf %293, %294 : vector<8x192xf32>
    %296 = vector.extract_strided_slice %289 {offsets = [0, 192], sizes = [8, 64], strides = [1, 1]} : vector<8x256xf32> to vector<8x64xf32>
    %297 = math.tanh %296 : vector<8x64xf32>
    %298 = vector.extract_strided_slice %295 {offsets = [0, 64], sizes = [8, 64], strides = [1, 1]} : vector<8x192xf32> to vector<8x64xf32>
    %299 = arith.mulf %298, %278 : vector<8x64xf32>
    %300 = vector.extract_strided_slice %295 {offsets = [0, 0], sizes = [8, 64], strides = [1, 1]} : vector<8x192xf32> to vector<8x64xf32>
    %301 = arith.mulf %300, %297 : vector<8x64xf32>
    %302 = arith.addf %299, %301 : vector<8x64xf32>
    %303 = vector.extract_strided_slice %295 {offsets = [0, 128], sizes = [8, 64], strides = [1, 1]} : vector<8x192xf32> to vector<8x64xf32>
    %304 = math.tanh %302 : vector<8x64xf32>
    %305 = arith.mulf %303, %304 : vector<8x64xf32>
    %306 = vector.extract_strided_slice %305 {offsets = [0, 0], sizes = [8, 32], strides = [1, 1]} : vector<8x64xf32> to vector<8x32xf32>
    %307 = vector.extract_strided_slice %305 {offsets = [0, 32], sizes = [8, 32], strides = [1, 1]} : vector<8x64xf32> to vector<8x32xf32>
    %308 = vector.extract_strided_slice %232 {offsets = [24, 0], sizes = [8, 256], strides = [1, 1]} : vector<64x256xf32> to vector<8x256xf32>
    %309 = vector.extract_strided_slice %232 {offsets = [32, 0], sizes = [8, 256], strides = [1, 1]} : vector<64x256xf32> to vector<8x256xf32>
    %310 = arith.select %18, %308, %309 : vector<8x256xi1>, vector<8x256xf32>
    %311 = arith.truncf %305 : vector<8x64xf32> to vector<8x64xbf16>
    %cst_44 = arith.constant dense<0.000000e+00> : vector<8x256xf32>
    %312 = tpu.matmul %311, %233, %cst_44 {dimension_numbers = #tpu.dot_dimension_numbers<[1], [0], [0], [1], [0, 0, 1, 1], [], []>} : vector<8x64xbf16>, vector<64x256xbf16>, vector<8x256xf32> -> vector<8x256xf32>
    %313 = arith.addf %310, %312 : vector<8x256xf32>
    %314 = vector.extract_strided_slice %313 {offsets = [0, 0], sizes = [8, 192], strides = [1, 1]} : vector<8x256xf32> to vector<8x192xf32>
    %315 = arith.negf %314 : vector<8x192xf32>
    %316 = math.exp %315 : vector<8x192xf32>
    %cst_45 = arith.constant 1.000000e+00 : f32
    %317 = vector.broadcast %cst_45 : f32 to vector<8x192xf32>
    %318 = arith.addf %317, %316 : vector<8x192xf32>
    %319 = arith.divf %317, %318 : vector<8x192xf32>
    %320 = vector.extract_strided_slice %313 {offsets = [0, 192], sizes = [8, 64], strides = [1, 1]} : vector<8x256xf32> to vector<8x64xf32>
    %321 = math.tanh %320 : vector<8x64xf32>
    %322 = vector.extract_strided_slice %319 {offsets = [0, 64], sizes = [8, 64], strides = [1, 1]} : vector<8x192xf32> to vector<8x64xf32>
    %323 = arith.mulf %322, %302 : vector<8x64xf32>
    %324 = vector.extract_strided_slice %319 {offsets = [0, 0], sizes = [8, 64], strides = [1, 1]} : vector<8x192xf32> to vector<8x64xf32>
    %325 = arith.mulf %324, %321 : vector<8x64xf32>
    %326 = arith.addf %323, %325 : vector<8x64xf32>
    %327 = vector.extract_strided_slice %319 {offsets = [0, 128], sizes = [8, 64], strides = [1, 1]} : vector<8x192xf32> to vector<8x64xf32>
    %328 = math.tanh %326 : vector<8x64xf32>
    %329 = arith.mulf %327, %328 : vector<8x64xf32>
    %330 = vector.extract_strided_slice %329 {offsets = [0, 0], sizes = [8, 32], strides = [1, 1]} : vector<8x64xf32> to vector<8x32xf32>
    %331 = vector.extract_strided_slice %329 {offsets = [0, 32], sizes = [8, 32], strides = [1, 1]} : vector<8x64xf32> to vector<8x32xf32>
    %332 = vector.extract_strided_slice %232 {offsets = [32, 0], sizes = [8, 256], strides = [1, 1]} : vector<64x256xf32> to vector<8x256xf32>
    %333 = vector.extract_strided_slice %232 {offsets = [24, 0], sizes = [8, 256], strides = [1, 1]} : vector<64x256xf32> to vector<8x256xf32>
    %334 = arith.select %18, %332, %333 : vector<8x256xi1>, vector<8x256xf32>
    %335 = arith.truncf %329 : vector<8x64xf32> to vector<8x64xbf16>
    %cst_46 = arith.constant dense<0.000000e+00> : vector<8x256xf32>
    %336 = tpu.matmul %335, %233, %cst_46 {dimension_numbers = #tpu.dot_dimension_numbers<[1], [0], [0], [1], [0, 0, 1, 1], [], []>} : vector<8x64xbf16>, vector<64x256xbf16>, vector<8x256xf32> -> vector<8x256xf32>
    %337 = arith.addf %334, %336 : vector<8x256xf32>
    %338 = vector.extract_strided_slice %337 {offsets = [0, 0], sizes = [8, 192], strides = [1, 1]} : vector<8x256xf32> to vector<8x192xf32>
    %339 = arith.negf %338 : vector<8x192xf32>
    %340 = math.exp %339 : vector<8x192xf32>
    %cst_47 = arith.constant 1.000000e+00 : f32
    %341 = vector.broadcast %cst_47 : f32 to vector<8x192xf32>
    %342 = arith.addf %341, %340 : vector<8x192xf32>
    %343 = arith.divf %341, %342 : vector<8x192xf32>
    %344 = vector.extract_strided_slice %337 {offsets = [0, 192], sizes = [8, 64], strides = [1, 1]} : vector<8x256xf32> to vector<8x64xf32>
    %345 = math.tanh %344 : vector<8x64xf32>
    %346 = vector.extract_strided_slice %343 {offsets = [0, 64], sizes = [8, 64], strides = [1, 1]} : vector<8x192xf32> to vector<8x64xf32>
    %347 = arith.mulf %346, %326 : vector<8x64xf32>
    %348 = vector.extract_strided_slice %343 {offsets = [0, 0], sizes = [8, 64], strides = [1, 1]} : vector<8x192xf32> to vector<8x64xf32>
    %349 = arith.mulf %348, %345 : vector<8x64xf32>
    %350 = arith.addf %347, %349 : vector<8x64xf32>
    %351 = vector.extract_strided_slice %343 {offsets = [0, 128], sizes = [8, 64], strides = [1, 1]} : vector<8x192xf32> to vector<8x64xf32>
    %352 = math.tanh %350 : vector<8x64xf32>
    %353 = arith.mulf %351, %352 : vector<8x64xf32>
    %354 = vector.extract_strided_slice %353 {offsets = [0, 0], sizes = [8, 32], strides = [1, 1]} : vector<8x64xf32> to vector<8x32xf32>
    %355 = vector.extract_strided_slice %353 {offsets = [0, 32], sizes = [8, 32], strides = [1, 1]} : vector<8x64xf32> to vector<8x32xf32>
    %356 = vector.extract_strided_slice %232 {offsets = [40, 0], sizes = [8, 256], strides = [1, 1]} : vector<64x256xf32> to vector<8x256xf32>
    %357 = vector.extract_strided_slice %232 {offsets = [16, 0], sizes = [8, 256], strides = [1, 1]} : vector<64x256xf32> to vector<8x256xf32>
    %358 = arith.select %18, %356, %357 : vector<8x256xi1>, vector<8x256xf32>
    %359 = arith.truncf %353 : vector<8x64xf32> to vector<8x64xbf16>
    %cst_48 = arith.constant dense<0.000000e+00> : vector<8x256xf32>
    %360 = tpu.matmul %359, %233, %cst_48 {dimension_numbers = #tpu.dot_dimension_numbers<[1], [0], [0], [1], [0, 0, 1, 1], [], []>} : vector<8x64xbf16>, vector<64x256xbf16>, vector<8x256xf32> -> vector<8x256xf32>
    %361 = arith.addf %358, %360 : vector<8x256xf32>
    %362 = vector.extract_strided_slice %361 {offsets = [0, 0], sizes = [8, 192], strides = [1, 1]} : vector<8x256xf32> to vector<8x192xf32>
    %363 = arith.negf %362 : vector<8x192xf32>
    %364 = math.exp %363 : vector<8x192xf32>
    %cst_49 = arith.constant 1.000000e+00 : f32
    %365 = vector.broadcast %cst_49 : f32 to vector<8x192xf32>
    %366 = arith.addf %365, %364 : vector<8x192xf32>
    %367 = arith.divf %365, %366 : vector<8x192xf32>
    %368 = vector.extract_strided_slice %361 {offsets = [0, 192], sizes = [8, 64], strides = [1, 1]} : vector<8x256xf32> to vector<8x64xf32>
    %369 = math.tanh %368 : vector<8x64xf32>
    %370 = vector.extract_strided_slice %367 {offsets = [0, 64], sizes = [8, 64], strides = [1, 1]} : vector<8x192xf32> to vector<8x64xf32>
    %371 = arith.mulf %370, %350 : vector<8x64xf32>
    %372 = vector.extract_strided_slice %367 {offsets = [0, 0], sizes = [8, 64], strides = [1, 1]} : vector<8x192xf32> to vector<8x64xf32>
    %373 = arith.mulf %372, %369 : vector<8x64xf32>
    %374 = arith.addf %371, %373 : vector<8x64xf32>
    %375 = vector.extract_strided_slice %367 {offsets = [0, 128], sizes = [8, 64], strides = [1, 1]} : vector<8x192xf32> to vector<8x64xf32>
    %376 = math.tanh %374 : vector<8x64xf32>
    %377 = arith.mulf %375, %376 : vector<8x64xf32>
    %378 = vector.extract_strided_slice %377 {offsets = [0, 0], sizes = [8, 32], strides = [1, 1]} : vector<8x64xf32> to vector<8x32xf32>
    %379 = vector.extract_strided_slice %377 {offsets = [0, 32], sizes = [8, 32], strides = [1, 1]} : vector<8x64xf32> to vector<8x32xf32>
    %380 = vector.extract_strided_slice %232 {offsets = [48, 0], sizes = [8, 256], strides = [1, 1]} : vector<64x256xf32> to vector<8x256xf32>
    %381 = vector.extract_strided_slice %232 {offsets = [8, 0], sizes = [8, 256], strides = [1, 1]} : vector<64x256xf32> to vector<8x256xf32>
    %382 = arith.select %18, %380, %381 : vector<8x256xi1>, vector<8x256xf32>
    %383 = arith.truncf %377 : vector<8x64xf32> to vector<8x64xbf16>
    %cst_50 = arith.constant dense<0.000000e+00> : vector<8x256xf32>
    %384 = tpu.matmul %383, %233, %cst_50 {dimension_numbers = #tpu.dot_dimension_numbers<[1], [0], [0], [1], [0, 0, 1, 1], [], []>} : vector<8x64xbf16>, vector<64x256xbf16>, vector<8x256xf32> -> vector<8x256xf32>
    %385 = arith.addf %382, %384 : vector<8x256xf32>
    %386 = vector.extract_strided_slice %385 {offsets = [0, 0], sizes = [8, 192], strides = [1, 1]} : vector<8x256xf32> to vector<8x192xf32>
    %387 = arith.negf %386 : vector<8x192xf32>
    %388 = math.exp %387 : vector<8x192xf32>
    %cst_51 = arith.constant 1.000000e+00 : f32
    %389 = vector.broadcast %cst_51 : f32 to vector<8x192xf32>
    %390 = arith.addf %389, %388 : vector<8x192xf32>
    %391 = arith.divf %389, %390 : vector<8x192xf32>
    %392 = vector.extract_strided_slice %385 {offsets = [0, 192], sizes = [8, 64], strides = [1, 1]} : vector<8x256xf32> to vector<8x64xf32>
    %393 = math.tanh %392 : vector<8x64xf32>
    %394 = vector.extract_strided_slice %391 {offsets = [0, 64], sizes = [8, 64], strides = [1, 1]} : vector<8x192xf32> to vector<8x64xf32>
    %395 = arith.mulf %394, %374 : vector<8x64xf32>
    %396 = vector.extract_strided_slice %391 {offsets = [0, 0], sizes = [8, 64], strides = [1, 1]} : vector<8x192xf32> to vector<8x64xf32>
    %397 = arith.mulf %396, %393 : vector<8x64xf32>
    %398 = arith.addf %395, %397 : vector<8x64xf32>
    %399 = vector.extract_strided_slice %391 {offsets = [0, 128], sizes = [8, 64], strides = [1, 1]} : vector<8x192xf32> to vector<8x64xf32>
    %400 = math.tanh %398 : vector<8x64xf32>
    %401 = arith.mulf %399, %400 : vector<8x64xf32>
    %402 = vector.extract_strided_slice %401 {offsets = [0, 0], sizes = [8, 32], strides = [1, 1]} : vector<8x64xf32> to vector<8x32xf32>
    %403 = vector.extract_strided_slice %401 {offsets = [0, 32], sizes = [8, 32], strides = [1, 1]} : vector<8x64xf32> to vector<8x32xf32>
    %404 = vector.extract_strided_slice %232 {offsets = [56, 0], sizes = [8, 256], strides = [1, 1]} : vector<64x256xf32> to vector<8x256xf32>
    %405 = vector.extract_strided_slice %232 {offsets = [0, 0], sizes = [8, 256], strides = [1, 1]} : vector<64x256xf32> to vector<8x256xf32>
    %406 = arith.select %18, %404, %405 : vector<8x256xi1>, vector<8x256xf32>
    %407 = arith.truncf %401 : vector<8x64xf32> to vector<8x64xbf16>
    %cst_52 = arith.constant dense<0.000000e+00> : vector<8x256xf32>
    %408 = tpu.matmul %407, %233, %cst_52 {dimension_numbers = #tpu.dot_dimension_numbers<[1], [0], [0], [1], [0, 0, 1, 1], [], []>} : vector<8x64xbf16>, vector<64x256xbf16>, vector<8x256xf32> -> vector<8x256xf32>
    %409 = arith.addf %406, %408 : vector<8x256xf32>
    %410 = vector.extract_strided_slice %409 {offsets = [0, 0], sizes = [8, 192], strides = [1, 1]} : vector<8x256xf32> to vector<8x192xf32>
    %411 = arith.negf %410 : vector<8x192xf32>
    %412 = math.exp %411 : vector<8x192xf32>
    %cst_53 = arith.constant 1.000000e+00 : f32
    %413 = vector.broadcast %cst_53 : f32 to vector<8x192xf32>
    %414 = arith.addf %413, %412 : vector<8x192xf32>
    %415 = arith.divf %413, %414 : vector<8x192xf32>
    %416 = vector.extract_strided_slice %409 {offsets = [0, 192], sizes = [8, 64], strides = [1, 1]} : vector<8x256xf32> to vector<8x64xf32>
    %417 = math.tanh %416 : vector<8x64xf32>
    %418 = vector.extract_strided_slice %415 {offsets = [0, 64], sizes = [8, 64], strides = [1, 1]} : vector<8x192xf32> to vector<8x64xf32>
    %419 = arith.mulf %418, %398 : vector<8x64xf32>
    %420 = vector.extract_strided_slice %415 {offsets = [0, 0], sizes = [8, 64], strides = [1, 1]} : vector<8x192xf32> to vector<8x64xf32>
    %421 = arith.mulf %420, %417 : vector<8x64xf32>
    %422 = arith.addf %419, %421 : vector<8x64xf32>
    %423 = vector.extract_strided_slice %415 {offsets = [0, 128], sizes = [8, 64], strides = [1, 1]} : vector<8x192xf32> to vector<8x64xf32>
    %424 = math.tanh %422 : vector<8x64xf32>
    %425 = arith.mulf %423, %424 : vector<8x64xf32>
    %426 = vector.extract_strided_slice %425 {offsets = [0, 0], sizes = [8, 32], strides = [1, 1]} : vector<8x64xf32> to vector<8x32xf32>
    %427 = vector.extract_strided_slice %425 {offsets = [0, 32], sizes = [8, 32], strides = [1, 1]} : vector<8x64xf32> to vector<8x32xf32>
    %428 = tpu.concatenate %258, %282, %306, %330, %354, %378, %402, %426 in 0 : vector<8x32xf32>, vector<8x32xf32>, vector<8x32xf32>, vector<8x32xf32>, vector<8x32xf32>, vector<8x32xf32>, vector<8x32xf32>, vector<8x32xf32> -> vector<64x32xf32>
    %429 = tpu.concatenate %427, %403, %379, %355, %331, %307, %283, %259 in 0 : vector<8x32xf32>, vector<8x32xf32>, vector<8x32xf32>, vector<8x32xf32>, vector<8x32xf32>, vector<8x32xf32>, vector<8x32xf32>, vector<8x32xf32> -> vector<64x32xf32>
    %c0_54 = arith.constant 0 : index
    %c0_55 = arith.constant 0 : index
    %430 = vector.load %arg7[%c0_54, %c0_55] : memref<64x8xbf16, #tpu.memory_space<vmem>>, vector<64x8xbf16>
    %cst_56 = arith.constant 0.000000e+00 : f32
    %431 = vector.broadcast %cst_56 : f32 to vector<64x32xf32>
    %432 = arith.maximumf %428, %431 : vector<64x32xf32>
    %433 = arith.truncf %432 : vector<64x32xf32> to vector<64x32xbf16>
    %434 = vector.extract_strided_slice %430 {offsets = [0, 0], sizes = [32, 8], strides = [1, 1]} : vector<64x8xbf16> to vector<32x8xbf16>
    %cst_57 = arith.constant dense<0.000000e+00> : vector<64x8xf32>
    %435 = tpu.matmul %433, %434, %cst_57 {dimension_numbers = #tpu.dot_dimension_numbers<[1], [0], [0], [1], [0, 0, 1, 1], [], []>} : vector<64x32xbf16>, vector<32x8xbf16>, vector<64x8xf32> -> vector<64x8xf32>
    %cst_58 = arith.constant 0.000000e+00 : f32
    %436 = vector.broadcast %cst_58 : f32 to vector<64x32xf32>
    %437 = arith.maximumf %429, %436 : vector<64x32xf32>
    %438 = arith.truncf %437 : vector<64x32xf32> to vector<64x32xbf16>
    %439 = vector.extract_strided_slice %430 {offsets = [32, 0], sizes = [32, 8], strides = [1, 1]} : vector<64x8xbf16> to vector<32x8xbf16>
    %cst_59 = arith.constant dense<0.000000e+00> : vector<64x8xf32>
    %440 = tpu.matmul %438, %439, %cst_59 {dimension_numbers = #tpu.dot_dimension_numbers<[1], [0], [0], [1], [0, 0, 1, 1], [], []>} : vector<64x32xbf16>, vector<32x8xbf16>, vector<64x8xf32> -> vector<64x8xf32>
    %441 = arith.addf %435, %440 : vector<64x8xf32>
    %c0_60 = arith.constant 0 : index
    %c0_61 = arith.constant 0 : index
    %442 = vector.load %arg8[%c0_60, %c0_61] : memref<1x8xf32, #tpu.memory_space<vmem>>, vector<1x8xf32>
    %443 = vector.broadcast %442 : vector<1x8xf32> to vector<64x8xf32>
    %444 = arith.addf %441, %443 : vector<64x8xf32>
    %cst_62 = arith.constant 0.000000e+00 : f32
    %445 = vector.broadcast %cst_62 : f32 to vector<64x8xf32>
    %446 = arith.maximumf %444, %445 : vector<64x8xf32>
    %447 = vector.extract_strided_slice %446 {offsets = [0, 0], sizes = [8, 8], strides = [1, 1]} : vector<64x8xf32> to vector<8x8xf32>
    %448 = vector.extract_strided_slice %446 {offsets = [8, 0], sizes = [8, 8], strides = [1, 1]} : vector<64x8xf32> to vector<8x8xf32>
    %449 = vector.extract_strided_slice %446 {offsets = [16, 0], sizes = [8, 8], strides = [1, 1]} : vector<64x8xf32> to vector<8x8xf32>
    %450 = vector.extract_strided_slice %446 {offsets = [24, 0], sizes = [8, 8], strides = [1, 1]} : vector<64x8xf32> to vector<8x8xf32>
    %451 = vector.extract_strided_slice %446 {offsets = [32, 0], sizes = [8, 8], strides = [1, 1]} : vector<64x8xf32> to vector<8x8xf32>
    %452 = vector.extract_strided_slice %446 {offsets = [40, 0], sizes = [8, 8], strides = [1, 1]} : vector<64x8xf32> to vector<8x8xf32>
    %453 = vector.extract_strided_slice %446 {offsets = [48, 0], sizes = [8, 8], strides = [1, 1]} : vector<64x8xf32> to vector<8x8xf32>
    %454 = vector.extract_strided_slice %446 {offsets = [56, 0], sizes = [8, 8], strides = [1, 1]} : vector<64x8xf32> to vector<8x8xf32>
    %455 = tpu.concatenate %447, %448, %449, %450, %451, %452, %453, %454 in 1 : vector<8x8xf32>, vector<8x8xf32>, vector<8x8xf32>, vector<8x8xf32>, vector<8x8xf32>, vector<8x8xf32>, vector<8x8xf32>, vector<8x8xf32> -> vector<8x64xf32>
    %c0_63 = arith.constant 0 : index
    %c0_64 = arith.constant 0 : index
    %456 = vector.load %arg9[%c0_63, %c0_64] : memref<64x3xf32, #tpu.memory_space<vmem>>, vector<64x3xf32>
    %cst_65 = arith.constant dense<0.000000e+00> : vector<8x3xf32>
    %457 = tpu.matmul %455, %456, %cst_65 {dimension_numbers = #tpu.dot_dimension_numbers<[1], [0], [0], [1], [0, 0, 1, 1], [], []>} : vector<8x64xf32>, vector<64x3xf32>, vector<8x3xf32> -> vector<8x3xf32>
    %c0_66 = arith.constant 0 : index
    %c0_67 = arith.constant 0 : index
    %458 = vector.load %arg10[%c0_66, %c0_67] : memref<1x3xf32, #tpu.memory_space<vmem>>, vector<1x3xf32>
    %459 = vector.broadcast %458 : vector<1x3xf32> to vector<8x3xf32>
    %460 = arith.addf %457, %459 : vector<8x3xf32>
    %c0_68 = arith.constant 0 : index
    %c0_69 = arith.constant 0 : index
    %461 = vector.load %arg11[%c0_68, %c0_69] : memref<8x3xf32, #tpu.memory_space<vmem>>, vector<8x3xf32>
    tpu.vector_store %arg11[%c0_68, %c0_69], %460 {strides = array<i32>} : memref<8x3xf32, #tpu.memory_space<vmem>>, vector<8x3xf32>,
    return
  }
}

</mosaic_0001>

<bundles_post_ra>
// kernel: rnn_forward.1
= control target key start
LH: loop header
LB: loop body
LE: loop exit
PB: predicated region body
PF: predicated region fallthrough
CT: control target
= control target key end

     0   :  { %vm126_vm0 = vcmask 261120   ;;  %v2684_v39 = vmov 0   ;;  %v39_v45 = vlaneseq  ;;  %vm247_vm11 = vcmask 523264   ;;  %s2688_s20 = smov 16   ;;  %s2690_s21 = smov 32   ;;  %s3753_s1 = inlined_call_operand.vmem [shape: bf16[32,256], index: 1, kind: input, shape index: {}]   ;;  %s3754_s2 = inlined_call_operand.vmem [shape: bf16[64,256], index: 2, kind: input, shape index: {}]   ;;  %s3755_s0 = inlined_call_operand.vmem [shape: bf16[64,32], index: 0, kind: input, shape index: {}]   ;;  %s3756_s3 = inlined_call_operand.vmem [shape: f32[1,256], index: 3, kind: input, shape index: {}]   ;;  %s3757_s4 = inlined_call_operand.vmem [shape: bf16[64,256], index: 4, kind: input, shape index: {}]   ;;  %s3758_s5 = inlined_call_operand.vmem [shape: bf16[64,256], index: 5, kind: input, shape index: {}]   ;;  %s3759_s6 = inlined_call_operand.vmem [shape: f32[1,256], index: 6, kind: input, shape index: {}]   ;;  %s3760_s7 = inlined_call_operand.vmem [shape: bf16[64,8], index: 7, kind: input, shape index: {}]   ;;  %s3761_s8 = inlined_call_operand.vmem [shape: f32[1,8], index: 8, kind: input, shape index: {}]   ;;  %s3762_s10 = inlined_call_operand.vmem [shape: f32[1,3], index: 10, kind: input, shape index: {}]   ;;  %s3763_s9 = inlined_call_operand.vmem [shape: f32[64,3], index: 9, kind: input, shape index: {}]   ;;  %s3764_s11 = inlined_call_operand.vmem [shape: f32[8,3], index: 11, kind: output, shape index: {}]  }
   0x1   :  { %v2229_v0 = vld [vmem:[%s3753_s1 + $0x10] sm:$0xf]  ;;  %v2447_v1 = vld [vmem:[%s3753_s1 + $0x14] sm:$0xf0]  ;;  %v2446_v2 = vld [vmem:[%s3753_s1 + $0x14] sm:$0xf] }
   0x2   :  { %v2230_v3 = vor.u32 %v2447_v1, %v2229_v0  ;;  %v2231_v4 = vld [vmem:[%s3753_s1 + $0x18] sm:$0xf0]  ;;  %v2221_v5 = vld [vmem:[%s3753_s1] sm:$0xf]  ;;  %v2445_v6 = vld [vmem:[%s3753_s1 + $0x4] sm:$0xf0] }
   0x3   :  { %v2234_v7 = vor.u32 %v2446_v2, %v2231_v4  ;;  %v2444_v8 = vld [vmem:[%s3753_s1 + $0x4] sm:$0xf]  ;;  %v2223_v9 = vld [vmem:[%s3753_s1 + $0x8] sm:$0xf0]  ;;  %v2222_v10 = vor.u32 %v2445_v6, %v2221_v5  ;;  %v2454_v11 = vld [vmem:[%s3754_s2 + $0x34] sm:$0xf] }
   0x4   :  { %2476 = vmatpush.bf16.msra.mxu3 %v2230_v3  ;;  %v2271_v12 = vld [vmem:[%s3754_s2 + $0x38] sm:$0xf0]  ;;  %145 = vmatpush.bf16.msra.mxu0 %v2230_v3  ;;  %v2226_v13 = vor.u32 %v2444_v8, %v2223_v9  ;;  %v2452_v15 = vld [vmem:[%s3754_s2 + $0x24] sm:$0xf]  ;;  %v2263_v16 = vld [vmem:[%s3754_s2 + $0x28] sm:$0xf0] }
   0x5   :  { %2478 = vmatpush.bf16.msra.mxu1 %v2234_v7  ;;  %v2784_v14 = vor.u32 %v2454_v11, %v2271_v12  ;;  %v2269_v17 = vld [vmem:[%s3754_s2 + $0x30] sm:$0xf]  ;;  %v2441_v18 = vld [vmem:[%s3755_s0 + $0x8] sm:$0xff]  ;;  %v2440_v19 = vld [vmem:[%s3755_s0] sm:$0xff]  ;;  %v2807_v22 = vor.u32 %v2452_v15, %v2263_v16  ;;  %v40_v48 = vand.u32 127, %v39_v45  ;;  %s2691_s22 = smov 40  }
   0x6   :  { %v2455_v20 = vld [vmem:[%s3754_s2 + $0x34] sm:$0xf0]  ;;  %v2261_v23 = vld [vmem:[%s3754_s2 + $0x20] sm:$0xf]  ;;  %v2453_v24 = vld [vmem:[%s3754_s2 + $0x24] sm:$0xf0] }
   0x7   :  { %v2804_v21 = vor.u32 %v2455_v20, %v2269_v17  ;;  %v2450_v25 = vld [vmem:[%s3754_s2 + $0x14] sm:$0xf]  ;;  %v2255_v26 = vld [vmem:[%s3754_s2 + $0x18] sm:$0xf0]  ;;  %v2822_v27 = vor.u32 %v2453_v24, %v2261_v23  ;;  %v2253_v28 = vld [vmem:[%s3754_s2 + $0x10] sm:$0xf] }
   0x8   :  { %2477 = vmatpush.bf16.msra.mxu3 %v2222_v10  ;;  %146 = vmatpush.bf16.msra.mxu0 %v2222_v10  ;;  %v2451_v29 = vld [vmem:[%s3754_s2 + $0x14] sm:$0xf0]  ;;  %v2834_v30 = vor.u32 %v2450_v25, %v2255_v26  ;;  %v2448_v32 = vld [vmem:[%s3754_s2 + $0x4] sm:$0xf]  ;;  %v2247_v33 = vld [vmem:[%s3754_s2 + $0x8] sm:$0xf0] }
   0x9   :  { %2479 = vmatpush.bf16.msra.mxu1 %v2226_v13  ;;  %255 = vmatpush.bf16.msra.mxu2 %v2804_v21  ;;  %v2838_v31 = vor.u32 %v2451_v29, %v2253_v28  ;;  %v2245_v34 = vld [vmem:[%s3754_s2] sm:$0xf]  ;;  %v2449_v35 = vld [vmem:[%s3754_s2 + $0x4] sm:$0xf0]  ;;  %v2854_v36 = vor.u32 %v2448_v32, %v2247_v33  ;;  %v2442_v38 = vld [vmem:[%s3755_s0 + $0x10] sm:$0xff]  ;;  %v41_v53 = vadd.s32 128, %v40_v48 }
   0xa   :  { %v2858_v37 = vor.u32 %v2449_v35, %v2245_v34  ;;  %v2443_v40 = vld [vmem:[%s3755_s0 + $0x18] sm:$0xff]  ;;  %v80_v41 = vld [vmem:[%s3756_s3] sm:$0x3]  ;;  %v46_v60 = vand.u32 63, %v40_v48  ;;  %s2685_s3 = smov 64   ;;  %s2686_s2 = smov 96  }
   0xb   :  { %2236 = vmatmul.msk.bf16.vlgmr.msra.gmra.mxu3 %vm126_vm0, %v2441_v18  ;;  %2235 = vmatmul.msk.bf16.vlgmr.msra.gmra.mxu0 %vm126_vm0, %v2440_v19  ;;  %v83_v42 = vperm.slane %v80_v41, 1  ;;  %v82_v47 = vperm.slane %v80_v41, 0  ;;  %v53_v54 = vand.u32 63, %v41_v53  ;;  %s2692_s23 = smov 48  }
   0xc   :  { %268 = vmatpush.bf16.msrb.mxu3 %v2784_v14  ;;  %174 = vmatpush.bf16.msrb.mxu0 %v2234_v7  ;;  %vm2923_vm2 = vcmp.lt.s32.totalorder %v46_v60, 32 }
   0xd   :  { %2240 = vmatmul.msk.bf16.vlgmr.msra.gmra.mxu1 %vm126_vm0, %v2441_v18  ;;  %256 = vmatpush.bf16.msra.mxu2 %v2822_v27  ;;  %vm2907_vm1 = vcmp.lt.s32.totalorder %v53_v54, 32 }
   0xe   :  { %808 = vmatpush.bf16.msrb.mxu1 %v2784_v14 }
  0x10   :  { %269 = vmatpush.bf16.msrb.mxu3 %v2807_v22  ;;  %175 = vmatpush.bf16.msrb.mxu0 %v2226_v13 }
  0x11   :  { %257 = vmatpush.bf16.msra.mxu2 %v2838_v31 }
  0x12   :  { %809 = vmatpush.bf16.msrb.mxu1 %v2807_v22 }
  0x14   :  { %615 = vmatpush.bf16.msra.mxu0 %v2804_v21  ;;  %270 = vmatpush.bf16.msrb.mxu3 %v2834_v30 }
  0x15   :  { %258 = vmatpush.bf16.msra.mxu2 %v2858_v37 }
  0x16   :  { %810 = vmatpush.bf16.msrb.mxu1 %v2834_v30 }
  0x18   :  { %616 = vmatpush.bf16.msra.mxu0 %v2822_v27  ;;  %271 = vmatpush.bf16.msrb.mxu3 %v2854_v36 }
  0x19   :  { %345 = vmatpush.bf16.msrb.mxu2 %v2804_v21 }
  0x1a   :  { %259 = vmatmul.bf16.vlgmr.msra.gmra.mxu2 %v2684_v39  ;;  %811 = vmatpush.bf16.msrb.mxu1 %v2854_v36 }
  0x1b   :  { %2237 = vmatmul.msk.bf16.gmra.mxu3 %vm126_vm0, %v2442_v38  ;;  %2239 = vmatmul.msk.bf16.vlgmr.msrb.gmra.mxu0 %vm126_vm0, %v2440_v19 }
  0x1c   :  { %358 = vmatpush.bf16.msra.mxu3 %v2784_v14  ;;  %617 = vmatpush.bf16.msra.mxu0 %v2838_v31 }
  0x1d   :  { %2241 = vmatmul.msk.bf16.gmra.mxu1 %vm126_vm0, %v2442_v38  ;;  %346 = vmatpush.bf16.msrb.mxu2 %v2822_v27 }
  0x20   :  { %359 = vmatpush.bf16.msra.mxu3 %v2807_v22  ;;  %618 = vmatpush.bf16.msra.mxu0 %v2858_v37 }
  0x21   :  { %347 = vmatpush.bf16.msrb.mxu2 %v2838_v31 }
  0x24   :  { %360 = vmatpush.bf16.msra.mxu3 %v2834_v30  ;;  %795 = vmatpush.bf16.msrb.mxu0 %v2804_v21 }
  0x25   :  { %348 = vmatpush.bf16.msrb.mxu2 %v2858_v37 }
  0x28   :  { %361 = vmatpush.bf16.msra.mxu3 %v2854_v36  ;;  %796 = vmatpush.bf16.msrb.mxu0 %v2822_v27 }
  0x29   :  { %435 = vmatpush.bf16.msra.mxu2 %v2804_v21 }
  0x2b   :  { %2238 = vmatmul.msk.bf16.gmra.mxu3 %vm126_vm0, %v2443_v40 }
  0x2c   :  { %797 = vmatpush.bf16.msrb.mxu0 %v2838_v31 }
  0x2d   :  { %436 = vmatpush.bf16.msra.mxu2 %v2822_v27  ;;  %2242 = vmatmul.msk.bf16.gmra.mxu1 %vm126_vm0, %v2443_v40 }
  0x30   :  { %798 = vmatpush.bf16.msrb.mxu0 %v2858_v37 }
  0x31   :  { %437 = vmatpush.bf16.msra.mxu2 %v2838_v31 }
  0x35   :  { %438 = vmatpush.bf16.msra.mxu2 %v2858_v37 }
  0x3b   :  { %272 = vmatmul.bf16.vlgmr.msrb.gmra.mxu3 %v2684_v39 }
  0x3c   :  { %448 = vmatpush.bf16.msrb.mxu3 %v2784_v14 }
  0x40   :  { %449 = vmatpush.bf16.msrb.mxu3 %v2807_v22 }
  0x44   :  { %450 = vmatpush.bf16.msrb.mxu3 %v2834_v30 }
  0x48   :  { %451 = vmatpush.bf16.msrb.mxu3 %v2854_v36 }
  0x88   :  { %v148_v43 = vpop.f32.mrf.mxu0 }
  0x89   :  { %v2991_v41 = vadd.f32 %v148_v43, %v82_v47 }
  0x8a   :  { %v182_v44 = vpop.f32.mrf.mxu1 }
  0x8b   :  { %v2903_v46 = vadd.f32 %v182_v44, %v83_v42 }
  0x8e   :  { %v153_v49 = vpop.f32.mrf.mxu3 }
  0x8f   :  { %v2905_v50 = vadd.f32 %v153_v49, %v82_v47 }
  0x90   :  { %v150_v52 = vpop.f32.mrf.mxu0 }
  0x91   :  { %v2971_v26 = vadd.f32 %v150_v52, %v82_v47 }
  0x92   :  { %v184_v51 = vpop.f32.mrf.mxu1 }
  0x93   :  { %v2911_v58 = vadd.f32 %v184_v51, %v83_v42 }
  0x96   :  { %v155_v55 = vpop.f32.mrf.mxu3 }
  0x97   :  { %v2927_v3 = vadd.f32 %v155_v55, %v82_v47 }
  0x98   :  { %v177_v61 = vpop.f32.mrf.mxu0 }
  0x99   :  { %v2975_v29 = vadd.f32 %v177_v61, %v83_v42 }
  0x9a   :  { %v187_v56 = vpop.f32.mrf.mxu1 }
  0x9b   :  { %v2913_v59 = vadd.f32 %v187_v56, %v83_v42 }
  0x9d   :  { %v260_v62 = vpop.f32.mrf.mxu2  ;;  %v516_v63 = vsel %vm2907_vm1, %v2911_v58, %v2913_v59  ;;  %v606_v0 = vsel %vm2907_vm1, %v2913_v59, %v2911_v58 }
  0x9e   :  { %v158_v1 = vpop.f32.mrf.mxu3 }
  0x9f   :  { %v2929_v4 = vadd.f32 %v158_v1, %v82_v47 }
  0xa0   :  { %v179_v12 = vpop.f32.mrf.mxu0 }
  0xa1   :  { %v515_v6 = vsel %vm2923_vm2, %v2927_v3, %v2929_v4  ;;  %v605_v7 = vsel %vm2923_vm2, %v2929_v4, %v2927_v3  ;;  %v2951_v16 = vadd.f32 %v179_v12, %v83_v42 }
  0xa2   :  { %v189_v5 = vpop.f32.mrf.mxu1 }
  0xa3   :  { %v2939_v8 = vadd.f32 %v189_v5, %v83_v42 }
  0xa5   :  { %v262_v9 = vpop.f32.mrf.mxu2  ;;  %v426_v10 = vsel %vm2907_vm1, %v2903_v46, %v2939_v8  ;;  %v696_v11 = vsel %vm2907_vm1, %v2939_v8, %v2903_v46 }
  0xa6   :  { %v160_v13 = vpop.f32.mrf.mxu3 }
  0xa7   :  { %v2949_v15 = vadd.f32 %v160_v13, %v82_v47 }
  0xa9   :  { %v425_v18 = vsel %vm2923_vm2, %v2905_v50, %v2949_v15  ;;  %v695_v19 = vsel %vm2923_vm2, %v2949_v15, %v2905_v50 }
  0xaa   :  { %v192_v17 = vpop.f32.mrf.mxu1 }
  0xab   :  { %v2961_v20 = vadd.f32 %v192_v17, %v83_v42 }
  0xad   :  { %v336_v23 = vsel %vm2907_vm1, %v2951_v16, %v2961_v20  ;;  %v786_v24 = vsel %vm2907_vm1, %v2961_v20, %v2951_v16 }
  0xae   :  { %v163_v25 = vpop.f32.mrf.mxu3 }
  0xaf   :  { %v2973_v28 = vadd.f32 %v163_v25, %v82_v47 }
  0xb1   :  { %v335_v33 = vsel %vm2923_vm2, %v2971_v26, %v2973_v28  ;;  %v785_v34 = vsel %vm2923_vm2, %v2973_v28, %v2971_v26 }
  0xb2   :  { %v194_v32 = vpop.f32.mrf.mxu1 }
  0xb3   :  { %v2985_v35 = vadd.f32 %v194_v32, %v83_v42 }
  0xb5   :  { %v876_v38 = vsel %vm2907_vm1, %v2985_v35, %v2975_v29  ;;  %v206_v49 = vsel %vm2907_vm1, %v2975_v29, %v2985_v35 }
  0xb6   :  { %v165_v40 = vpop.f32.mrf.mxu3 }
  0xb7   :  { %v2993_v44 = vadd.f32 %v165_v40, %v82_v47 }
  0xb9   :  { %v205_v45 = vsel %vm2923_vm2, %v2991_v41, %v2993_v44  ;;  %v875_v42 = vsel %vm2923_vm2, %v2993_v44, %v2991_v41 }
  0xba   :  { %v277_v48 = vadd.f32 %v260_v62, %v205_v45 }
  0xbc   :  { %v2275_v53 = vmul.f32 -1.442695, %v277_v48 }
  0xbe   :  { %v273_v43 = vpop.f32.mrf.mxu3 }
  0xbf   :  { %v278_v51 = vadd.f32 %v273_v43, %v206_v49 }
  0xc1   :  { %2492 = vtanh.f32 %v278_v51  ;;  %v2276_v43 = vmul.f32 -1.442695, %v278_v51 }
  0xc2   :  { %2494 = vpow2.f32 %v2275_v53 }
  0xc6   :  { %v275_v47 = vpop.f32.mrf.mxu3 }
  0xc7   :  { %v2493_v52 = vpop.eup %2492 }
  0xc8   :  { %320 = vrot.lane.b32.xlu0 %v2493_v52, %s2685_s3  ;;  %v2495_v54 = vpop.eup %2494 }
  0xc9   :  { %v285_v55 = vadd.f32 1.0, %v2495_v54 }
  0xcb   :  { %2496 = vrcp.f32 %v285_v55  ;;  %v298_v5 = vand.u32 2147483648, %v285_v55  ;;  %vm292_vm4 = vweird.f32 %v285_v55  ;;  %v296_v9 = vand.u32 2147483647, %v285_v55 }
  0xcd   :  { %v299_v13 = vor.u32 1.1754944e-38, %v298_v5  ;;  %vm297_vm6 = vcmp.eq.f32.partialorder %v296_v9, 8.507059e+37 }
  0xd1   :  { %v2497_v56 = vpop.eup %2496 }
  0xd2   :  { %v288_v60 = vmul.f32 %v2497_v56, %v285_v55  ;;  %vm293_vm3 = vweird.f32 %v2497_v56 }
  0xd3   :  { %vm294_vm5 = vmor %vm292_vm4, %vm293_vm3 }
  0xd4   :  { %v289_v61 = vsub.f32 1.0, %v288_v60 }
  0xd6   :  { %v290_v62 = vmul.f32 %v2497_v56, %v289_v61 }
  0xd8   :  { %v291_v1 = vadd.f32 %v2497_v56, %v290_v62 }
  0xda   :  { %v295_v12 = vsel %vm294_vm5, %v2497_v56, %v291_v1 }
  0xdb   :  { %v300_v25 = vsel %vm297_vm6, %v299_v13, %v295_v12 }
  0xdc   :  { %v318_v40 = vmul.f32 0.0, %v300_v25 }
 0x13a   :  { %v321_v17 = vpop.permute.xlu0 %320 }
 0x13b   :  { %v323_v32 = vmul.f32 %v321_v17, %v300_v25 }
 0x13d   :  { %325 = vrot.lane.b32.xlu0 %v323_v32, %s2685_s3 }
 0x1af   :  { %v326_v45 = vpop.permute.xlu0 %325 }
 0x1b0   :  { %v3009_v48 = vadd.f32 %v326_v45, %v318_v40 }
 0x1b2   :  { %2498 = vtanh.f32 %v3009_v48 }
 0x1b3   :  { %2500 = vpow2.f32 %v2276_v43 }
 0x1b8   :  { %v2499_v49 = vpop.eup %2498 }
 0x1b9   :  { %331 = vrot.lane.b32.xlu1 %v2499_v49, %s2685_s3  ;;  %v2501_v47 = vpop.eup %2500 }
 0x1ba   :  { %v286_v52 = vadd.f32 1.0, %v2501_v47 }
 0x1bc   :  { %2502 = vrcp.f32 %v286_v52  ;;  %v313_v61 = vand.u32 2147483648, %v286_v52  ;;  %vm307_vm8 = vweird.f32 %v286_v52  ;;  %v311_v62 = vand.u32 2147483647, %v286_v52 }
 0x1be   :  { %v314_v5 = vor.u32 1.1754944e-38, %v313_v61  ;;  %vm312_vm10 = vcmp.eq.f32.partialorder %v311_v62, 8.507059e+37 }
 0x1c2   :  { %v2503_v53 = vpop.eup %2502 }
 0x1c3   :  { %v303_v54 = vmul.f32 %v2503_v53, %v286_v52  ;;  %vm308_vm7 = vweird.f32 %v2503_v53 }
 0x1c4   :  { %vm309_vm9 = vmor %vm307_vm8, %vm308_vm7 }
 0x1c5   :  { %v304_v55 = vsub.f32 1.0, %v303_v54 }
 0x1c7   :  { %v305_v56 = vmul.f32 %v2503_v53, %v304_v55 }
 0x1c9   :  { %v306_v60 = vadd.f32 %v2503_v53, %v305_v56 }
 0x1cb   :  { %v310_v1 = vsel %vm309_vm9, %v2503_v53, %v306_v60 }
 0x1cc   :  { %v315_v9 = vsel %vm312_vm10, %v314_v5, %v310_v1 }
 0x22b   :  { %v332_v12 = vpop.permute.xlu1 %331 }
 0x22c   :  { %v3013_v51 = vmul.f32 %v332_v12, %v315_v9 }
 0x22e   :  { %v337_v13 = vpack.c.bf16 %v3013_v51, %v3013_v51 }
 0x230   :  { %2277 = vmatmul.msk.bf16.vlgmr.msrb.gmra.mxu2 %vm247_vm11, %v337_v13  ;;  %2278 = vmatmul.msk.bf16.vlgmr.msra.gmra.mxu3 %vm247_vm11, %v337_v13 }
 0x231   :  { %538 = vmatpush.bf16.msra.mxu3 %v2784_v14  ;;  %525 = vmatpush.bf16.msrb.mxu2 %v2804_v21 }
 0x235   :  { %539 = vmatpush.bf16.msra.mxu3 %v2807_v22  ;;  %526 = vmatpush.bf16.msrb.mxu2 %v2822_v27 }
 0x239   :  { %540 = vmatpush.bf16.msra.mxu3 %v2834_v30  ;;  %527 = vmatpush.bf16.msrb.mxu2 %v2838_v31 }
 0x23d   :  { %541 = vmatpush.bf16.msra.mxu3 %v2854_v36  ;;  %528 = vmatpush.bf16.msrb.mxu2 %v2858_v37 }
 0x2b3   :  { %v350_v17 = vpop.f32.mrf.mxu2  ;;  %v363_v25 = vpop.f32.mrf.mxu3 }
 0x2b4   :  { %v367_v32 = vadd.f32 %v350_v17, %v335_v33  ;;  %v368_v40 = vadd.f32 %v363_v25, %v336_v23 }
 0x2b6   :  { %2504 = vtanh.f32 %v368_v40  ;;  %v2279_v47 = vmul.f32 -1.442695, %v367_v32 }
 0x2b8   :  { %2506 = vpow2.f32 %v2279_v47 }
 0x2bb   :  { %v352_v45 = vpop.f32.mrf.mxu2  ;;  %v365_v49 = vpop.f32.mrf.mxu3 }
 0x2bc   :  { %v2505_v43 = vpop.eup %2504  ;;  %v2280_v45 = vmul.f32 -1.442695, %v368_v40 }
 0x2bd   :  { %410 = vrot.lane.b32.xlu1 %v2505_v43, %s2685_s3 }
 0x2be   :  { %v2507_v52 = vpop.eup %2506 }
 0x2bf   :  { %v375_v53 = vadd.f32 1.0, %v2507_v52 }
 0x2c1   :  { %2508 = vrcp.f32 %v375_v53  ;;  %v388_v61 = vand.u32 2147483648, %v375_v53  ;;  %vm382_vm13 = vweird.f32 %v375_v53  ;;  %v386_v23 = vand.u32 2147483647, %v375_v53 }
 0x2c3   :  { %v389_v1 = vor.u32 1.1754944e-38, %v388_v61  ;;  %vm387_vm15 = vcmp.eq.f32.partialorder %v386_v23, 8.507059e+37 }
 0x2c7   :  { %v2509_v54 = vpop.eup %2508 }
 0x2c8   :  { %v378_v55 = vmul.f32 %v2509_v54, %v375_v53  ;;  %vm383_vm12 = vweird.f32 %v2509_v54 }
 0x2c9   :  { %vm384_vm14 = vmor %vm382_vm13, %vm383_vm12 }
 0x2ca   :  { %v379_v33 = vsub.f32 1.0, %v378_v55 }
 0x2cc   :  { %v380_v56 = vmul.f32 %v2509_v54, %v379_v33 }
 0x2ce   :  { %v381_v60 = vadd.f32 %v2509_v54, %v380_v56 }
 0x2d0   :  { %v385_v62 = vsel %vm384_vm14, %v2509_v54, %v381_v60 }
 0x2d1   :  { %v390_v9 = vsel %vm387_vm15, %v389_v1, %v385_v62 }
 0x2d2   :  { %v408_v13 = vmul.f32 %v390_v9, %v3009_v48 }
 0x32f   :  { %v411_v5 = vpop.permute.xlu1 %410 }
 0x330   :  { %v413_v12 = vmul.f32 %v411_v5, %v390_v9 }
 0x332   :  { %415 = vrot.lane.b32.xlu2 %v413_v12, %s2685_s3 }
 0x38c   :  { %v416_v17 = vpop.permute.xlu2 %415 }
 0x38d   :  { %v3040_v25 = vadd.f32 %v416_v17, %v408_v13 }
 0x38f   :  { %2510 = vtanh.f32 %v3040_v25 }
 0x390   :  { %2512 = vpow2.f32 %v2280_v45 }
 0x395   :  { %v2511_v32 = vpop.eup %2510 }
 0x396   :  { %421 = vrot.lane.b32.xlu2 %v2511_v32, %s2685_s3  ;;  %v2513_v49 = vpop.eup %2512 }
 0x397   :  { %v376_v43 = vadd.f32 1.0, %v2513_v49 }
 0x399   :  { %2514 = vrcp.f32 %v376_v43  ;;  %v403_v48 = vand.u32 2147483648, %v376_v43  ;;  %vm397_vm4 = vweird.f32 %v376_v43  ;;  %v401_v33 = vand.u32 2147483647, %v376_v43 }
 0x39b   :  { %v404_v60 = vor.u32 1.1754944e-38, %v403_v48  ;;  %vm402_vm6 = vcmp.eq.f32.partialorder %v401_v33, 8.507059e+37 }
 0x39f   :  { %v2515_v47 = vpop.eup %2514 }
 0x3a0   :  { %v393_v52 = vmul.f32 %v2515_v47, %v376_v43  ;;  %vm398_vm3 = vweird.f32 %v2515_v47 }
 0x3a1   :  { %vm399_vm5 = vmor %vm397_vm4, %vm398_vm3 }
 0x3a2   :  { %v394_v53 = vsub.f32 1.0, %v393_v52 }
 0x3a4   :  { %v395_v54 = vmul.f32 %v2515_v47, %v394_v53 }
 0x3a6   :  { %v396_v55 = vadd.f32 %v2515_v47, %v395_v54 }
 0x3a8   :  { %v400_v56 = vsel %vm399_vm5, %v2515_v47, %v396_v55 }
 0x3a9   :  { %v405_v61 = vsel %vm402_vm6, %v404_v60, %v400_v56 }
 0x3f0   :  { %v422_v23 = vpop.permute.xlu2 %421 }
 0x3f1   :  { %v3044_v40 = vmul.f32 %v422_v23, %v405_v61 }
 0x3f3   :  { %v427_v62 = vpack.c.bf16 %v3044_v40, %v3044_v40 }
 0x3f5   :  { %2281 = vmatmul.msk.bf16.vlgmr.msra.gmra.mxu2 %vm247_vm11, %v427_v62  ;;  %2282 = vmatmul.msk.bf16.vlgmr.msrb.gmra.mxu3 %vm247_vm11, %v427_v62 }
 0x3f6   :  { %628 = vmatpush.bf16.msra.mxu2 %v2784_v14  ;;  %718 = vmatpush.bf16.msrb.mxu3 %v2784_v14 }
 0x3fa   :  { %629 = vmatpush.bf16.msra.mxu2 %v2807_v22  ;;  %719 = vmatpush.bf16.msrb.mxu3 %v2807_v22 }
 0x3fe   :  { %630 = vmatpush.bf16.msra.mxu2 %v2834_v30  ;;  %720 = vmatpush.bf16.msrb.mxu3 %v2834_v30 }
 0x402   :  { %631 = vmatpush.bf16.msra.mxu2 %v2854_v36  ;;  %721 = vmatpush.bf16.msrb.mxu3 %v2854_v36 }
 0x478   :  { %v440_v1 = vpop.f32.mrf.mxu2  ;;  %v453_v5 = vpop.f32.mrf.mxu3 }
 0x479   :  { %v457_v9 = vadd.f32 %v440_v1, %v425_v18  ;;  %v458_v12 = vadd.f32 %v453_v5, %v426_v10 }
 0x47b   :  { %2516 = vtanh.f32 %v458_v12  ;;  %v2283_v45 = vmul.f32 -1.442695, %v457_v9  ;;  %v2284_v9 = vmul.f32 -1.442695, %v458_v12 }
 0x47d   :  { %2518 = vpow2.f32 %v2283_v45 }
 0x480   :  { %v442_v13 = vpop.f32.mrf.mxu2  ;;  %v455_v17 = vpop.f32.mrf.mxu3 }
 0x481   :  { %v2517_v32 = vpop.eup %2516 }
 0x482   :  { %500 = vrot.lane.b32.xlu0 %v2517_v32, %s2685_s3 }
 0x483   :  { %v2519_v49 = vpop.eup %2518 }
 0x484   :  { %v465_v43 = vadd.f32 1.0, %v2519_v49 }
 0x486   :  { %2520 = vrcp.f32 %v465_v43  ;;  %v478_v55 = vand.u32 2147483648, %v465_v43  ;;  %vm472_vm8 = vweird.f32 %v465_v43  ;;  %v476_v10 = vand.u32 2147483647, %v465_v43 }
 0x488   :  { %v479_v33 = vor.u32 1.1754944e-38, %v478_v55  ;;  %vm477_vm10 = vcmp.eq.f32.partialorder %v476_v10, 8.507059e+37 }
 0x48c   :  { %v2521_v47 = vpop.eup %2520 }
 0x48d   :  { %v468_v52 = vmul.f32 %v2521_v47, %v465_v43  ;;  %vm473_vm7 = vweird.f32 %v2521_v47 }
 0x48e   :  { %vm474_vm9 = vmor %vm472_vm8, %vm473_vm7 }
 0x48f   :  { %v469_v18 = vsub.f32 1.0, %v468_v52 }
 0x491   :  { %v470_v53 = vmul.f32 %v2521_v47, %v469_v18 }
 0x493   :  { %v471_v54 = vadd.f32 %v2521_v47, %v470_v53 }
 0x495   :  { %v475_v48 = vsel %vm474_vm9, %v2521_v47, %v471_v54 }
 0x496   :  { %v480_v60 = vsel %vm477_vm10, %v479_v33, %v475_v48 }
 0x497   :  { %v498_v23 = vmul.f32 %v480_v60, %v3040_v25 }
 0x4f4   :  { %v501_v56 = vpop.permute.xlu0 %500 }
 0x4f5   :  { %v503_v61 = vmul.f32 %v501_v56, %v480_v60 }
 0x4f7   :  { %505 = vrot.lane.b32.xlu1 %v503_v61, %s2685_s3 }
 0x569   :  { %v506_v62 = vpop.permute.xlu1 %505 }
 0x56a   :  { %v3071_v1 = vadd.f32 %v506_v62, %v498_v23 }
 0x56c   :  { %2522 = vtanh.f32 %v3071_v1 }
 0x56d   :  { %2524 = vpow2.f32 %v2284_v9 }
 0x572   :  { %v2523_v5 = vpop.eup %2522 }
 0x573   :  { %511 = vrot.lane.b32.xlu2 %v2523_v5, %s2685_s3  ;;  %v2525_v13 = vpop.eup %2524 }
 0x574   :  { %v466_v17 = vadd.f32 1.0, %v2525_v13 }
 0x576   :  { %2526 = vrcp.f32 %v466_v17  ;;  %v493_v25 = vand.u32 2147483648, %v466_v17  ;;  %vm487_vm13 = vweird.f32 %v466_v17  ;;  %v491_v52 = vand.u32 2147483647, %v466_v17 }
 0x578   :  { %v494_v53 = vor.u32 1.1754944e-38, %v493_v25  ;;  %vm492_vm15 = vcmp.eq.f32.partialorder %v491_v52, 8.507059e+37 }
 0x57c   :  { %v2527_v32 = vpop.eup %2526 }
 0x57d   :  { %v483_v45 = vmul.f32 %v2527_v32, %v466_v17  ;;  %vm488_vm12 = vweird.f32 %v2527_v32 }
 0x57e   :  { %vm489_vm14 = vmor %vm487_vm13, %vm488_vm12 }
 0x57f   :  { %v484_v49 = vsub.f32 1.0, %v483_v45 }
 0x581   :  { %v485_v43 = vmul.f32 %v2527_v32, %v484_v49 }
 0x583   :  { %v486_v47 = vadd.f32 %v2527_v32, %v485_v43 }
 0x585   :  { %v490_v18 = vsel %vm489_vm14, %v2527_v32, %v486_v47 }
 0x586   :  { %v495_v54 = vsel %vm492_vm15, %v494_v53, %v490_v18 }
 0x5cd   :  { %v512_v55 = vpop.permute.xlu2 %511 }
 0x5ce   :  { %v3075_v12 = vmul.f32 %v512_v55, %v495_v54 }
 0x5d0   :  { %v517_v10 = vpack.c.bf16 %v3075_v12, %v3075_v12 }
 0x5d2   :  { %2285 = vmatmul.msk.bf16.vlgmr.msrb.gmra.mxu2 %vm247_vm11, %v517_v10  ;;  %2286 = vmatmul.msk.bf16.vlgmr.msra.gmra.mxu3 %vm247_vm11, %v517_v10 }
 0x5d3   :  { %705 = vmatpush.bf16.msrb.mxu2 %v2804_v21  ;;  %898 = vmatpush.bf16.msra.mxu3 %v2784_v14 }
 0x5d7   :  { %706 = vmatpush.bf16.msrb.mxu2 %v2822_v27  ;;  %899 = vmatpush.bf16.msra.mxu3 %v2807_v22 }
 0x5db   :  { %707 = vmatpush.bf16.msrb.mxu2 %v2838_v31  ;;  %900 = vmatpush.bf16.msra.mxu3 %v2834_v30 }
 0x5df   :  { %708 = vmatpush.bf16.msrb.mxu2 %v2858_v37  ;;  %901 = vmatpush.bf16.msra.mxu3 %v2854_v36 }
 0x655   :  { %v530_v48 = vpop.f32.mrf.mxu2  ;;  %v543_v33 = vpop.f32.mrf.mxu3 }
 0x656   :  { %v548_v14 = vadd.f32 %v543_v33, %v516_v63  ;;  %v547_v30 = vadd.f32 %v530_v48, %v515_v6 }
 0x658   :  { %2528 = vtanh.f32 %v548_v14  ;;  %v2287_v36 = vmul.f32 -1.442695, %v547_v30  ;;  %v2288_v54 = vmul.f32 -1.442695, %v548_v14 }
 0x65a   :  { %2530 = vpow2.f32 %v2287_v36 }
 0x65d   :  { %v532_v56 = vpop.f32.mrf.mxu2  ;;  %v545_v60 = vpop.f32.mrf.mxu3 }
 0x65e   :  { %v2529_v22 = vpop.eup %2528 }
 0x65f   :  { %590 = vrot.lane.b32.xlu0 %v2529_v22, %s2685_s3 }
 0x660   :  { %v2531_v61 = vpop.eup %2530 }
 0x661   :  { %v555_v23 = vadd.f32 1.0, %v2531_v61 }
 0x663   :  { %2532 = vrcp.f32 %v555_v23  ;;  %v568_v17 = vand.u32 2147483648, %v555_v23  ;;  %vm562_vm4 = vweird.f32 %v555_v23  ;;  %v566_v32 = vand.u32 2147483647, %v555_v23 }
 0x665   :  { %v569_v49 = vor.u32 1.1754944e-38, %v568_v17  ;;  %vm567_vm6 = vcmp.eq.f32.partialorder %v566_v32, 8.507059e+37 }
 0x669   :  { %v2533_v62 = vpop.eup %2532 }
 0x66a   :  { %v558_v5 = vmul.f32 %v2533_v62, %v555_v23  ;;  %vm563_vm3 = vweird.f32 %v2533_v62 }
 0x66b   :  { %vm564_vm5 = vmor %vm562_vm4, %vm563_vm3 }
 0x66c   :  { %v559_v63 = vsub.f32 1.0, %v558_v5 }
 0x66e   :  { %v560_v9 = vmul.f32 %v2533_v62, %v559_v63 }
 0x670   :  { %v561_v13 = vadd.f32 %v2533_v62, %v560_v9 }
 0x672   :  { %v565_v45 = vsel %vm564_vm5, %v2533_v62, %v561_v13 }
 0x673   :  { %v570_v6 = vsel %vm567_vm6, %v569_v49, %v565_v45 }
 0x674   :  { %v588_v25 = vmul.f32 %v570_v6, %v3071_v1 }
 0x6d1   :  { %v591_v43 = vpop.permute.xlu0 %590 }
 0x6d2   :  { %v593_v47 = vmul.f32 %v591_v43, %v570_v6 }
 0x6d4   :  { %595 = vrot.lane.b32.xlu1 %v593_v47, %s2685_s3 }
 0x746   :  { %v596_v52 = vpop.permute.xlu1 %595 }
 0x747   :  { %v3102_v18 = vadd.f32 %v596_v52, %v588_v25 }
 0x749   :  { %2534 = vtanh.f32 %v3102_v18 }
 0x74a   :  { %2536 = vpow2.f32 %v2288_v54 }
 0x74f   :  { %v2535_v53 = vpop.eup %2534 }
 0x750   :  { %601 = vrot.lane.b32.xlu2 %v2535_v53, %s2685_s3  ;;  %v2537_v55 = vpop.eup %2536 }
 0x751   :  { %v556_v10 = vadd.f32 1.0, %v2537_v55 }
 0x753   :  { %2538 = vrcp.f32 %v556_v10  ;;  %v583_v1 = vand.u32 2147483648, %v556_v10  ;;  %vm577_vm8 = vweird.f32 %v556_v10  ;;  %v581_v30 = vand.u32 2147483647, %v556_v10 }
 0x755   :  { %v584_v61 = vor.u32 1.1754944e-38, %v583_v1  ;;  %vm582_vm10 = vcmp.eq.f32.partialorder %v581_v30, 8.507059e+37 }
 0x759   :  { %v2539_v48 = vpop.eup %2538 }
 0x75a   :  { %v573_v33 = vmul.f32 %v2539_v48, %v556_v10  ;;  %vm578_vm7 = vweird.f32 %v2539_v48 }
 0x75b   :  { %vm579_vm9 = vmor %vm577_vm8, %vm578_vm7 }
 0x75c   :  { %v574_v56 = vsub.f32 1.0, %v573_v33 }
 0x75e   :  { %v575_v60 = vmul.f32 %v2539_v48, %v574_v56 }
 0x760   :  { %v576_v22 = vadd.f32 %v2539_v48, %v575_v60 }
 0x762   :  { %v580_v36 = vsel %vm579_vm9, %v2539_v48, %v576_v22 }
 0x763   :  { %v585_v23 = vsel %vm582_vm10, %v584_v61, %v580_v36 }
 0x7aa   :  { %v602_v62 = vpop.permute.xlu2 %601 }
 0x7ab   :  { %v3106_v14 = vmul.f32 %v602_v62, %v585_v23 }
 0x7ad   :  { %v607_v5 = vpack.c.bf16 %v3106_v14, %v3106_v14 }
 0x7af   :  { %2289 = vmatmul.msk.bf16.vlgmr.msra.gmra.mxu0 %vm247_vm11, %v607_v5  ;;  %2290 = vmatmul.msk.bf16.vlgmr.msra.gmra.mxu2 %vm247_vm11, %v607_v5 }
 0x7b0   :  { %885 = vmatpush.bf16.msra.mxu2 %v2804_v21 }
 0x7b4   :  { %886 = vmatpush.bf16.msra.mxu2 %v2822_v27 }
 0x7b8   :  { %887 = vmatpush.bf16.msra.mxu2 %v2838_v31 }
 0x7bc   :  { %888 = vmatpush.bf16.msra.mxu2 %v2858_v37 }
 0x82c   :  { %v620_v63 = vpop.f32.mrf.mxu0 }
 0x82d   :  { %v637_v9 = vadd.f32 %v620_v63, %v605_v7 }
 0x82f   :  { %v2291_v37 = vmul.f32 -1.442695, %v637_v9 }
 0x832   :  { %v633_v13 = vpop.f32.mrf.mxu2 }
 0x833   :  { %v638_v21 = vadd.f32 %v633_v13, %v606_v0 }
 0x834   :  { %v622_v17 = vpop.f32.mrf.mxu0 }
 0x835   :  { %2540 = vtanh.f32 %v638_v21  ;;  %v2292_v48 = vmul.f32 -1.442695, %v638_v21 }
 0x836   :  { %2542 = vpow2.f32 %v2291_v37 }
 0x83a   :  { %v635_v27 = vpop.f32.mrf.mxu2 }
 0x83b   :  { %v2541_v31 = vpop.eup %2540 }
 0x83c   :  { %680 = vrot.lane.b32.xlu0 %v2541_v31, %s2685_s3  ;;  %v2543_v32 = vpop.eup %2542 }
 0x83d   :  { %v645_v45 = vadd.f32 1.0, %v2543_v32 }
 0x83f   :  { %2544 = vrcp.f32 %v645_v45  ;;  %v658_v6 = vand.u32 2147483648, %v645_v45  ;;  %vm652_vm13 = vweird.f32 %v645_v45  ;;  %v656_v58 = vand.u32 2147483647, %v645_v45 }
 0x841   :  { %v659_v0 = vor.u32 1.1754944e-38, %v658_v6  ;;  %vm657_vm15 = vcmp.eq.f32.partialorder %v656_v58, 8.507059e+37 }
 0x845   :  { %v2545_v3 = vpop.eup %2544 }
 0x846   :  { %v648_v4 = vmul.f32 %v2545_v3, %v645_v45  ;;  %vm653_vm12 = vweird.f32 %v2545_v3 }
 0x847   :  { %vm654_vm14 = vmor %vm652_vm13, %vm653_vm12 }
 0x848   :  { %v649_v7 = vsub.f32 1.0, %v648_v4 }
 0x84a   :  { %v650_v49 = vmul.f32 %v2545_v3, %v649_v7 }
 0x84c   :  { %v651_v43 = vadd.f32 %v2545_v3, %v650_v49 }
 0x84e   :  { %v655_v59 = vsel %vm654_vm14, %v2545_v3, %v651_v43 }
 0x84f   :  { %v660_v47 = vsel %vm657_vm15, %v659_v0, %v655_v59 }
 0x850   :  { %v678_v53 = vmul.f32 %v660_v47, %v3102_v18 }
 0x8ae   :  { %v681_v25 = vpop.permute.xlu0 %680 }
 0x8af   :  { %v683_v52 = vmul.f32 %v681_v25, %v660_v47 }
 0x8b1   :  { %685 = vrot.lane.b32.xlu1 %v683_v52, %s2685_s3 }
 0x923   :  { %v686_v54 = vpop.permute.xlu1 %685 }
 0x924   :  { %v688_v55 = vadd.f32 %v686_v54, %v678_v53 }
 0x926   :  { %2546 = vtanh.f32 %v688_v55 }
 0x927   :  { %2548 = vpow2.f32 %v2292_v48 }
 0x92c   :  { %v2547_v10 = vpop.eup %2546 }
 0x92d   :  { %691 = vrot.lane.b32.xlu2 %v2547_v10, %s2685_s3  ;;  %v2549_v33 = vpop.eup %2548 }
 0x92e   :  { %v646_v56 = vadd.f32 1.0, %v2549_v33 }
 0x930   :  { %2550 = vrcp.f32 %v646_v56  ;;  %v673_v61 = vand.u32 2147483648, %v646_v56  ;;  %vm667_vm4 = vweird.f32 %v646_v56  ;;  %v671_v18 = vand.u32 2147483647, %v646_v56 }
 0x932   :  { %v674_v62 = vor.u32 1.1754944e-38, %v673_v61  ;;  %vm672_vm6 = vcmp.eq.f32.partialorder %v671_v18, 8.507059e+37 }
 0x936   :  { %v2551_v60 = vpop.eup %2550 }
 0x937   :  { %v663_v22 = vmul.f32 %v2551_v60, %v646_v56  ;;  %vm668_vm3 = vweird.f32 %v2551_v60 }
 0x938   :  { %vm669_vm5 = vmor %vm667_vm4, %vm668_vm3 }
 0x939   :  { %v664_v1 = vsub.f32 1.0, %v663_v22 }
 0x93b   :  { %v665_v30 = vmul.f32 %v2551_v60, %v664_v1 }
 0x93d   :  { %v666_v36 = vadd.f32 %v2551_v60, %v665_v30 }
 0x93f   :  { %v670_v23 = vsel %vm669_vm5, %v2551_v60, %v666_v36 }
 0x940   :  { %v675_v63 = vsel %vm672_vm6, %v674_v62, %v670_v23 }
 0x987   :  { %v692_v5 = vpop.permute.xlu2 %691 }
 0x988   :  { %v3130_v9 = vmul.f32 %v692_v5, %v675_v63 }
 0x98a   :  { %v697_v13 = vpack.c.bf16 %v3130_v9, %v3130_v9 }
 0x98c   :  { %2293 = vmatmul.msk.bf16.vlgmr.msrb.gmra.mxu2 %vm247_vm11, %v697_v13  ;;  %2294 = vmatmul.msk.bf16.vlgmr.msrb.gmra.mxu3 %vm247_vm11, %v697_v13 }
 0xa0f   :  { %v710_v21 = vpop.f32.mrf.mxu2  ;;  %v723_v17 = vpop.f32.mrf.mxu3 }
 0xa10   :  { %v727_v27 = vadd.f32 %v710_v21, %v695_v19  ;;  %v728_v31 = vadd.f32 %v723_v17, %v696_v11 }
 0xa12   :  { %2552 = vtanh.f32 %v728_v31  ;;  %v2295_v3 = vmul.f32 -1.442695, %v727_v27  ;;  %v2296_v54 = vmul.f32 -1.442695, %v728_v31 }
 0xa14   :  { %2554 = vpow2.f32 %v2295_v3 }
 0xa17   :  { %v712_v37 = vpop.f32.mrf.mxu2  ;;  %v725_v32 = vpop.f32.mrf.mxu3 }
 0xa18   :  { %v2553_v45 = vpop.eup %2552 }
 0xa19   :  { %770 = vrot.lane.b32.xlu0 %v2553_v45, %s2685_s3 }
 0xa1a   :  { %v2555_v4 = vpop.eup %2554 }
 0xa1b   :  { %v735_v7 = vadd.f32 1.0, %v2555_v4 }
 0xa1d   :  { %2556 = vrcp.f32 %v735_v7  ;;  %v748_v6 = vand.u32 2147483648, %v735_v7  ;;  %vm742_vm8 = vweird.f32 %v735_v7  ;;  %v746_v46 = vand.u32 2147483647, %v735_v7 }
 0xa1f   :  { %v749_v11 = vor.u32 1.1754944e-38, %v748_v6  ;;  %vm747_vm10 = vcmp.eq.f32.partialorder %v746_v46, 8.507059e+37 }
 0xa23   :  { %v2557_v49 = vpop.eup %2556 }
 0xa24   :  { %v738_v50 = vmul.f32 %v2557_v49, %v735_v7  ;;  %vm743_vm7 = vweird.f32 %v2557_v49 }
 0xa25   :  { %vm744_vm9 = vmor %vm742_vm8, %vm743_vm7 }
 0xa26   :  { %v739_v15 = vsub.f32 1.0, %v738_v50 }
 0xa28   :  { %v740_v19 = vmul.f32 %v2557_v49, %v739_v15 }
 0xa2a   :  { %v741_v43 = vadd.f32 %v2557_v49, %v740_v19 }
 0xa2c   :  { %v745_v8 = vsel %vm744_vm9, %v2557_v49, %v741_v43 }
 0xa2d   :  { %v750_v59 = vsel %vm747_vm10, %v749_v11, %v745_v8 }
 0xa2e   :  { %v768_v47 = vmul.f32 %v750_v59, %v688_v55 }
 0xa8b   :  { %v771_v58 = vpop.permute.xlu0 %770 }
 0xa8c   :  { %v773_v0 = vmul.f32 %v771_v58, %v750_v59 }
 0xa8e   :  { %775 = vrot.lane.b32.xlu1 %v773_v0, %s2685_s3  ;;  %v2339_v0 = vld [vmem:[%s3757_s4 + $0x10] sm:$0xf] }
 0xb00   :  { %v776_v25 = vpop.permute.xlu1 %775 }
 0xb01   :  { %v778_v52 = vadd.f32 %v776_v25, %v768_v47  ;;  %v2459_v47 = vld [vmem:[%s3757_s4 + $0x14] sm:$0xf0]  ;;  %v2458_v25 = vld [vmem:[%s3757_s4 + $0x14] sm:$0xf] }
 0xb03   :  { %2558 = vtanh.f32 %v778_v52 }
 0xb04   :  { %2560 = vpow2.f32 %v2296_v54  ;;  %v2331_v54 = vld [vmem:[%s3757_s4] sm:$0xf] }
 0xb09   :  { %v2559_v53 = vpop.eup %2558 }
 0xb0a   :  { %781 = vrot.lane.b32.xlu2 %v2559_v53, %s2685_s3  ;;  %v2561_v10 = vpop.eup %2560  ;;  %v2341_v53 = vld [vmem:[%s3757_s4 + $0x18] sm:$0xf0] }
 0xb0b   :  { %v736_v48 = vadd.f32 1.0, %v2561_v10  ;;  %v2457_v10 = vld [vmem:[%s3757_s4 + $0x4] sm:$0xf0] }
 0xb0d   :  { %2562 = vrcp.f32 %v736_v48  ;;  %v763_v30 = vand.u32 2147483648, %v736_v48  ;;  %vm757_vm13 = vweird.f32 %v736_v48  ;;  %v761_v55 = vand.u32 2147483647, %v736_v48 }
 0xb0f   :  { %v764_v61 = vor.u32 1.1754944e-38, %v763_v30  ;;  %vm762_vm15 = vcmp.eq.f32.partialorder %v761_v55, 8.507059e+37 }
 0xb13   :  { %v2563_v33 = vpop.eup %2562 }
 0xb14   :  { %v753_v56 = vmul.f32 %v2563_v33, %v736_v48  ;;  %vm758_vm12 = vweird.f32 %v2563_v33  ;;  %v2344_v48 = vor.u32 %v2458_v25, %v2341_v53 }
 0xb15   :  { %vm759_vm14 = vmor %vm757_vm13, %vm758_vm12 }
 0xb16   :  { %v754_v60 = vsub.f32 1.0, %v753_v56  ;;  %v2333_v56 = vld [vmem:[%s3757_s4 + $0x8] sm:$0xf0]  ;;  %1150 = vmatpush.bf16.msrb.mxu3 %v2344_v48  ;;  %v2315_v48 = vld [vmem:[%s3757_s4 + $0x30] sm:$0xf] }
 0xb18   :  { %v755_v22 = vmul.f32 %v2563_v33, %v754_v60  ;;  %v2332_v60 = vor.u32 %v2457_v10, %v2331_v54  ;;  %v2317_v54 = vld [vmem:[%s3757_s4 + $0x38] sm:$0xf0]  ;;  %v2309_v10 = vld [vmem:[%s3757_s4 + $0x28] sm:$0xf0] }
 0xb1a   :  { %v756_v1 = vadd.f32 %v2563_v33, %v755_v22 }
 0xb1c   :  { %v760_v36 = vsel %vm759_vm14, %v2563_v33, %v756_v1  ;;  %v2456_v33 = vld [vmem:[%s3757_s4 + $0x4] sm:$0xf] }
 0xb1d   :  { %v765_v18 = vsel %vm762_vm15, %v764_v61, %v760_v36  ;;  %v2336_v22 = vor.u32 %v2456_v33, %v2333_v56  ;;  %v2463_v33 = vld [vmem:[%s3757_s4 + $0x34] sm:$0xf0] }
 0xb1e   :  { %v2316_v56 = vor.u32 %v2463_v33, %v2315_v48 }
 0xb1f   :  { %1151 = vmatpush.bf16.msrb.mxu3 %v2336_v22  ;;  %v2461_v22 = vld [vmem:[%s3757_s4 + $0x24] sm:$0xf0] }
 0xb20   :  { %1031 = vmatpush.bf16.msra.mxu0 %v2316_v56 }
 0xb64   :  { %v782_v23 = vpop.permute.xlu2 %781 }
 0xb65   :  { %v3149_v62 = vmul.f32 %v782_v23, %v765_v18 }
 0xb67   :  { %v787_v5 = vpack.c.bf16 %v3149_v62, %v3149_v62 }
 0xb69   :  { %2297 = vmatmul.msk.bf16.vlgmr.msrb.gmra.mxu0 %vm247_vm11, %v787_v5  ;;  %2298 = vmatmul.msk.bf16.vlgmr.msrb.gmra.mxu1 %vm247_vm11, %v787_v5 }
 0xbe6   :  { %v800_v63 = vpop.f32.mrf.mxu0  ;;  %v813_v13 = vpop.f32.mrf.mxu1 }
 0xbe7   :  { %v817_v21 = vadd.f32 %v800_v63, %v785_v34  ;;  %v818_v17 = vadd.f32 %v813_v13, %v786_v24 }
 0xbe9   :  { %2564 = vtanh.f32 %v818_v17  ;;  %v2299_v32 = vmul.f32 -1.442695, %v817_v21  ;;  %v2300_v11 = vmul.f32 -1.442695, %v818_v17 }
 0xbeb   :  { %2566 = vpow2.f32 %v2299_v32  ;;  %v975_v32 = vpack.c.bf16 %v3149_v62, %v3130_v9 }
 0xbee   :  { %v802_v27 = vpop.f32.mrf.mxu0  ;;  %v815_v31 = vpop.f32.mrf.mxu1 }
 0xbef   :  { %v2565_v37 = vpop.eup %2564  ;;  %v973_v31 = vpack.c.bf16 %v3044_v40, %v3013_v51 }
 0xbf0   :  { %860 = vrot.lane.b32.xlu0 %v2565_v37, %s2685_s3  ;;  %v974_v37 = vpack.c.bf16 %v3106_v14, %v3075_v12 }
 0xbf1   :  { %v2567_v45 = vpop.eup %2566 }
 0xbf2   :  { %v825_v3 = vadd.f32 1.0, %v2567_v45 }
 0xbf4   :  { %2568 = vrcp.f32 %v825_v3  ;;  %v838_v49 = vand.u32 2147483648, %v825_v3  ;;  %vm832_vm4 = vweird.f32 %v825_v3  ;;  %v836_v16 = vand.u32 2147483647, %v825_v3 }
 0xbf6   :  { %v839_v24 = vor.u32 1.1754944e-38, %v838_v49  ;;  %vm837_vm6 = vcmp.eq.f32.partialorder %v836_v16, 8.507059e+37 }
 0xbfa   :  { %v2569_v4 = vpop.eup %2568 }
 0xbfb   :  { %v828_v26 = vmul.f32 %v2569_v4, %v825_v3  ;;  %vm833_vm3 = vweird.f32 %v2569_v4 }
 0xbfc   :  { %vm834_vm5 = vmor %vm832_vm4, %vm833_vm3 }
 0xbfd   :  { %v829_v28 = vsub.f32 1.0, %v828_v26 }
 0xbff   :  { %v830_v34 = vmul.f32 %v2569_v4, %v829_v28 }
 0xc01   :  { %v831_v7 = vadd.f32 %v2569_v4, %v830_v34 }
 0xc03   :  { %v835_v20 = vsel %vm834_vm5, %v2569_v4, %v831_v7 }
 0xc04   :  { %v840_v15 = vsel %vm837_vm6, %v839_v24, %v835_v20 }
 0xc05   :  { %v858_v43 = vmul.f32 %v840_v15, %v778_v52  ;;  %v2340_v52 = vor.u32 %v2459_v47, %v2339_v0  ;;  %v979_v47 = vpack.c.bf16 %v3075_v12, %v3106_v14  ;;  %v2460_v12 = vld [vmem:[%s3757_s4 + $0x24] sm:$0xf] }
 0xc07   :  { %1121 = vmatpush.bf16.msrb.mxu2 %v2340_v52 }
 0xc0b   :  { %1122 = vmatpush.bf16.msrb.mxu2 %v2332_v60  ;;  %v2307_v60 = vld [vmem:[%s3757_s4 + $0x20] sm:$0xf] }
 0xc62   :  { %v861_v50 = vpop.permute.xlu0 %860 }
 0xc63   :  { %v863_v19 = vmul.f32 %v861_v50, %v840_v15 }
 0xc65   :  { %865 = vrot.lane.b32.xlu1 %v863_v19, %s2685_s3 }
 0xcd7   :  { %v866_v6 = vpop.permute.xlu1 %865 }
 0xcd8   :  { %v3167_v46 = vadd.f32 %v866_v6, %v858_v43 }
 0xcda   :  { %2570 = vtanh.f32 %v3167_v46 }
 0xcdb   :  { %2572 = vpow2.f32 %v2300_v11 }
 0xce0   :  { %v2571_v8 = vpop.eup %2570 }
 0xce1   :  { %871 = vrot.lane.b32.xlu2 %v2571_v8, %s2685_s3  ;;  %v2573_v58 = vpop.eup %2572  ;;  %v978_v8 = vpack.c.bf16 %v3130_v9, %v3149_v62 }
 0xce2   :  { %v826_v59 = vadd.f32 1.0, %v2573_v58 }
 0xce4   :  { %2574 = vrcp.f32 %v826_v59  ;;  %v853_v18 = vand.u32 2147483648, %v826_v59  ;;  %vm847_vm8 = vweird.f32 %v826_v59  ;;  %v851_v23 = vand.u32 2147483647, %v826_v59 }
 0xce6   :  { %v854_v63 = vor.u32 1.1754944e-38, %v853_v18  ;;  %vm852_vm10 = vcmp.eq.f32.partialorder %v851_v23, 8.507059e+37 }
 0xcea   :  { %v2575_v1 = vpop.eup %2574 }
 0xceb   :  { %v843_v30 = vmul.f32 %v2575_v1, %v826_v59  ;;  %vm848_vm7 = vweird.f32 %v2575_v1 }
 0xcec   :  { %vm849_vm9 = vmor %vm847_vm8, %vm848_vm7 }
 0xced   :  { %v844_v55 = vsub.f32 1.0, %v843_v30 }
 0xcef   :  { %v845_v36 = vmul.f32 %v2575_v1, %v844_v55  ;;  %v2308_v55 = vor.u32 %v2461_v22, %v2307_v60 }
 0xcf1   :  { %v846_v61 = vadd.f32 %v2575_v1, %v845_v36  ;;  %1032 = vmatpush.bf16.msra.mxu0 %v2308_v55 }
 0xcf3   :  { %v850_v5 = vsel %vm849_vm9, %v2575_v1, %v846_v61  ;;  %v2312_v1 = vor.u32 %v2460_v12, %v2309_v10 }
 0xcf4   :  { %v855_v13 = vsel %vm852_vm10, %v854_v63, %v850_v5 }
 0xd3b   :  { %v872_v21 = vpop.permute.xlu2 %871 }
 0xd3c   :  { %v3195_v17 = vmul.f32 %v872_v21, %v855_v13 }
 0xd3e   :  { %v877_v27 = vpack.c.bf16 %v3195_v17, %v3195_v17 }
 0xd40   :  { %2301 = vmatmul.msk.bf16.vlgmr.msra.gmra.mxu2 %vm247_vm11, %v877_v27  ;;  %2302 = vmatmul.msk.bf16.vlgmr.msra.gmra.mxu3 %vm247_vm11, %v877_v27 }
 0xd50   :  { %2345 = vmatmul.msk.bf16.vlgmr.msrb.gmra.mxu2 %vm126_vm0, %v973_v31  ;;  %2349 = vmatmul.msk.bf16.vlgmr.msrb.gmra.mxu3 %vm126_vm0, %v973_v31 }
 0xd60   :  { %2346 = vmatmul.msk.bf16.gmra.mxu2 %vm126_vm0, %v974_v37  ;;  %2350 = vmatmul.msk.bf16.gmra.mxu3 %vm126_vm0, %v974_v37 }
 0xd70   :  { %2347 = vmatmul.msk.bf16.gmra.mxu2 %vm126_vm0, %v975_v32  ;;  %2351 = vmatmul.msk.bf16.gmra.mxu3 %vm126_vm0, %v975_v32  ;;  %v980_v32 = vpack.c.bf16 %v3013_v51, %v3044_v40  ;;  %v2468_v51 = vld [vmem:[%s3758_s5 + $0x24] sm:$0xf]  ;;  %v2373_v40 = vld [vmem:[%s3758_s5 + $0x28] sm:$0xf0] }
 0xdc3   :  { %v890_v45 = vpop.f32.mrf.mxu2  ;;  %v903_v3 = vpop.f32.mrf.mxu3 }
 0xdc4   :  { %v907_v4 = vadd.f32 %v890_v45, %v875_v42  ;;  %v908_v26 = vadd.f32 %v903_v3, %v876_v38  ;;  %v2470_v45 = vld [vmem:[%s3758_s5 + $0x34] sm:$0xf]  ;;  %v2381_v3 = vld [vmem:[%s3758_s5 + $0x38] sm:$0xf0] }
 0xdc6   :  { %2576 = vtanh.f32 %v908_v26  ;;  %v2303_v49 = vmul.f32 -1.442695, %v907_v4  ;;  %v2304_v25 = vmul.f32 -1.442695, %v908_v26  ;;  %v3281_v4 = vor.u32 %v2468_v51, %v2373_v40 }
 0xdc8   :  { %2578 = vpow2.f32 %v2303_v49 }
 0xdcb   :  { %v892_v28 = vpop.f32.mrf.mxu2  ;;  %v905_v34 = vpop.f32.mrf.mxu3 }
 0xdcc   :  { %v2577_v7 = vpop.eup %2576  ;;  %v2466_v28 = vld [vmem:[%s3758_s5 + $0x14] sm:$0xf]  ;;  %v2365_v34 = vld [vmem:[%s3758_s5 + $0x18] sm:$0xf0] }
 0xdcd   :  { %950 = vrot.lane.b32.xlu0 %v2577_v7, %s2685_s3  ;;  %v3293_v7 = vor.u32 %v2466_v28, %v2365_v34 }
 0xdce   :  { %v2579_v16 = vpop.eup %2578 }
 0xdcf   :  { %v915_v20 = vadd.f32 1.0, %v2579_v16  ;;  %v2379_v16 = vld [vmem:[%s3758_s5 + $0x30] sm:$0xf] }
 0xdd1   :  { %2580 = vrcp.f32 %v915_v20  ;;  %v928_v15 = vand.u32 2147483648, %v915_v20  ;;  %vm922_vm13 = vweird.f32 %v915_v20  ;;  %v926_v29 = vand.u32 2147483647, %v915_v20 }
 0xdd3   :  { %v929_v38 = vor.u32 1.1754944e-38, %v928_v15  ;;  %vm927_vm15 = vcmp.eq.f32.partialorder %v926_v29, 8.507059e+37  ;;  %v2469_v15 = vld [vmem:[%s3758_s5 + $0x24] sm:$0xf0] }
 0xdd7   :  { %v2581_v24 = vpop.eup %2580 }
 0xdd8   :  { %v918_v41 = vmul.f32 %v2581_v24, %v915_v20  ;;  %vm923_vm12 = vweird.f32 %v2581_v24  ;;  %v2471_v20 = vld [vmem:[%s3758_s5 + $0x34] sm:$0xf0] }
 0xdd9   :  { %vm924_vm14 = vmor %vm922_vm13, %vm923_vm12 }
 0xdda   :  { %v919_v44 = vsub.f32 1.0, %v918_v41  ;;  %v2357_v41 = vld [vmem:[%s3758_s5 + $0x8] sm:$0xf0] }
 0xddc   :  { %v920_v42 = vmul.f32 %v2581_v24, %v919_v44  ;;  %v3311_v44 = vor.u32 %v2471_v20, %v2379_v16 }
 0xdde   :  { %v921_v50 = vadd.f32 %v2581_v24, %v920_v42  ;;  %v2371_v42 = vld [vmem:[%s3758_s5 + $0x20] sm:$0xf]  ;;  %1249 = vmatpush.bf16.msrb.mxu0 %v3311_v44  ;;  %1339 = vmatpush.bf16.msra.mxu2 %v3311_v44 }
 0xddf   :  { %v3322_v29 = vor.u32 %v2469_v15, %v2371_v42 }
 0xde0   :  { %v925_v35 = vsel %vm924_vm14, %v2581_v24, %v921_v50  ;;  %v2464_v24 = vld [vmem:[%s3758_s5 + $0x4] sm:$0xf] }
 0xde1   :  { %v930_v43 = vsel %vm927_vm15, %v929_v38, %v925_v35  ;;  %v3316_v50 = vor.u32 %v2464_v24, %v2357_v41  ;;  %v2363_v35 = vld [vmem:[%s3758_s5 + $0x10] sm:$0xf]  ;;  %v2467_v38 = vld [vmem:[%s3758_s5 + $0x14] sm:$0xf0] }
 0xde2   :  { %v948_v11 = vmul.f32 %v930_v43, %v3167_v46  ;;  %v2462_v46 = vld [vmem:[%s3757_s4 + $0x34] sm:$0xf]  ;;  %1250 = vmatpush.bf16.msrb.mxu0 %v3322_v29  ;;  %1340 = vmatpush.bf16.msra.mxu2 %v3322_v29  ;;  %s2693_s4 = smov 56  }
 0xde3   :  { %v2320_v14 = vor.u32 %v2462_v46, %v2317_v54 }
 0xde5   :  { %1060 = vmatpush.bf16.msra.mxu1 %v2320_v14 }
 0xde9   :  { %1061 = vmatpush.bf16.msra.mxu1 %v2312_v1 }
 0xe3f   :  { %v951_v19 = vpop.permute.xlu0 %950 }
 0xe40   :  { %v953_v6 = vmul.f32 %v951_v19, %v930_v43  ;;  %v3336_v19 = vor.u32 %v2467_v38, %v2363_v35  ;;  %v2355_v43 = vld [vmem:[%s3758_s5] sm:$0xf] }
 0xe42   :  { %955 = vrot.lane.b32.xlu1 %v953_v6, %s2685_s3  ;;  %v2465_v6 = vld [vmem:[%s3758_s5 + $0x4] sm:$0xf0]  ;;  %1251 = vmatpush.bf16.msrb.mxu0 %v3336_v19 }
 0xe43   :  { %1341 = vmatpush.bf16.msra.mxu2 %v3336_v19 }
 0xe4a   :  { %987 = vrot.lane.b32.xlu1 %v978_v8, %s2686_s2  ;;  %v3348_v8 = vor.u32 %v2465_v6, %v2355_v43 }
 0xe4c   :  { %1252 = vmatpush.bf16.msrb.mxu0 %v3348_v8  ;;  %1342 = vmatpush.bf16.msra.mxu2 %v3348_v8 }
 0xe50   :  { %1519 = vmatpush.bf16.msrb.mxu2 %v3311_v44 }
 0xe54   :  { %1520 = vmatpush.bf16.msrb.mxu2 %v3322_v29 }
 0xe58   :  { %1521 = vmatpush.bf16.msrb.mxu2 %v3336_v19 }
 0xe5c   :  { %1522 = vmatpush.bf16.msrb.mxu2 %v3348_v8 }
 0xeb4   :  { %v956_v58 = vpop.permute.xlu1 %955 }
 0xeb5   :  { %v958_v59 = vadd.f32 %v956_v58, %v948_v11 }
 0xeb7   :  { %2582 = vtanh.f32 %v958_v59  ;;  %v1124_v59 = vpop.f32.mrf.mxu2 }
 0xeb8   :  { %2584 = vpow2.f32 %v2304_v25 }
 0xebc   :  { %v988_v49 = vpop.permute.xlu1 %987 }
 0xebd   :  { %v2583_v0 = vpop.eup %2582 }
 0xebe   :  { %961 = vrot.lane.b32.xlu2 %v2583_v0, %s2685_s3  ;;  %v2585_v52 = vpop.eup %2584  ;;  %v3379_v0 = vpop.f32.mrf.mxu3 }
 0xebf   :  { %v916_v9 = vadd.f32 1.0, %v2585_v52 }
 0xec1   :  { %2586 = vrcp.f32 %v916_v9  ;;  %v943_v18 = vand.u32 2147483648, %v916_v9  ;;  %vm937_vm4 = vweird.f32 %v916_v9  ;;  %v941_v23 = vand.u32 2147483647, %v916_v9 }
 0xec3   :  { %v944_v63 = vor.u32 1.1754944e-38, %v943_v18  ;;  %vm942_vm6 = vcmp.eq.f32.partialorder %v941_v23, 8.507059e+37 }
 0xec6   :  { %989 = vrot.lane.b32.xlu2 %v979_v47, %s2686_s2  ;;  %v1126_v47 = vpop.f32.mrf.mxu2  ;;  %v1155_v25 = vpop.f32.mrf.mxu3 }
 0xec7   :  { %v2587_v62 = vpop.eup %2586 }
 0xec8   :  { %v933_v53 = vmul.f32 %v2587_v62, %v916_v9  ;;  %vm938_vm3 = vweird.f32 %v2587_v62 }
 0xec9   :  { %vm939_vm5 = vmor %vm937_vm4, %vm938_vm3 }
 0xeca   :  { %v934_v30 = vsub.f32 1.0, %v933_v53 }
 0xecc   :  { %v935_v36 = vmul.f32 %v2587_v62, %v934_v30 }
 0xece   :  { %v936_v61 = vadd.f32 %v2587_v62, %v935_v36  ;;  %v1129_v54 = vpop.f32.mrf.mxu2  ;;  %v1158_v12 = vpop.f32.mrf.mxu3 }
 0xed0   :  { %v940_v5 = vsel %vm939_vm5, %v2587_v62, %v936_v61 }
 0xed1   :  { %v945_v13 = vsel %vm942_vm6, %v944_v63, %v940_v5 }
 0xed6   :  { %v1131_v55 = vpop.f32.mrf.mxu2  ;;  %v1160_v36 = vpop.f32.mrf.mxu3 }
 0xf18   :  { %v962_v21 = vpop.permute.xlu2 %961 }
 0xf19   :  { %v964_v27 = vmul.f32 %v962_v21, %v945_v13 }
 0xf1b   :  { %v976_v31 = vpack.c.bf16 %v964_v27, %v3195_v17  ;;  %v977_v37 = vpack.c.bf16 %v3195_v17, %v964_v27  ;;  %v3271_v17 = vor.u32 %v2470_v45, %v2381_v3 }
 0xf1d   :  { %985 = vrot.lane.b32.xlu0 %v977_v37, %s2686_s2  ;;  %2348 = vmatmul.msk.bf16.gmra.mxu2 %vm126_vm0, %v976_v31  ;;  %v1163_v37 = vpop.f32.mrf.mxu3 }
 0xf1e   :  { %2352 = vmatmul.msk.bf16.gmra.mxu3 %vm126_vm0, %v976_v31  ;;  %1262 = vmatpush.bf16.msrb.mxu1 %v3271_v17  ;;  %v1134_v31 = vpop.f32.mrf.mxu2 }
 0xf1f   :  { %1352 = vmatpush.bf16.msra.mxu3 %v3271_v17 }
 0xf20   :  { %v990_v11 = vpop.permute.xlu2 %989 }
 0xf22   :  { %1263 = vmatpush.bf16.msrb.mxu1 %v3281_v4 }
 0xf23   :  { %1353 = vmatpush.bf16.msra.mxu3 %v3281_v4 }
 0xf25   :  { %991 = vrot.lane.b32.xlu0 %v980_v32, %s2686_s2  ;;  %v1165_v16 = vpop.f32.mrf.mxu3 }
 0xf26   :  { %1264 = vmatpush.bf16.msrb.mxu1 %v3293_v7 }
 0xf27   :  { %1354 = vmatpush.bf16.msra.mxu3 %v3293_v7 }
 0xf2a   :  { %1265 = vmatpush.bf16.msrb.mxu1 %v3316_v50 }
 0xf2b   :  { %1355 = vmatpush.bf16.msra.mxu3 %v3316_v50 }
 0xf2f   :  { %1532 = vmatpush.bf16.msrb.mxu3 %v3271_v17 }
 0xf33   :  { %1533 = vmatpush.bf16.msrb.mxu3 %v3281_v4 }
 0xf37   :  { %1534 = vmatpush.bf16.msrb.mxu3 %v3293_v7 }
 0xf3b   :  { %1535 = vmatpush.bf16.msrb.mxu3 %v3316_v50 }
 0xf8f   :  { %v986_v26 = vpop.permute.xlu0 %985 }
 0xf90   :  { %2321 = vmatmul.msk.bf16.vlgmr.msra.gmra.mxu0 %vm126_vm0, %v986_v26  ;;  %2325 = vmatmul.msk.bf16.vlgmr.msra.gmra.mxu1 %vm126_vm0, %v986_v26 }
 0xf91   :  { %1442 = vmatpush.bf16.msra.mxu1 %v3271_v17  ;;  %1429 = vmatpush.bf16.msra.mxu0 %v3311_v44 }
 0xf95   :  { %1443 = vmatpush.bf16.msra.mxu1 %v3281_v4  ;;  %1430 = vmatpush.bf16.msra.mxu0 %v3322_v29 }
 0xf97   :  { %v992_v58 = vpop.permute.xlu0 %991 }
 0xf99   :  { %1444 = vmatpush.bf16.msra.mxu1 %v3293_v7  ;;  %1431 = vmatpush.bf16.msra.mxu0 %v3336_v19 }
 0xf9d   :  { %1445 = vmatpush.bf16.msra.mxu1 %v3316_v50  ;;  %1432 = vmatpush.bf16.msra.mxu0 %v3348_v8 }
 0xfa0   :  { %2322 = vmatmul.msk.bf16.gmra.mxu0 %vm126_vm0, %v988_v49  ;;  %2326 = vmatmul.msk.bf16.gmra.mxu1 %vm126_vm0, %v988_v49  ;;  %v1136_v49 = vpop.f32.mrf.mxu2 }
 0xfb0   :  { %2323 = vmatmul.msk.bf16.gmra.mxu0 %vm126_vm0, %v990_v11  ;;  %2327 = vmatmul.msk.bf16.gmra.mxu1 %vm126_vm0, %v990_v11 }
 0xfc0   :  { %2324 = vmatmul.msk.bf16.gmra.mxu0 %vm126_vm0, %v992_v58  ;;  %2328 = vmatmul.msk.bf16.gmra.mxu1 %vm126_vm0, %v992_v58  ;;  %v1139_v58 = vpop.f32.mrf.mxu2 }
 0xfd0   :  { %1253 = vmatmul.bf16.vlgmr.msrb.gmra.mxu0 %v2684_v39  ;;  %1266 = vmatmul.bf16.vlgmr.msrb.gmra.mxu1 %v2684_v39  ;;  %v1173_v39 = vld [vmem:[%s3759_s6] sm:$0x3] }
 0xfd1   :  { %1622 = vmatpush.bf16.msrb.mxu1 %v3271_v17  ;;  %1609 = vmatpush.bf16.msrb.mxu0 %v3311_v44  ;;  %v3384_v52 = vperm.slane %v1173_v39, 0  ;;  %v3391_v48 = vperm.slane %v1173_v39, 1 }
 0xfd5   :  { %1623 = vmatpush.bf16.msrb.mxu1 %v3281_v4  ;;  %1610 = vmatpush.bf16.msrb.mxu0 %v3322_v29 }
 0xfd9   :  { %1624 = vmatpush.bf16.msrb.mxu1 %v3293_v7  ;;  %1611 = vmatpush.bf16.msrb.mxu0 %v3336_v19 }
 0xfdd   :  { %1625 = vmatpush.bf16.msrb.mxu1 %v3316_v50  ;;  %1612 = vmatpush.bf16.msrb.mxu0 %v3348_v8 }
0x100d   :  { %v1034_v9 = vpop.f32.mrf.mxu0  ;;  %v3386_v62 = vpop.f32.mrf.mxu1 }
0x100e   :  { %v1125_v53 = vadd.f32 %v1124_v59, %v1034_v9  ;;  %v1168_v59 = vpop.f32.mrf.mxu3 }
0x1010   :  { %v3389_v46 = vadd.f32 %v3384_v52, %v1125_v53 }
0x1015   :  { %v1036_v14 = vpop.f32.mrf.mxu0  ;;  %v1065_v10 = vpop.f32.mrf.mxu1 }
0x1016   :  { %v1127_v33 = vadd.f32 %v1126_v47, %v1036_v14  ;;  %v1156_v56 = vadd.f32 %v1155_v25, %v1065_v10 }
0x1018   :  { %v3394_v60 = vadd.f32 %v3384_v52, %v1127_v33  ;;  %v3397_v22 = vadd.f32 %v3391_v48, %v1156_v56 }
0x101d   :  { %v1039_v1 = vpop.f32.mrf.mxu0  ;;  %v1068_v30 = vpop.f32.mrf.mxu1 }
0x101e   :  { %v1130_v61 = vadd.f32 %v1129_v54, %v1039_v1  ;;  %v1159_v18 = vadd.f32 %v1158_v12, %v1068_v30 }
0x1020   :  { %v3400_v23 = vadd.f32 %v3384_v52, %v1130_v61  ;;  %v3403_v5 = vadd.f32 %v3391_v48, %v1159_v18  ;;  %v1170_v61 = vpop.f32.mrf.mxu3  ;;  %v1154_v18 = vadd.f32 %v3379_v0, %v3386_v62 }
0x1025   :  { %v1041_v63 = vpop.f32.mrf.mxu0  ;;  %v1070_v13 = vpop.f32.mrf.mxu1 }
0x1026   :  { %v1132_v21 = vadd.f32 %v1131_v55, %v1041_v63  ;;  %v1161_v27 = vadd.f32 %v1160_v36, %v1070_v13  ;;  %v1141_v36 = vpop.f32.mrf.mxu2 }
0x1028   :  { %v3406_v32 = vadd.f32 %v3384_v52, %v1132_v21  ;;  %v3409_v45 = vadd.f32 %v3391_v48, %v1161_v27 }
0x102d   :  { %v1044_v3 = vpop.f32.mrf.mxu0  ;;  %v1073_v51 = vpop.f32.mrf.mxu1 }
0x102e   :  { %v1135_v40 = vadd.f32 %v1134_v31, %v1044_v3  ;;  %v1164_v26 = vadd.f32 %v1163_v37, %v1073_v51  ;;  %v3480_v31 = vadd.f32 %v3391_v48, %v1154_v18 }
0x1030   :  { %v3412_v28 = vadd.f32 %v3384_v52, %v1135_v40  ;;  %v3415_v34 = vadd.f32 %v3391_v48, %v1164_v26 }
0x1032   :  { %v1509_v20 = vsel %vm2923_vm2, %v3406_v32, %v3412_v28  ;;  %v1510_v24 = vsel %vm2907_vm1, %v3409_v45, %v3415_v34  ;;  %v1599_v41 = vsel %vm2923_vm2, %v3412_v28, %v3406_v32  ;;  %v1600_v42 = vsel %vm2907_vm1, %v3415_v34, %v3409_v45 }
0x1035   :  { %v1046_v15 = vpop.f32.mrf.mxu0  ;;  %v1075_v35 = vpop.f32.mrf.mxu1 }
0x1036   :  { %v1137_v38 = vadd.f32 %v1136_v49, %v1046_v15  ;;  %v1166_v43 = vadd.f32 %v1165_v16, %v1075_v35 }
0x1038   :  { %v3434_v6 = vadd.f32 %v3384_v52, %v1137_v38  ;;  %v3437_v11 = vadd.f32 %v3391_v48, %v1166_v43 }
0x103a   :  { %v1419_v39 = vsel %vm2923_vm2, %v3400_v23, %v3434_v6  ;;  %v1420_v47 = vsel %vm2907_vm1, %v3403_v5, %v3437_v11  ;;  %v1689_v25 = vsel %vm2923_vm2, %v3434_v6, %v3400_v23  ;;  %v1690_v9 = vsel %vm2907_vm1, %v3437_v11, %v3403_v5 }
0x103d   :  { %v1049_v53 = vpop.f32.mrf.mxu0  ;;  %v1078_v54 = vpop.f32.mrf.mxu1 }
0x103e   :  { %v1140_v12 = vadd.f32 %v1139_v58, %v1049_v53  ;;  %v1169_v14 = vadd.f32 %v1168_v59, %v1078_v54 }
0x1040   :  { %v3456_v10 = vadd.f32 %v3384_v52, %v1140_v12  ;;  %v3459_v33 = vadd.f32 %v3391_v48, %v1169_v14 }
0x1042   :  { %v1329_v56 = vsel %vm2923_vm2, %v3394_v60, %v3456_v10  ;;  %v1330_v1 = vsel %vm2907_vm1, %v3397_v22, %v3459_v33  ;;  %v1779_v30 = vsel %vm2923_vm2, %v3456_v10, %v3394_v60  ;;  %v1780_v55 = vsel %vm2907_vm1, %v3459_v33, %v3397_v22 }
0x1045   :  { %v1051_v63 = vpop.f32.mrf.mxu0  ;;  %v1080_v13 = vpop.f32.mrf.mxu1 }
0x1046   :  { %v1142_v21 = vadd.f32 %v1141_v36, %v1051_v63  ;;  %v1171_v27 = vadd.f32 %v1170_v61, %v1080_v13 }
0x1048   :  { %v3483_v37 = vadd.f32 %v3384_v52, %v1142_v21  ;;  %v3486_v3 = vadd.f32 %v3391_v48, %v1171_v27 }
0x104a   :  { %v1203_v51 = vsel %vm2923_vm2, %v3389_v46, %v3483_v37  ;;  %v1869_v0 = vsel %vm2923_vm2, %v3483_v37, %v3389_v46  ;;  %v1870_v62 = vsel %vm2907_vm1, %v3486_v3, %v3480_v31  ;;  %v1204_v48 = vsel %vm2907_vm1, %v3480_v31, %v3486_v3 }
0x104d   :  { %v1254_v52 = vpop.f32.mrf.mxu0  ;;  %v1267_v40 = vpop.f32.mrf.mxu1 }
0x104e   :  { %v1271_v26 = vadd.f32 %v1254_v52, %v1203_v51  ;;  %v1272_v49 = vadd.f32 %v1267_v40, %v1204_v48 }
0x1050   :  { %2588 = vtanh.f32 %v1272_v49  ;;  %v2385_v38 = vmul.f32 -1.442695, %v1271_v26  ;;  %v2386_v26 = vmul.f32 -1.442695, %v1272_v49 }
0x1052   :  { %2590 = vpow2.f32 %v2385_v38 }
0x1055   :  { %v1269_v16 = vpop.f32.mrf.mxu1  ;;  %v1256_v15 = vpop.f32.mrf.mxu0 }
0x1056   :  { %v2589_v35 = vpop.eup %2588 }
0x1057   :  { %1314 = vrot.lane.b32.xlu1 %v2589_v35, %s2685_s3 }
0x1058   :  { %v2591_v43 = vpop.eup %2590 }
0x1059   :  { %v1279_v58 = vadd.f32 1.0, %v2591_v43 }
0x105b   :  { %2592 = vrcp.f32 %v1279_v58  ;;  %v1292_v36 = vand.u32 2147483648, %v1279_v58  ;;  %vm1286_vm8 = vweird.f32 %v1279_v58  ;;  %v1290_v61 = vand.u32 2147483647, %v1279_v58 }
0x105d   :  { %v1293_v63 = vor.u32 1.1754944e-38, %v1292_v36  ;;  %vm1291_vm10 = vcmp.eq.f32.partialorder %v1290_v61, 8.507059e+37 }
0x1061   :  { %v2593_v59 = vpop.eup %2592 }
0x1062   :  { %v1282_v53 = vmul.f32 %v2593_v59, %v1279_v58  ;;  %vm1287_vm7 = vweird.f32 %v2593_v59 }
0x1063   :  { %vm1288_vm9 = vmor %vm1286_vm8, %vm1287_vm7 }
0x1064   :  { %v1283_v54 = vsub.f32 1.0, %v1282_v53 }
0x1066   :  { %v1284_v12 = vmul.f32 %v2593_v59, %v1283_v54 }
0x1068   :  { %v1285_v14 = vadd.f32 %v2593_v59, %v1284_v12 }
0x106a   :  { %v1289_v18 = vsel %vm1288_vm9, %v2593_v59, %v1285_v14 }
0x106b   :  { %v1294_v21 = vsel %vm1291_vm10, %v1293_v63, %v1289_v18 }
0x106c   :  { %v1312_v51 = vmul.f32 0.0, %v1294_v21 }
0x10c9   :  { %v1315_v13 = vpop.permute.xlu1 %1314 }
0x10ca   :  { %v1317_v27 = vmul.f32 %v1315_v13, %v1294_v21 }
0x10cc   :  { %1319 = vrot.lane.b32.xlu2 %v1317_v27, %s2685_s3 }
0x1126   :  { %v1320_v52 = vpop.permute.xlu2 %1319 }
0x1127   :  { %v3506_v48 = vadd.f32 %v1320_v52, %v1312_v51 }
0x1129   :  { %2594 = vtanh.f32 %v3506_v48 }
0x112a   :  { %2596 = vpow2.f32 %v2386_v26 }
0x112f   :  { %v2595_v40 = vpop.eup %2594 }
0x1130   :  { %1325 = vrot.lane.b32.xlu0 %v2595_v40, %s2685_s3  ;;  %v2597_v16 = vpop.eup %2596 }
0x1131   :  { %v1280_v15 = vadd.f32 1.0, %v2597_v16 }
0x1133   :  { %2598 = vrcp.f32 %v1280_v15  ;;  %v1307_v53 = vand.u32 2147483648, %v1280_v15  ;;  %vm1301_vm13 = vweird.f32 %v1280_v15  ;;  %v1305_v54 = vand.u32 2147483647, %v1280_v15 }
0x1135   :  { %v1308_v14 = vor.u32 1.1754944e-38, %v1307_v53  ;;  %vm1306_vm15 = vcmp.eq.f32.partialorder %v1305_v54, 8.507059e+37 }
0x1139   :  { %v2599_v35 = vpop.eup %2598 }
0x113a   :  { %v1297_v38 = vmul.f32 %v2599_v35, %v1280_v15  ;;  %vm1302_vm12 = vweird.f32 %v2599_v35 }
0x113b   :  { %vm1303_vm14 = vmor %vm1301_vm13, %vm1302_vm12 }
0x113c   :  { %v1298_v43 = vsub.f32 1.0, %v1297_v38 }
0x113e   :  { %v1299_v58 = vmul.f32 %v2599_v35, %v1298_v43 }
0x1140   :  { %v1300_v59 = vadd.f32 %v2599_v35, %v1299_v58 }
0x1142   :  { %v1304_v12 = vsel %vm1303_vm14, %v2599_v35, %v1300_v59 }
0x1143   :  { %v1309_v36 = vsel %vm1306_vm15, %v1308_v14, %v1304_v12 }
0x11a2   :  { %v1326_v61 = vpop.permute.xlu0 %1325 }
0x11a3   :  { %v3510_v49 = vmul.f32 %v1326_v61, %v1309_v36 }
0x11a5   :  { %v1331_v18 = vpack.c.bf16 %v3510_v49, %v3510_v49 }
0x11a7   :  { %2387 = vmatmul.msk.bf16.vlgmr.msra.gmra.mxu2 %vm247_vm11, %v1331_v18  ;;  %2388 = vmatmul.msk.bf16.vlgmr.msra.gmra.mxu3 %vm247_vm11, %v1331_v18 }
0x11a8   :  { %1712 = vmatpush.bf16.msra.mxu3 %v3271_v17  ;;  %1699 = vmatpush.bf16.msra.mxu2 %v3311_v44 }
0x11ac   :  { %1713 = vmatpush.bf16.msra.mxu3 %v3281_v4  ;;  %1700 = vmatpush.bf16.msra.mxu2 %v3322_v29 }
0x11b0   :  { %1714 = vmatpush.bf16.msra.mxu3 %v3293_v7  ;;  %1701 = vmatpush.bf16.msra.mxu2 %v3336_v19 }
0x11b4   :  { %1715 = vmatpush.bf16.msra.mxu3 %v3316_v50  ;;  %1702 = vmatpush.bf16.msra.mxu2 %v3348_v8 }
0x122a   :  { %v1344_v63 = vpop.f32.mrf.mxu2  ;;  %v1357_v13 = vpop.f32.mrf.mxu3 }
0x122b   :  { %v1361_v21 = vadd.f32 %v1344_v63, %v1329_v56  ;;  %v1362_v27 = vadd.f32 %v1357_v13, %v1330_v1 }
0x122d   :  { %2600 = vtanh.f32 %v1362_v27  ;;  %v2389_v26 = vmul.f32 -1.442695, %v1361_v21  ;;  %v2390_v21 = vmul.f32 -1.442695, %v1362_v27 }
0x122f   :  { %2602 = vpow2.f32 %v2389_v26 }
0x1232   :  { %v1346_v51 = vpop.f32.mrf.mxu2  ;;  %v1359_v52 = vpop.f32.mrf.mxu3 }
0x1233   :  { %v2601_v40 = vpop.eup %2600 }
0x1234   :  { %1404 = vrot.lane.b32.xlu1 %v2601_v40, %s2685_s3 }
0x1235   :  { %v2603_v16 = vpop.eup %2602 }
0x1236   :  { %v1369_v15 = vadd.f32 1.0, %v2603_v16 }
0x1238   :  { %2604 = vrcp.f32 %v1369_v15  ;;  %v1382_v59 = vand.u32 2147483648, %v1369_v15  ;;  %vm1376_vm4 = vweird.f32 %v1369_v15  ;;  %v1380_v1 = vand.u32 2147483647, %v1369_v15 }
0x123a   :  { %v1383_v54 = vor.u32 1.1754944e-38, %v1382_v59  ;;  %vm1381_vm6 = vcmp.eq.f32.partialorder %v1380_v1, 8.507059e+37  ;;  %v1967_v1 = vmax.f32 %v3510_v49, 0.0 }
0x123e   :  { %v2605_v35 = vpop.eup %2604 }
0x123f   :  { %v1372_v38 = vmul.f32 %v2605_v35, %v1369_v15  ;;  %vm1377_vm3 = vweird.f32 %v2605_v35 }
0x1240   :  { %vm1378_vm5 = vmor %vm1376_vm4, %vm1377_vm3 }
0x1241   :  { %v1373_v56 = vsub.f32 1.0, %v1372_v38 }
0x1243   :  { %v1374_v43 = vmul.f32 %v2605_v35, %v1373_v56 }
0x1245   :  { %v1375_v58 = vadd.f32 %v2605_v35, %v1374_v43 }
0x1247   :  { %v1379_v53 = vsel %vm1378_vm5, %v2605_v35, %v1375_v58 }
0x1248   :  { %v1384_v14 = vsel %vm1381_vm6, %v1383_v54, %v1379_v53 }
0x1249   :  { %v1402_v61 = vmul.f32 %v1384_v14, %v3506_v48 }
0x12a6   :  { %v1405_v12 = vpop.permute.xlu1 %1404 }
0x12a7   :  { %v1407_v36 = vmul.f32 %v1405_v12, %v1384_v14 }
0x12a9   :  { %1409 = vrot.lane.b32.xlu2 %v1407_v36, %s2685_s3 }
0x1303   :  { %v1410_v18 = vpop.permute.xlu2 %1409 }
0x1304   :  { %v3537_v63 = vadd.f32 %v1410_v18, %v1402_v61 }
0x1306   :  { %2606 = vtanh.f32 %v3537_v63 }
0x1307   :  { %2608 = vpow2.f32 %v2390_v21 }
0x130c   :  { %v2607_v13 = vpop.eup %2606 }
0x130d   :  { %1415 = vrot.lane.b32.xlu0 %v2607_v13, %s2685_s3  ;;  %v2609_v51 = vpop.eup %2608 }
0x130e   :  { %v1370_v52 = vadd.f32 1.0, %v2609_v51 }
0x1310   :  { %2610 = vrcp.f32 %v1370_v52  ;;  %v1397_v48 = vand.u32 2147483648, %v1370_v52  ;;  %vm1391_vm8 = vweird.f32 %v1370_v52  ;;  %v1395_v38 = vand.u32 2147483647, %v1370_v52 }
0x1312   :  { %v1398_v43 = vor.u32 1.1754944e-38, %v1397_v48  ;;  %vm1396_vm10 = vcmp.eq.f32.partialorder %v1395_v38, 8.507059e+37 }
0x1316   :  { %v2611_v40 = vpop.eup %2610 }
0x1317   :  { %v1387_v26 = vmul.f32 %v2611_v40, %v1370_v52  ;;  %vm1392_vm7 = vweird.f32 %v2611_v40 }
0x1318   :  { %vm1393_vm9 = vmor %vm1391_vm8, %vm1392_vm7 }
0x1319   :  { %v1388_v16 = vsub.f32 1.0, %v1387_v26 }
0x131b   :  { %v1389_v15 = vmul.f32 %v2611_v40, %v1388_v16 }
0x131d   :  { %v1390_v35 = vadd.f32 %v2611_v40, %v1389_v15 }
0x131f   :  { %v1394_v56 = vsel %vm1393_vm9, %v2611_v40, %v1390_v35 }
0x1320   :  { %v1399_v58 = vsel %vm1396_vm10, %v1398_v43, %v1394_v56 }
0x137f   :  { %v1416_v59 = vpop.permute.xlu0 %1415 }
0x1380   :  { %v1418_v27 = vmul.f32 %v1416_v59, %v1399_v58 }
0x1382   :  { %v1421_v53 = vpack.c.bf16 %v1418_v27, %v1418_v27  ;;  %v1968_v54 = vmax.f32 %v1418_v27, 0.0 }
0x1384   :  { %v3542_v12 = vpack.c.bf16 %v1968_v54, %v1967_v1  ;;  %2391 = vmatmul.msk.bf16.vlgmr.msra.gmra.mxu0 %vm247_vm11, %v1421_v53  ;;  %2392 = vmatmul.msk.bf16.vlgmr.msra.gmra.mxu1 %vm247_vm11, %v1421_v53  ;;  %v3546_v14 = vpack.c.bf16 %v1967_v1, %v1968_v54 }
0x1385   :  { %1802 = vmatpush.bf16.msra.mxu1 %v3271_v17  ;;  %1789 = vmatpush.bf16.msra.mxu0 %v3311_v44 }
0x1389   :  { %1803 = vmatpush.bf16.msra.mxu1 %v3281_v4  ;;  %1790 = vmatpush.bf16.msra.mxu0 %v3322_v29 }
0x138d   :  { %1804 = vmatpush.bf16.msra.mxu1 %v3293_v7  ;;  %1791 = vmatpush.bf16.msra.mxu0 %v3336_v19 }
0x1391   :  { %1805 = vmatpush.bf16.msra.mxu1 %v3316_v50  ;;  %1792 = vmatpush.bf16.msra.mxu0 %v3348_v8 }
0x1401   :  { %v1434_v49 = vpop.f32.mrf.mxu0  ;;  %v1447_v36 = vpop.f32.mrf.mxu1 }
0x1402   :  { %v1451_v61 = vadd.f32 %v1434_v49, %v1419_v39  ;;  %v1452_v18 = vadd.f32 %v1447_v36, %v1420_v47 }
0x1404   :  { %2612 = vtanh.f32 %v1452_v18  ;;  %v2393_v52 = vmul.f32 -1.442695, %v1451_v61  ;;  %v2394_v36 = vmul.f32 -1.442695, %v1452_v18 }
0x1406   :  { %2614 = vpow2.f32 %v2393_v52 }
0x1409   :  { %v1436_v13 = vpop.f32.mrf.mxu0  ;;  %v1449_v21 = vpop.f32.mrf.mxu1 }
0x140a   :  { %v2613_v51 = vpop.eup %2612 }
0x140b   :  { %1494 = vrot.lane.b32.xlu1 %v2613_v51, %s2685_s3 }
0x140c   :  { %v2615_v40 = vpop.eup %2614 }
0x140d   :  { %v1459_v26 = vadd.f32 1.0, %v2615_v40 }
0x140f   :  { %2616 = vrcp.f32 %v1459_v26  ;;  %v1472_v38 = vand.u32 2147483648, %v1459_v26  ;;  %vm1466_vm13 = vweird.f32 %v1459_v26  ;;  %v1470_v47 = vand.u32 2147483647, %v1459_v26 }
0x1411   :  { %v1473_v43 = vor.u32 1.1754944e-38, %v1472_v38  ;;  %vm1471_vm15 = vcmp.eq.f32.partialorder %v1470_v47, 8.507059e+37 }
0x1415   :  { %v2617_v16 = vpop.eup %2616 }
0x1416   :  { %v1462_v15 = vmul.f32 %v2617_v16, %v1459_v26  ;;  %vm1467_vm12 = vweird.f32 %v2617_v16 }
0x1417   :  { %vm1468_vm14 = vmor %vm1466_vm13, %vm1467_vm12 }
0x1418   :  { %v1463_v39 = vsub.f32 1.0, %v1462_v15 }
0x141a   :  { %v1464_v35 = vmul.f32 %v2617_v16, %v1463_v39 }
0x141c   :  { %v1465_v48 = vadd.f32 %v2617_v16, %v1464_v35 }
0x141e   :  { %v1469_v56 = vsel %vm1468_vm14, %v2617_v16, %v1465_v48 }
0x141f   :  { %v1474_v59 = vsel %vm1471_vm15, %v1473_v43, %v1469_v56 }
0x1420   :  { %v1492_v1 = vmul.f32 %v1474_v59, %v3537_v63 }
0x147d   :  { %v1495_v58 = vpop.permute.xlu1 %1494 }
0x147e   :  { %v1497_v27 = vmul.f32 %v1495_v58, %v1474_v59 }
0x1480   :  { %1499 = vrot.lane.b32.xlu2 %v1497_v27, %s2685_s3 }
0x14da   :  { %v1500_v53 = vpop.permute.xlu2 %1499 }
0x14db   :  { %v3569_v54 = vadd.f32 %v1500_v53, %v1492_v1 }
0x14dd   :  { %2618 = vtanh.f32 %v3569_v54 }
0x14de   :  { %2620 = vpow2.f32 %v2394_v36 }
0x14e3   :  { %v2619_v49 = vpop.eup %2618 }
0x14e4   :  { %1505 = vrot.lane.b32.xlu0 %v2619_v49, %s2685_s3  ;;  %v2621_v61 = vpop.eup %2620 }
0x14e5   :  { %v1460_v13 = vadd.f32 1.0, %v2621_v61 }
0x14e7   :  { %2622 = vrcp.f32 %v1460_v13  ;;  %v1487_v63 = vand.u32 2147483648, %v1460_v13  ;;  %vm1481_vm4 = vweird.f32 %v1460_v13  ;;  %v1485_v16 = vand.u32 2147483647, %v1460_v13 }
0x14e9   :  { %v1488_v39 = vor.u32 1.1754944e-38, %v1487_v63  ;;  %vm1486_vm6 = vcmp.eq.f32.partialorder %v1485_v16, 8.507059e+37 }
0x14ed   :  { %v2623_v21 = vpop.eup %2622 }
0x14ee   :  { %v1477_v51 = vmul.f32 %v2623_v21, %v1460_v13  ;;  %vm1482_vm3 = vweird.f32 %v2623_v21 }
0x14ef   :  { %vm1483_vm5 = vmor %vm1481_vm4, %vm1482_vm3 }
0x14f0   :  { %v1478_v52 = vsub.f32 1.0, %v1477_v51 }
0x14f2   :  { %v1479_v40 = vmul.f32 %v2623_v21, %v1478_v52 }
0x14f4   :  { %v1480_v26 = vadd.f32 %v2623_v21, %v1479_v40 }
0x14f6   :  { %v1484_v15 = vsel %vm1483_vm5, %v2623_v21, %v1480_v26 }
0x14f7   :  { %v1489_v35 = vsel %vm1486_vm6, %v1488_v39, %v1484_v15 }
0x1556   :  { %v1506_v48 = vpop.permute.xlu0 %1505 }
0x1557   :  { %v3573_v18 = vmul.f32 %v1506_v48, %v1489_v35 }
0x1559   :  { %v1511_v38 = vpack.c.bf16 %v3573_v18, %v3573_v18 }
0x155b   :  { %2395 = vmatmul.msk.bf16.vlgmr.msrb.gmra.mxu2 %vm247_vm11, %v1511_v38  ;;  %2396 = vmatmul.msk.bf16.vlgmr.msrb.gmra.mxu3 %vm247_vm11, %v1511_v38 }
0x155c   :  { %1892 = vmatpush.bf16.msrb.mxu3 %v3271_v17  ;;  %1879 = vmatpush.bf16.msrb.mxu2 %v3311_v44 }
0x1560   :  { %1893 = vmatpush.bf16.msrb.mxu3 %v3281_v4  ;;  %1880 = vmatpush.bf16.msrb.mxu2 %v3322_v29 }
0x1564   :  { %1894 = vmatpush.bf16.msrb.mxu3 %v3293_v7  ;;  %1881 = vmatpush.bf16.msrb.mxu2 %v3336_v19 }
0x1568   :  { %1895 = vmatpush.bf16.msrb.mxu3 %v3316_v50  ;;  %1882 = vmatpush.bf16.msrb.mxu2 %v3348_v8 }
0x15de   :  { %v1524_v47 = vpop.f32.mrf.mxu2  ;;  %v1537_v56 = vpop.f32.mrf.mxu3 }
0x15df   :  { %v1541_v17 = vadd.f32 %v1524_v47, %v1509_v20  ;;  %v1542_v4 = vadd.f32 %v1537_v56, %v1510_v24 }
0x15e1   :  { %2624 = vtanh.f32 %v1542_v4  ;;  %v2397_v29 = vmul.f32 -1.442695, %v1541_v17  ;;  %v2398_v26 = vmul.f32 -1.442695, %v1542_v4 }
0x15e3   :  { %2626 = vpow2.f32 %v2397_v29 }
0x15e6   :  { %v1526_v7 = vpop.f32.mrf.mxu2  ;;  %v1539_v44 = vpop.f32.mrf.mxu3 }
0x15e7   :  { %v2625_v50 = vpop.eup %2624 }
0x15e8   :  { %1584 = vrot.lane.b32.xlu1 %v2625_v50, %s2685_s3  ;;  %v1969_v50 = vmax.f32 %v3573_v18, 0.0 }
0x15e9   :  { %v2627_v19 = vpop.eup %2626 }
0x15ea   :  { %v1549_v8 = vadd.f32 1.0, %v2627_v19 }
0x15ec   :  { %2628 = vrcp.f32 %v1549_v8  ;;  %v1562_v1 = vand.u32 2147483648, %v1549_v8  ;;  %vm1556_vm8 = vweird.f32 %v1549_v8  ;;  %v1560_v24 = vand.u32 2147483647, %v1549_v8 }
0x15ee   :  { %v1563_v49 = vor.u32 1.1754944e-38, %v1562_v1  ;;  %vm1561_vm10 = vcmp.eq.f32.partialorder %v1560_v24, 8.507059e+37 }
0x15f2   :  { %v2629_v43 = vpop.eup %2628 }
0x15f3   :  { %v1552_v58 = vmul.f32 %v2629_v43, %v1549_v8  ;;  %vm1557_vm7 = vweird.f32 %v2629_v43 }
0x15f4   :  { %vm1558_vm9 = vmor %vm1556_vm8, %vm1557_vm7 }
0x15f5   :  { %v1553_v20 = vsub.f32 1.0, %v1552_v58 }
0x15f7   :  { %v1554_v59 = vmul.f32 %v2629_v43, %v1553_v20 }
0x15f9   :  { %v1555_v27 = vadd.f32 %v2629_v43, %v1554_v59 }
0x15fb   :  { %v1559_v53 = vsel %vm1558_vm9, %v2629_v43, %v1555_v27 }
0x15fc   :  { %v1564_v61 = vsel %vm1561_vm10, %v1563_v49, %v1559_v53 }
0x15fd   :  { %v1582_v21 = vmul.f32 %v1564_v61, %v3569_v54 }
0x165a   :  { %v1585_v36 = vpop.permute.xlu1 %1584 }
0x165b   :  { %v1587_v13 = vmul.f32 %v1585_v36, %v1564_v61 }
0x165d   :  { %1589 = vrot.lane.b32.xlu2 %v1587_v13, %s2685_s3 }
0x16b7   :  { %v1590_v51 = vpop.permute.xlu2 %1589 }
0x16b8   :  { %v3600_v52 = vadd.f32 %v1590_v51, %v1582_v21 }
0x16ba   :  { %2630 = vtanh.f32 %v3600_v52 }
0x16bb   :  { %2632 = vpow2.f32 %v2398_v26 }
0x16c0   :  { %v2631_v40 = vpop.eup %2630 }
0x16c1   :  { %1595 = vrot.lane.b32.xlu0 %v2631_v40, %s2685_s3  ;;  %v2633_v63 = vpop.eup %2632 }
0x16c2   :  { %v1550_v16 = vadd.f32 1.0, %v2633_v63 }
0x16c4   :  { %2634 = vrcp.f32 %v1550_v16  ;;  %v1577_v54 = vand.u32 2147483648, %v1550_v16  ;;  %vm1571_vm13 = vweird.f32 %v1550_v16  ;;  %v1575_v47 = vand.u32 2147483647, %v1550_v16 }
0x16c6   :  { %v1578_v17 = vor.u32 1.1754944e-38, %v1577_v54  ;;  %vm1576_vm15 = vcmp.eq.f32.partialorder %v1575_v47, 8.507059e+37 }
0x16ca   :  { %v2635_v15 = vpop.eup %2634 }
0x16cb   :  { %v1567_v39 = vmul.f32 %v2635_v15, %v1550_v16  ;;  %vm1572_vm12 = vweird.f32 %v2635_v15 }
0x16cc   :  { %vm1573_vm14 = vmor %vm1571_vm13, %vm1572_vm12 }
0x16cd   :  { %v1568_v35 = vsub.f32 1.0, %v1567_v39 }
0x16cf   :  { %v1569_v48 = vmul.f32 %v2635_v15, %v1568_v35 }
0x16d1   :  { %v1570_v38 = vadd.f32 %v2635_v15, %v1569_v48 }
0x16d3   :  { %v1574_v56 = vsel %vm1573_vm14, %v2635_v15, %v1570_v38 }
0x16d4   :  { %v1579_v7 = vsel %vm1576_vm15, %v1578_v17, %v1574_v56 }
0x1733   :  { %v1596_v44 = vpop.permute.xlu0 %1595 }
0x1734   :  { %v1598_v4 = vmul.f32 %v1596_v44, %v1579_v7 }
0x1736   :  { %v1601_v29 = vpack.c.bf16 %v1598_v4, %v1598_v4  ;;  %v1970_v19 = vmax.f32 %v1598_v4, 0.0 }
0x1738   :  { %v3605_v8 = vpack.c.bf16 %v1970_v19, %v1969_v50  ;;  %2399 = vmatmul.msk.bf16.vlgmr.msrb.gmra.mxu0 %vm247_vm11, %v1601_v29  ;;  %2400 = vmatmul.msk.bf16.vlgmr.msrb.gmra.mxu1 %vm247_vm11, %v1601_v29  ;;  %v3609_v43 = vpack.c.bf16 %v1969_v50, %v1970_v19 }
0x17b5   :  { %v1614_v58 = vpop.f32.mrf.mxu0  ;;  %v1627_v20 = vpop.f32.mrf.mxu1 }
0x17b6   :  { %v1631_v59 = vadd.f32 %v1614_v58, %v1599_v41  ;;  %v1632_v18 = vadd.f32 %v1627_v20, %v1600_v42 }
0x17b8   :  { %2636 = vtanh.f32 %v1632_v18  ;;  %v2401_v53 = vmul.f32 -1.442695, %v1631_v59  ;;  %v2402_v35 = vmul.f32 -1.442695, %v1632_v18 }
0x17ba   :  { %2638 = vpow2.f32 %v2401_v53 }
0x17bd   :  { %v1616_v27 = vpop.f32.mrf.mxu0  ;;  %v1629_v1 = vpop.f32.mrf.mxu1 }
0x17be   :  { %v2637_v24 = vpop.eup %2636 }
0x17bf   :  { %1674 = vrot.lane.b32.xlu1 %v2637_v24, %s2685_s3 }
0x17c0   :  { %v2639_v49 = vpop.eup %2638 }
0x17c1   :  { %v1639_v36 = vadd.f32 1.0, %v2639_v49 }
0x17c3   :  { %2640 = vrcp.f32 %v1639_v36  ;;  %v1652_v21 = vand.u32 2147483648, %v1639_v36  ;;  %vm1646_vm4 = vweird.f32 %v1639_v36  ;;  %v1650_v45 = vand.u32 2147483647, %v1639_v36 }
0x17c5   :  { %v1653_v42 = vor.u32 1.1754944e-38, %v1652_v21  ;;  %vm1651_vm6 = vcmp.eq.f32.partialorder %v1650_v45, 8.507059e+37 }
0x17c9   :  { %v2641_v61 = vpop.eup %2640 }
0x17ca   :  { %v1642_v32 = vmul.f32 %v2641_v61, %v1639_v36  ;;  %vm1647_vm3 = vweird.f32 %v2641_v61 }
0x17cb   :  { %vm1648_vm5 = vmor %vm1646_vm4, %vm1647_vm3 }
0x17cc   :  { %v1643_v28 = vsub.f32 1.0, %v1642_v32 }
0x17ce   :  { %v1644_v41 = vmul.f32 %v2641_v61, %v1643_v28 }
0x17d0   :  { %v1645_v13 = vadd.f32 %v2641_v61, %v1644_v41 }
0x17d2   :  { %v1649_v34 = vsel %vm1648_vm5, %v2641_v61, %v1645_v13 }
0x17d3   :  { %v1654_v40 = vsel %vm1651_vm6, %v1653_v42, %v1649_v34 }
0x17d4   :  { %v1672_v63 = vmul.f32 %v1654_v40, %v3600_v52 }
0x1831   :  { %v1675_v51 = vpop.permute.xlu1 %1674 }
0x1832   :  { %v1677_v26 = vmul.f32 %v1675_v51, %v1654_v40 }
0x1834   :  { %1679 = vrot.lane.b32.xlu2 %v1677_v26, %s2685_s3 }
0x188e   :  { %v1680_v16 = vpop.permute.xlu2 %1679 }
0x188f   :  { %v1682_v15 = vadd.f32 %v1680_v16, %v1672_v63 }
0x1891   :  { %2642 = vtanh.f32 %v1682_v15 }
0x1892   :  { %2644 = vpow2.f32 %v2402_v35  ;;  %v2473_v35 = vld [vmem:[%s3760_s7 + $0x8] sm:$0xff] }
0x1893   :  { %2078 = vmatpush.bf16.msrb.mxu1 %v2473_v35 }
0x1897   :  { %v2643_v39 = vpop.eup %2642 }
0x1898   :  { %1685 = vrot.lane.b32.xlu0 %v2643_v39, %s2685_s3  ;;  %v2645_v48 = vpop.eup %2644 }
0x1899   :  { %v1640_v38 = vadd.f32 1.0, %v2645_v48 }
0x189b   :  { %2646 = vrcp.f32 %v1640_v38  ;;  %v1667_v44 = vand.u32 2147483648, %v1640_v38  ;;  %vm1661_vm8 = vweird.f32 %v1640_v38  ;;  %v1665_v52 = vand.u32 2147483647, %v1640_v38 }
0x189d   :  { %v1668_v50 = vor.u32 1.1754944e-38, %v1667_v44  ;;  %vm1666_vm10 = vcmp.eq.f32.partialorder %v1665_v52, 8.507059e+37 }
0x18a1   :  { %v2647_v54 = vpop.eup %2646 }
0x18a2   :  { %v1657_v47 = vmul.f32 %v2647_v54, %v1640_v38  ;;  %vm1662_vm7 = vweird.f32 %v2647_v54 }
0x18a3   :  { %vm1663_vm9 = vmor %vm1661_vm8, %vm1662_vm7 }
0x18a4   :  { %v1658_v56 = vsub.f32 1.0, %v1657_v47 }
0x18a6   :  { %v1659_v17 = vmul.f32 %v2647_v54, %v1658_v56 }
0x18a8   :  { %v1660_v7 = vadd.f32 %v2647_v54, %v1659_v17 }
0x18aa   :  { %v1664_v4 = vsel %vm1663_vm9, %v2647_v54, %v1660_v7 }
0x18ab   :  { %v1669_v29 = vsel %vm1666_vm10, %v1668_v50, %v1664_v4 }
0x190a   :  { %v1686_v19 = vpop.permute.xlu0 %1685 }
0x190b   :  { %v3625_v58 = vmul.f32 %v1686_v19, %v1669_v29 }
0x190d   :  { %v1691_v20 = vpack.c.bf16 %v3625_v58, %v3625_v58  ;;  %v1971_v19 = vmax.f32 %v3625_v58, 0.0 }
0x190f   :  { %2403 = vmatmul.msk.bf16.vlgmr.msra.gmra.mxu2 %vm247_vm11, %v1691_v20  ;;  %2404 = vmatmul.msk.bf16.vlgmr.msra.gmra.mxu3 %vm247_vm11, %v1691_v20 }
0x1992   :  { %v1704_v59 = vpop.f32.mrf.mxu2  ;;  %v1717_v18 = vpop.f32.mrf.mxu3 }
0x1993   :  { %v1721_v27 = vadd.f32 %v1704_v59, %v1689_v25  ;;  %v1722_v1 = vadd.f32 %v1717_v18, %v1690_v9 }
0x1995   :  { %2648 = vtanh.f32 %v1722_v1  ;;  %v2405_v36 = vmul.f32 -1.442695, %v1721_v27  ;;  %v2406_v63 = vmul.f32 -1.442695, %v1722_v1 }
0x1997   :  { %2650 = vpow2.f32 %v2405_v36 }
0x199a   :  { %v1706_v24 = vpop.f32.mrf.mxu2  ;;  %v1719_v53 = vpop.f32.mrf.mxu3 }
0x199b   :  { %v2649_v49 = vpop.eup %2648 }
0x199c   :  { %1764 = vrot.lane.b32.xlu1 %v2649_v49, %s2685_s3 }
0x199d   :  { %v2651_v61 = vpop.eup %2650 }
0x199e   :  { %v1729_v32 = vadd.f32 1.0, %v2651_v61 }
0x19a0   :  { %2652 = vrcp.f32 %v1729_v32  ;;  %v1742_v13 = vand.u32 2147483648, %v1729_v32  ;;  %vm1736_vm13 = vweird.f32 %v1729_v32  ;;  %v1740_v5 = vand.u32 2147483647, %v1729_v32 }
0x19a2   :  { %v1743_v9 = vor.u32 1.1754944e-38, %v1742_v13  ;;  %vm1741_vm15 = vcmp.eq.f32.partialorder %v1740_v5, 8.507059e+37 }
0x19a6   :  { %v2653_v28 = vpop.eup %2652 }
0x19a7   :  { %v1732_v23 = vmul.f32 %v2653_v28, %v1729_v32  ;;  %vm1737_vm12 = vweird.f32 %v2653_v28 }
0x19a8   :  { %vm1738_vm14 = vmor %vm1736_vm13, %vm1737_vm12 }
0x19a9   :  { %v1733_v6 = vsub.f32 1.0, %v1732_v23 }
0x19ab   :  { %v1734_v25 = vmul.f32 %v2653_v28, %v1733_v6 }
0x19ad   :  { %v1735_v41 = vadd.f32 %v2653_v28, %v1734_v25 }
0x19af   :  { %v1739_v11 = vsel %vm1738_vm14, %v2653_v28, %v1735_v41 }
0x19b0   :  { %v1744_v45 = vsel %vm1741_vm15, %v1743_v9, %v1739_v11 }
0x19b1   :  { %v1762_v42 = vmul.f32 %v1744_v45, %v1682_v15  ;;  %v2472_v15 = vld [vmem:[%s3760_s7] sm:$0xff] }
0x19b2   :  { %2079 = vmatpush.bf16.msrb.mxu1 %v2472_v15 }
0x1a0e   :  { %v1765_v21 = vpop.permute.xlu1 %1764 }
0x1a0f   :  { %v1767_v34 = vmul.f32 %v1765_v21, %v1744_v45 }
0x1a11   :  { %1769 = vrot.lane.b32.xlu2 %v1767_v34, %s2685_s3 }
0x1a6b   :  { %v1770_v51 = vpop.permute.xlu2 %1769 }
0x1a6c   :  { %v3643_v40 = vadd.f32 %v1770_v51, %v1762_v42 }
0x1a6e   :  { %2654 = vtanh.f32 %v3643_v40 }
0x1a6f   :  { %2656 = vpow2.f32 %v2406_v63 }
0x1a74   :  { %v2655_v26 = vpop.eup %2654 }
0x1a75   :  { %1775 = vrot.lane.b32.xlu0 %v2655_v26, %s2685_s3  ;;  %v2657_v16 = vpop.eup %2656 }
0x1a76   :  { %v1730_v39 = vadd.f32 1.0, %v2657_v16 }
0x1a78   :  { %2658 = vrcp.f32 %v1730_v39  ;;  %v1757_v17 = vand.u32 2147483648, %v1730_v39  ;;  %vm1751_vm4 = vweird.f32 %v1730_v39  ;;  %v1755_v7 = vand.u32 2147483647, %v1730_v39 }
0x1a7a   :  { %v1758_v52 = vor.u32 1.1754944e-38, %v1757_v17  ;;  %vm1756_vm6 = vcmp.eq.f32.partialorder %v1755_v7, 8.507059e+37 }
0x1a7e   :  { %v2659_v48 = vpop.eup %2658 }
0x1a7f   :  { %v1747_v38 = vmul.f32 %v2659_v48, %v1730_v39  ;;  %vm1752_vm3 = vweird.f32 %v2659_v48 }
0x1a80   :  { %vm1753_vm5 = vmor %vm1751_vm4, %vm1752_vm3 }
0x1a81   :  { %v1748_v54 = vsub.f32 1.0, %v1747_v38 }
0x1a83   :  { %v1749_v47 = vmul.f32 %v2659_v48, %v1748_v54 }
0x1a85   :  { %v1750_v56 = vadd.f32 %v2659_v48, %v1749_v47 }
0x1a87   :  { %v1754_v44 = vsel %vm1753_vm5, %v2659_v48, %v1750_v56 }
0x1a88   :  { %v1759_v4 = vsel %vm1756_vm6, %v1758_v52, %v1754_v44 }
0x1ae7   :  { %v1776_v50 = vpop.permute.xlu0 %1775 }
0x1ae8   :  { %v1778_v29 = vmul.f32 %v1776_v50, %v1759_v4 }
0x1aea   :  { %v1781_v20 = vpack.c.bf16 %v1778_v29, %v1778_v29  ;;  %v1972_v59 = vmax.f32 %v1778_v29, 0.0 }
0x1aec   :  { %v1977_v18 = vpack.c.bf16 %v1972_v59, %v1971_v19  ;;  %2407 = vmatmul.msk.bf16.vlgmr.msra.gmra.mxu0 %vm247_vm11, %v1781_v20  ;;  %2408 = vmatmul.msk.bf16.vlgmr.msra.gmra.mxu1 %vm247_vm11, %v1781_v20  ;;  %v3656_v27 = vpack.c.bf16 %v1971_v19, %v1972_v59 }
0x1afc   :  { %2435 = vmatmul.msk.bf16.vlgmr.msrb.gmra.mxu1 %vm126_vm0, %v3542_v12 }
0x1b0c   :  { %2436 = vmatmul.msk.bf16.gmra.mxu1 %vm126_vm0, %v3605_v8 }
0x1b1c   :  { %2437 = vmatmul.msk.bf16.gmra.mxu1 %vm126_vm0, %v1977_v18 }
0x1b69   :  { %v1794_v1 = vpop.f32.mrf.mxu0  ;;  %v1807_v24 = vpop.f32.mrf.mxu1 }
0x1b6a   :  { %v1811_v58 = vadd.f32 %v1794_v1, %v1779_v30  ;;  %v1812_v53 = vadd.f32 %v1807_v24, %v1780_v55 }
0x1b6c   :  { %2660 = vtanh.f32 %v1812_v53  ;;  %v2409_v36 = vmul.f32 -1.442695, %v1811_v58  ;;  %v2410_v45 = vmul.f32 -1.442695, %v1812_v53 }
0x1b6e   :  { %2662 = vpow2.f32 %v2409_v36 }
0x1b71   :  { %v1796_v12 = vpop.f32.mrf.mxu0  ;;  %v1809_v49 = vpop.f32.mrf.mxu1 }
0x1b72   :  { %v2661_v8 = vpop.eup %2660 }
0x1b73   :  { %1854 = vrot.lane.b32.xlu1 %v2661_v8, %s2685_s3 }
0x1b74   :  { %v2663_v61 = vpop.eup %2662 }
0x1b75   :  { %v1819_v32 = vadd.f32 1.0, %v2663_v61 }
0x1b77   :  { %2664 = vrcp.f32 %v1819_v32  ;;  %v1832_v6 = vand.u32 2147483648, %v1819_v32  ;;  %vm1826_vm8 = vweird.f32 %v1819_v32  ;;  %v1830_v22 = vand.u32 2147483647, %v1819_v32 }
0x1b79   :  { %v1833_v55 = vor.u32 1.1754944e-38, %v1832_v6  ;;  %vm1831_vm10 = vcmp.eq.f32.partialorder %v1830_v22, 8.507059e+37 }
0x1b7d   :  { %v2665_v28 = vpop.eup %2664 }
0x1b7e   :  { %v1822_v60 = vmul.f32 %v2665_v28, %v1819_v32  ;;  %vm1827_vm7 = vweird.f32 %v2665_v28 }
0x1b7f   :  { %vm1828_vm9 = vmor %vm1826_vm8, %vm1827_vm7 }
0x1b80   :  { %v1823_v10 = vsub.f32 1.0, %v1822_v60 }
0x1b82   :  { %v1824_v30 = vmul.f32 %v2665_v28, %v1823_v10 }
0x1b84   :  { %v1825_v23 = vadd.f32 %v2665_v28, %v1824_v30  ;;  %v2474_v30 = vld [vmem:[%s3760_s7 + $0x10] sm:$0xff] }
0x1b86   :  { %v1829_v33 = vsel %vm1828_vm9, %v2665_v28, %v1825_v23  ;;  %vm2149_vm9 = vcmask 64512  }
0x1b87   :  { %v1834_v41 = vsel %vm1831_vm10, %v1833_v55, %v1829_v33  ;;  %vm2151_vm10 = vcmask 130048  }
0x1b88   :  { %v1852_v5 = vmul.f32 %v1834_v41, %v3643_v40 }
0x1be5   :  { %v1855_v25 = vpop.permute.xlu1 %1854 }
0x1be6   :  { %v1857_v13 = vmul.f32 %v1855_v25, %v1834_v41 }
0x1be8   :  { %1859 = vrot.lane.b32.xlu2 %v1857_v13, %s2685_s3 }
0x1c42   :  { %v1860_v11 = vpop.permute.xlu2 %1859 }
0x1c43   :  { %v1862_v9 = vadd.f32 %v1860_v11, %v1852_v5 }
0x1c45   :  { %2666 = vtanh.f32 %v1862_v9 }
0x1c46   :  { %2668 = vpow2.f32 %v2410_v45 }
0x1c4b   :  { %v2667_v21 = vpop.eup %2666 }
0x1c4c   :  { %1865 = vrot.lane.b32.xlu0 %v2667_v21, %s2685_s3  ;;  %v2669_v34 = vpop.eup %2668 }
0x1c4d   :  { %v1820_v42 = vadd.f32 1.0, %v2669_v34 }
0x1c4f   :  { %2670 = vrcp.f32 %v1820_v42  ;;  %v1847_v35 = vand.u32 2147483648, %v1820_v42  ;;  %vm1841_vm13 = vweird.f32 %v1820_v42  ;;  %v1845_v40 = vand.u32 2147483647, %v1820_v42 }
0x1c51   :  { %v1848_v48 = vor.u32 1.1754944e-38, %v1847_v35  ;;  %vm1846_vm15 = vcmp.eq.f32.partialorder %v1845_v40, 8.507059e+37 }
0x1c55   :  { %v2671_v51 = vpop.eup %2670 }
0x1c56   :  { %v1837_v26 = vmul.f32 %v2671_v51, %v1820_v42  ;;  %vm1842_vm12 = vweird.f32 %v2671_v51 }
0x1c57   :  { %vm1843_vm14 = vmor %vm1841_vm13, %vm1842_vm12  ;;  %vm2153_vm12 = vcmask 195584   ;;  %vm2156_vm13 = vcmask 326656  }
0x1c58   :  { %v1838_v63 = vsub.f32 1.0, %v1837_v26  ;;  %v2081_v26 = vpop.f32.mrf.mxu1 }
0x1c5a   :  { %v1839_v16 = vmul.f32 %v2671_v51, %v1838_v63 }
0x1c5c   :  { %v1840_v39 = vadd.f32 %v2671_v51, %v1839_v16  ;;  %v2490_v16 = vld [vmem:[%s3761_s8] ss:$0 sm:$0xff]  ;;  %s2689_s8 = smov 24  }
0x1c5e   :  { %v1844_v15 = vsel %vm1843_vm14, %v2671_v51, %v1840_v39  ;;  %vm2158_vm14 = vcmask 392192  }
0x1c5f   :  { %v1849_v38 = vsel %vm1846_vm15, %v1848_v48, %v1844_v15  ;;  %vm2160_vm15 = vcmask 457728  }
0x1c60   :  { %v2083_v63 = vpop.f32.mrf.mxu1 }
0x1c68   :  { %v2086_v40 = vpop.f32.mrf.mxu1 }
0x1cbe   :  { %v1866_v54 = vpop.permute.xlu0 %1865 }
0x1cbf   :  { %v3677_v47 = vmul.f32 %v1866_v54, %v1849_v38 }
0x1cc1   :  { %v1871_v56 = vpack.c.bf16 %v3677_v47, %v3677_v47  ;;  %v1973_v5 = vmax.f32 %v3677_v47, 0.0 }
0x1cc3   :  { %2411 = vmatmul.msk.bf16.vlgmr.msrb.gmra.mxu2 %vm247_vm11, %v1871_v56  ;;  %2412 = vmatmul.msk.bf16.vlgmr.msrb.gmra.mxu3 %vm247_vm11, %v1871_v56 }
0x1d46   :  { %v1884_v17 = vpop.f32.mrf.mxu2  ;;  %v1897_v7 = vpop.f32.mrf.mxu3 }
0x1d47   :  { %v1901_v44 = vadd.f32 %v1884_v17, %v1869_v0  ;;  %v1902_v52 = vadd.f32 %v1897_v7, %v1870_v62  ;;  %v2088_v17 = vpop.f32.mrf.mxu1 }
0x1d49   :  { %2672 = vtanh.f32 %v1902_v52  ;;  %v2413_v19 = vmul.f32 -1.442695, %v1901_v44  ;;  %v2414_v36 = vmul.f32 -1.442695, %v1902_v52 }
0x1d4b   :  { %2674 = vpow2.f32 %v2413_v19 }
0x1d4e   :  { %v1886_v4 = vpop.f32.mrf.mxu2  ;;  %v1899_v50 = vpop.f32.mrf.mxu3 }
0x1d4f   :  { %v2673_v29 = vpop.eup %2672 }
0x1d50   :  { %1944 = vrot.lane.b32.xlu1 %v2673_v29, %s2685_s3  ;;  %v2091_v29 = vpop.f32.mrf.mxu1 }
0x1d51   :  { %v2675_v20 = vpop.eup %2674 }
0x1d52   :  { %v1909_v2 = vadd.f32 1.0, %v2675_v20 }
0x1d54   :  { %2676 = vrcp.f32 %v1909_v2  ;;  %v1922_v18 = vand.u32 2147483648, %v1909_v2  ;;  %vm1916_vm1 = vweird.f32 %v1909_v2  ;;  %v1920_v31 = vand.u32 2147483647, %v1909_v2 }
0x1d56   :  { %v1923_v62 = vor.u32 1.1754944e-38, %v1922_v18  ;;  %vm1921_vm4 = vcmp.eq.f32.partialorder %v1920_v31, 8.507059e+37 }
0x1d5a   :  { %v2677_v59 = vpop.eup %2676 }
0x1d5b   :  { %v1912_v46 = vmul.f32 %v2677_v59, %v1909_v2  ;;  %vm1917_vm2 = vweird.f32 %v2677_v59 }
0x1d5c   :  { %vm1918_vm3 = vmor %vm1916_vm1, %vm1917_vm2  ;;  %vm2197_vm2 = vcmask 23552  }
0x1d5d   :  { %v1913_v37 = vsub.f32 1.0, %v1912_v46 }
0x1d5f   :  { %v1914_v0 = vmul.f32 %v2677_v59, %v1913_v37  ;;  %v2093_v37 = vpop.f32.mrf.mxu1 }
0x1d61   :  { %v1915_v57 = vadd.f32 %v2677_v59, %v1914_v0 }
0x1d63   :  { %v1919_v3 = vsel %vm1918_vm3, %v2677_v59, %v1915_v57 }
0x1d64   :  { %v1924_v24 = vsel %vm1921_vm4, %v1923_v62, %v1919_v3 }
0x1d65   :  { %v1942_v53 = vmul.f32 %v1924_v24, %v1862_v9 }
0x1dc2   :  { %v1945_v1 = vpop.permute.xlu1 %1944 }
0x1dc3   :  { %v1947_v58 = vmul.f32 %v1945_v1, %v1924_v24 }
0x1dc5   :  { %1949 = vrot.lane.b32.xlu2 %v1947_v58, %s2685_s3 }
0x1dcd   :  { %1989 = vrot.lane.b32.xlu2 %v3656_v27, %s2686_s2  ;;  %v2475_v27 = vld [vmem:[%s3760_s7 + $0x18] sm:$0xff] }
0x1dce   :  { %2025 = vmatpush.bf16.msrb.mxu0 %v2475_v27  ;;  %v2165_v27 = vld [vmem:[%s3763_s9 + $0x18] sm:$0xff] }
0x1dd2   :  { %2026 = vmatpush.bf16.msrb.mxu0 %v2474_v30  ;;  %v2163_v30 = vld [vmem:[%s3763_s9 + $0x8] sm:$0xff] }
0x1e1f   :  { %v1950_v12 = vpop.permute.xlu2 %1949 }
0x1e20   :  { %v1952_v49 = vadd.f32 %v1950_v12, %v1942_v53 }
0x1e22   :  { %2678 = vtanh.f32 %v1952_v49 }
0x1e23   :  { %2680 = vpow2.f32 %v2414_v36 }
0x1e27   :  { %v1990_v34 = vpop.permute.xlu2 %1989 }
0x1e28   :  { %v2679_v8 = vpop.eup %2678 }
0x1e29   :  { %1955 = vrot.lane.b32.xlu0 %v2679_v8, %s2685_s3  ;;  %v2681_v61 = vpop.eup %2680 }
0x1e2a   :  { %v1910_v32 = vadd.f32 1.0, %v2681_v61  ;;  %v2169_v61 = vld [vmem:[%s3763_s9 + $0x38] sm:$0xff] }
0x1e2b   :  { %2185 = vmatpush.msra.mxu2 %v2169_v61 }
0x1e2c   :  { %2682 = vrcp.f32 %v1910_v32  ;;  %v1937_v6 = vand.u32 2147483648, %v1910_v32  ;;  %vm1931_vm6 = vweird.f32 %v1910_v32  ;;  %v1935_v22 = vand.u32 2147483647, %v1910_v32 }
0x1e2e   :  { %v1938_v55 = vor.u32 1.1754944e-38, %v1937_v6  ;;  %vm1936_vm8 = vcmp.eq.f32.partialorder %v1935_v22, 8.507059e+37 }
0x1e31   :  { %1991 = vrot.lane.b32.xlu0 %v3609_v43, %s2686_s2 }
0x1e32   :  { %v2683_v28 = vpop.eup %2682 }
0x1e33   :  { %v1927_v60 = vmul.f32 %v2683_v28, %v1910_v32  ;;  %vm1932_vm5 = vweird.f32 %v2683_v28  ;;  %v2168_v32 = vld [vmem:[%s3763_s9 + $0x30] sm:$0xff] }
0x1e34   :  { %vm1933_vm7 = vmor %vm1931_vm6, %vm1932_vm5  ;;  %2186 = vmatpush.msra.mxu2 %v2168_v32 }
0x1e35   :  { %v1928_v10 = vsub.f32 1.0, %v1927_v60  ;;  %v2166_v60 = vld [vmem:[%s3763_s9 + $0x20] sm:$0xff] }
0x1e37   :  { %v1929_v23 = vmul.f32 %v2683_v28, %v1928_v10  ;;  %v2164_v10 = vld [vmem:[%s3763_s9 + $0x10] sm:$0xff] }
0x1e39   :  { %v1930_v43 = vadd.f32 %v2683_v28, %v1929_v23  ;;  %v2162_v23 = vld [vmem:[%s3763_s9] sm:$0xff] }
0x1e3b   :  { %v1934_v33 = vsel %vm1933_vm7, %v2683_v28, %v1930_v43  ;;  %v2167_v28 = vld [vmem:[%s3763_s9 + $0x28] sm:$0xff] }
0x1e3c   :  { %v1939_v25 = vsel %vm1936_vm8, %v1938_v55, %v1934_v33  ;;  %2187 = vmatpush.msra.mxu2 %v2167_v28 }
0x1e3e   :  { %2188 = vmatpush.msra.mxu2 %v2166_v60 }
0x1e40   :  { %2189 = vmatpush.msra.mxu2 %v2165_v27 }
0x1e42   :  { %2190 = vmatpush.msra.mxu2 %v2164_v10 }
0x1e44   :  { %2191 = vmatpush.msra.mxu2 %v2163_v30 }
0x1e46   :  { %2192 = vmatpush.msra.mxu2 %v2162_v23 }
0x1e9b   :  { %v1956_v41 = vpop.permute.xlu0 %1955 }
0x1e9c   :  { %v1958_v13 = vmul.f32 %v1956_v41, %v1939_v25 }
0x1e9e   :  { %v1974_v11 = vmax.f32 %v1958_v13, 0.0 }
0x1ea0   :  { %v1978_v9 = vpack.c.bf16 %v1974_v11, %v1973_v5  ;;  %v1979_v21 = vpack.c.bf16 %v1973_v5, %v1974_v11 }
0x1ea2   :  { %1987 = vrot.lane.b32.xlu1 %v1979_v21, %s2686_s2  ;;  %2438 = vmatmul.msk.bf16.gmra.mxu1 %vm126_vm0, %v1978_v9 }
0x1ea3   :  { %v1992_v42 = vpop.permute.xlu0 %1991 }
0x1eaa   :  { %1993 = vrot.lane.b32.xlu1 %v3546_v14, %s2686_s2  ;;  %s2687_s2 = smov 8  }
0x1f14   :  { %v1988_v45 = vpop.permute.xlu1 %1987 }
0x1f15   :  { %2423 = vmatmul.msk.bf16.vlgmr.msrb.gmra.mxu0 %vm126_vm0, %v1988_v45 }
0x1f1c   :  { %v1994_v51 = vpop.permute.xlu1 %1993 }
0x1f1f   :  { %v2096_v3 = vpop.f32.mrf.mxu1 }
0x1f25   :  { %2424 = vmatmul.msk.bf16.gmra.mxu0 %vm126_vm0, %v1990_v34 }
0x1f27   :  { %v2098_v53 = vpop.f32.mrf.mxu1 }
0x1f35   :  { %2425 = vmatmul.msk.bf16.gmra.mxu0 %vm126_vm0, %v1992_v42 }
0x1f45   :  { %2426 = vmatmul.msk.bf16.gmra.mxu0 %vm126_vm0, %v1994_v51  ;;  %v2491_v51 = vld [vmem:[%s3762_s10] ss:$0 sm:$0xff] }
0x1f92   :  { %v2028_v39 = vpop.f32.mrf.mxu0 }
0x1f93   :  { %v2082_v14 = vadd.f32 %v2081_v26, %v2028_v39 }
0x1f95   :  { %v3718_v35 = vadd.f32 %v2490_v16, %v2082_v14 }
0x1f97   :  { %v2113_v22 = vmax.f32 %v3718_v35, 0.0 }
0x1f9a   :  { %v2030_v15 = vpop.f32.mrf.mxu0 }
0x1f9b   :  { %v2084_v48 = vadd.f32 %v2083_v63, %v2030_v15 }
0x1f9d   :  { %v2106_v38 = vadd.f32 %v2490_v16, %v2084_v48 }
0x1f9f   :  { %v2114_v54 = vmax.f32 %v2106_v38, 0.0 }
0x1fa1   :  { %2122 = vrot.lane.b32.xlu2 %v2114_v54, %s2687_s2 }
0x1fa2   :  { %v2033_v47 = vpop.f32.mrf.mxu0 }
0x1fa3   :  { %v2087_v56 = vadd.f32 %v2086_v40, %v2033_v47 }
0x1fa5   :  { %v2107_v7 = vadd.f32 %v2490_v16, %v2087_v56 }
0x1fa7   :  { %v2115_v44 = vmax.f32 %v2107_v7, 0.0 }
0x1fa9   :  { %2126 = vrot.lane.b32.xlu0 %v2115_v44, %s2688_s20 }
0x1faa   :  { %v2035_v52 = vpop.f32.mrf.mxu0 }
0x1fab   :  { %v2089_v4 = vadd.f32 %v2088_v17, %v2035_v52 }
0x1fad   :  { %v2108_v50 = vadd.f32 %v2490_v16, %v2089_v4 }
0x1faf   :  { %v2116_v19 = vmax.f32 %v2108_v50, 0.0 }
0x1fb1   :  { %2130 = vrot.lane.b32.xlu1 %v2116_v19, %s2689_s8 }
0x1fb2   :  { %v2038_v20 = vpop.f32.mrf.mxu0 }
0x1fb3   :  { %v2092_v2 = vadd.f32 %v2091_v29, %v2038_v20 }
0x1fb5   :  { %v2109_v59 = vadd.f32 %v2490_v16, %v2092_v2 }
0x1fb7   :  { %v2117_v46 = vmax.f32 %v2109_v59, 0.0 }
0x1fb9   :  { %2134 = vrot.lane.b32.xlu2 %v2117_v46, %s2690_s21 }
0x1fba   :  { %v2040_v0 = vpop.f32.mrf.mxu0 }
0x1fbb   :  { %v2094_v57 = vadd.f32 %v2093_v37, %v2040_v0 }
0x1fbd   :  { %v2110_v18 = vadd.f32 %v2490_v16, %v2094_v57 }
0x1fbf   :  { %v2118_v31 = vmax.f32 %v2110_v18, 0.0 }
0x1fc1   :  { %2138 = vrot.lane.b32.xlu0 %v2118_v31, %s2691_s22 }
0x1fc2   :  { %v2043_v62 = vpop.f32.mrf.mxu0 }
0x1fc3   :  { %v2097_v1 = vadd.f32 %v2096_v3, %v2043_v62 }
0x1fc5   :  { %v2111_v24 = vadd.f32 %v2490_v16, %v2097_v1 }
0x1fc7   :  { %v2119_v58 = vmax.f32 %v2111_v24, 0.0 }
0x1fc9   :  { %2142 = vrot.lane.b32.xlu1 %v2119_v58, %s2692_s23 }
0x1fca   :  { %v2045_v12 = vpop.f32.mrf.mxu0 }
0x1fcb   :  { %v2099_v49 = vadd.f32 %v2098_v53, %v2045_v12 }
0x1fcd   :  { %v2112_v8 = vadd.f32 %v2490_v16, %v2099_v49 }
0x1fcf   :  { %v2120_v36 = vmax.f32 %v2112_v8, 0.0 }
0x1fd1   :  { %2146 = vrot.lane.b32.xlu2 %v2120_v36, %s2693_s4 }
0x1ffb   :  { %v2123_v43 = vpop.permute.xlu2 %2122 }
0x1ffc   :  { %v2150_v25 = vsel %vm2149_vm9, %v2113_v22, %v2123_v43 }
0x2013   :  { %v2135_v55 = vpop.permute.xlu2 %2134 }
0x201b   :  { %v2127_v6 = vpop.permute.xlu0 %2126 }
0x201c   :  { %v2152_v41 = vsel %vm2151_vm10, %v2150_v25, %v2127_v6 }
0x2023   :  { %v2131_v33 = vpop.permute.xlu1 %2130 }
0x2024   :  { %v2154_v13 = vsel %vm2153_vm12, %v2152_v41, %v2131_v33 }
0x2025   :  { %v2155_v11 = vsel %vm126_vm0, %v2154_v13, %v2135_v55 }
0x202b   :  { %v2147_v45 = vpop.permute.xlu2 %2146 }
0x2033   :  { %v2139_v5 = vpop.permute.xlu0 %2138 }
0x2034   :  { %v2157_v9 = vsel %vm2156_vm13, %v2155_v11, %v2139_v5 }
0x203b   :  { %v2143_v21 = vpop.permute.xlu1 %2142 }
0x203c   :  { %v2159_v34 = vsel %vm2158_vm14, %v2157_v9, %v2143_v21 }
0x203d   :  { %v2161_v42 = vsel %vm2160_vm15, %v2159_v34, %v2147_v45 }
0x203e   :  { %2439 = vmatmul.msk.f32.vlgmr.msra.gmra.mxu2 %vm247_vm11, %v2161_v42 }
0x20c1   :  { %v2194_v26 = vpop.f32.mrf.mxu2 }
0x20c2   :  { %v2195_v63 = vadd.f32 %v2491_v51, %v2194_v26 }
0x20c4   :  { %2198 = vst.msk [vmem:[%s3764_s11] sm:$0xff] %vm2197_vm2, %v2195_v63 }

</bundles_post_ra>
